<compile_context>
chip_gen: v7x
topology: tpu7x:2x2x1
jax: 0.10.0
libtpu: 0.0.40
codegen_flags: <defaults>
</compile_context>

<pallas_src>
import functools

import jax
import jax.numpy as jnp
import numpy as np
from jax import lax
from jax.experimental import pallas as pl
from jax.experimental.pallas import tpu as pltpu


def _live_dh_pairs(D, H, dil):
    """(kd, kh) taps of the 3x3x3 dilated conv whose D/H patch overlaps the
    interior of the zero-padded volume (padding == dilation).  Dead pairs read
    only zeros and are pruned at compile time."""
    p = dil
    pairs = []
    for kd in range(3):
        dd = kd * dil
        if dd + D <= p or dd >= p + D:
            continue
        for kh in range(3):
            hh = kh * dil
            if hh + H <= p or hh >= p + H:
                continue
            pairs.append((kd, kh))
    return tuple(pairs)


def _bam_kernel(x_ref,
                wfc1_ref, bfc1_ref, wfc2_ref, bfc2_ref,
                wred_ref, red_sc_ref, red_sh_ref,
                wd1_ref, d1_sc_ref, d1_sh_ref,
                wd2_ref, d2_sc_ref, d2_sh_ref,
                wfin_ref, bfin_ref,
                o_ref,
                ypad_ref,
                *, D, H, dil, live_pairs):
    """One batch element.  x_ref/o_ref are (D*H, W*C) with lane = w*C + c;
    mid intermediates use lane = w*mid + m; the convs' W taps (and W zero
    padding) live inside the host-built banded weights."""
    p = dil
    R, WC = x_ref.shape                       # R = D*H
    Wm = wred_ref.shape[1]                    # W * mid
    Dp, Hp = D + 2 * p, H + 2 * p

    # Zero only the D/H halo slabs; the interior is fully overwritten before
    # each conv, and the W halo was eliminated by folding it into the weights.
    zf = lambda s: jnp.zeros(s, ypad_ref.dtype)
    ypad_ref[0:p, :, :] = zf((p, Hp, Wm))
    ypad_ref[p + D:Dp, :, :] = zf((p, Hp, Wm))
    ypad_ref[p:p + D, 0:p, :] = zf((D, p, Wm))
    ypad_ref[p:p + D, p + H:Hp, :] = zf((D, p, Wm))

    x2d = x_ref[...]                          # (R, WC) f32, lane-dense

    # ---- channel attention: global average pool -> 2-layer MLP -------------
    # wfc1_ref already holds wfc1 / (D*H*W) tiled over w, so a plain column
    # sum followed by one matmul computes relu(W1 @ mean(x) + b1) exactly.
    colsum = jnp.sum(x2d, axis=0, keepdims=True)                  # (1, WC)
    h = jnp.dot(colsum, wfc1_ref[...], preferred_element_type=jnp.float32)
    h = jnp.maximum(h + bfc1_ref[...], 0.0)                       # (1, mid)
    ca = jnp.dot(h, wfc2_ref[...], preferred_element_type=jnp.float32)
    ca = ca + bfc2_ref[...]                                       # (1, WC)

    # ---- spatial attention ---------------------------------------------------
    # 1x1x1 reduce conv (+ folded BN) + ReLU: block-diagonal matmul keeps the
    # result directly in the interleaved (R, W*mid) layout.
    y = jnp.dot(x2d, wred_ref[...], preferred_element_type=jnp.float32)
    y = jnp.maximum(y * red_sc_ref[...] + red_sh_ref[...], 0.0)   # (R, Wm)

    def dilated_conv_bn_relu(w_ref, sc_ref, sh_ref, y_in):
        # Stage the activation into the interior of the D/H-padded scratch;
        # the zero halo reproduces PyTorch's zero padding along D and H, the
        # W padding is handled by the band structure of w_ref.
        ypad_ref[p:p + D, p:p + H, :] = y_in.reshape(D, H, Wm)
        parts = []
        for t, (kd, kh) in enumerate(live_pairs):     # dead taps pruned
            patch = ypad_ref[kd * dil:kd * dil + D,
                             kh * dil:kh * dil + H, :].reshape(R, Wm)
            parts.append(jnp.dot(patch, w_ref[t],
                                 preferred_element_type=jnp.float32))
        while len(parts) > 1:                         # balanced tree-sum
            nxt = [parts[i] + parts[i + 1] for i in range(0, len(parts) - 1, 2)]
            if len(parts) % 2:
                nxt.append(parts[-1])
            parts = nxt
        return jnp.maximum(parts[0] * sc_ref[...] + sh_ref[...], 0.0)

    y = dilated_conv_bn_relu(wd1_ref, d1_sc_ref, d1_sh_ref, y)
    y = dilated_conv_bn_relu(wd2_ref, d2_sc_ref, d2_sh_ref, y)

    # 1x1x1 final conv back up to C channels (block-diagonal matmul).
    sa = jnp.dot(y, wfin_ref[...], preferred_element_type=jnp.float32)
    sa = sa + bfin_ref[...]                                       # (R, WC)

    # ---- BAM combine: out = (1 + sigmoid(ca * sa)) * x ----------------------
    z = ca * sa                                                   # (1,WC)*(R,WC)
    att = 1.0 + 1.0 / (1.0 + jnp.exp(-z))          # exp on EUP, exact divide
    o_ref[...] = (att * x2d).astype(o_ref.dtype)


def bam_forward(x_ncdhw, params, *, eps=1e-5, dilation=4):
    """x_ncdhw: (N, C, D, H, W) float32.  Returns (N, C, D, H, W)."""
    N, C, D, H, W = x_ncdhw.shape
    mid = params["wfc1"].shape[1]
    S = D * H * W
    R, WC, Wm = D * H, W * C, W * mid
    p = dilation
    f32 = jnp.float32

    live_pairs = _live_dh_pairs(D, H, dilation)
    n_live = len(live_pairs)

    # Layout glue: NCDHW -> (N, D*H, W*C); lane index = w*C + c (lane-dense).
    x_lay = jnp.transpose(x_ncdhw, (0, 2, 3, 4, 1)).reshape(N, R, WC).astype(f32)

    eyeW = jnp.eye(W, dtype=f32)

    def block_diag_in_out(w_io):        # (Cin, Cout) -> (W*Cin, W*Cout)
        ci, co = w_io.shape
        return jnp.einsum("wv,io->wivo", eyeW,
                          w_io.astype(f32)).reshape(W * ci, W * co)

    def tile_w(v, n):                   # (n,) per-channel -> (1, W*n)
        return jnp.tile(v.reshape(1, n).astype(f32), (1, W))

    def fold_bn(gamma, beta, mean, var, conv_bias):
        sc = gamma / jnp.sqrt(var + eps)
        sh = beta + (conv_bias - mean) * sc
        return tile_w(sc, mid), tile_w(sh, mid)

    def band_weights(w_oidhw):
        """Per live (kd, kh) pair, a (W*mid, W*mid) matrix M with
        M[w_in*mid + ci, w*mid + co] = K[co, ci, kd, kh, kw] for
        w_in = w + (kw-1)*dil inside [0, W); zero otherwise.  Folds the W-axis
        taps and the W-boundary zero padding exactly into the weight."""
        w5 = w_oidhw.astype(f32)                      # (O=mid, I=mid, 3, 3, 3)
        mats = []
        for (kd, kh) in live_pairs:
            m = jnp.zeros((Wm, Wm), f32)
            for kw in range(3):
                shift = np.zeros((W, W), np.float32)  # static band pattern
                for w in range(W):
                    w_in = w + (kw - 1) * dilation
                    if 0 <= w_in < W:
                        shift[w_in, w] = 1.0
                if not shift.any():
                    continue
                tap = jnp.transpose(w5[:, :, kd, kh, kw])       # (ci, co)
                m = m + jnp.einsum("uv,io->uivo", jnp.asarray(shift),
                                   tap).reshape(Wm, Wm)
            mats.append(m)
        return jnp.stack(mats)                        # (n_live, Wm, Wm)

    # Channel-attention MLP (global mean folded into the first layer weights).
    wfc1_big = jnp.tile(params["wfc1"].astype(f32), (W, 1)) / float(S)  # (WC, mid)
    bfc1 = params["bfc1"].reshape(1, mid).astype(f32)
    wfc2_big = jnp.tile(params["wfc2"].astype(f32), (1, W))             # (mid, WC)
    bfc2_big = tile_w(params["bfc2"], C)                                # (1, WC)

    # Spatial-attention weights.
    wred_big = block_diag_in_out(params["wred"])                        # (WC, Wm)
    red_sc, red_sh = fold_bn(params["bn1_g"], params["bn1_b"],
                             params["bn1_m"], params["bn1_v"], params["bred"])
    wd1_band = band_weights(params["wd1"])
    d1_sc, d1_sh = fold_bn(params["bn2_g"], params["bn2_b"],
                           params["bn2_m"], params["bn2_v"], params["bd1"])
    wd2_band = band_weights(params["wd2"])
    d2_sc, d2_sh = fold_bn(params["bn3_g"], params["bn3_b"],
                           params["bn3_m"], params["bn3_v"], params["bd2"])
    wfin_big = block_diag_in_out(params["wfin"])                        # (Wm, WC)
    bfin_big = tile_w(params["bfin"], C)                                # (1, WC)

    kernel = functools.partial(_bam_kernel, D=D, H=H, dil=dilation,
                               live_pairs=live_pairs)

    # Advisory cost estimate for the XLA scheduler.
    flops = N * (2 * R * WC * Wm                  # reduce conv (block-diag)
                 + 2 * 2 * n_live * R * Wm * Wm   # two dilated convs (banded)
                 + 2 * R * Wm * WC                # final conv
                 + 2 * WC * mid + 2 * mid * WC    # channel-attention MLP
                 + 8 * R * WC)                    # elementwise epilogue
    bytes_accessed = 4 * (2 * N * R * WC + WC * mid + mid * WC
                          + WC * Wm + Wm * WC + 2 * n_live * Wm * Wm
                          + 2 * WC + 6 * Wm + mid)
    cost = pl.CostEstimate(flops=int(flops), transcendentals=int(N * R * WC),
                           bytes_accessed=int(bytes_accessed))

    full2d = lambda b: (0, 0)
    full3d = lambda b: (0, 0, 0)

    out_lay = pl.pallas_call(
        kernel,
        out_shape=jax.ShapeDtypeStruct((N, R, WC), f32),
        grid_spec=pltpu.PrefetchScalarGridSpec(
            num_scalar_prefetch=0,
            grid=(N,),
            in_specs=[
                pl.BlockSpec((pl.Squeezed(), R, WC), lambda b: (b, 0, 0)),  # x
                pl.BlockSpec((WC, mid), full2d),         # wfc1 (tiled, /S)
                pl.BlockSpec((1, mid), full2d),          # bfc1
                pl.BlockSpec((mid, WC), full2d),         # wfc2 (tiled over w)
                pl.BlockSpec((1, WC), full2d),           # bfc2 (tiled over w)
                pl.BlockSpec((WC, Wm), full2d),          # wred (block-diag)
                pl.BlockSpec((1, Wm), full2d),           # reduce BN scale
                pl.BlockSpec((1, Wm), full2d),           # reduce BN shift
                pl.BlockSpec((n_live, Wm, Wm), full3d),  # dil conv 1 bands
                pl.BlockSpec((1, Wm), full2d),           # d1 BN scale
                pl.BlockSpec((1, Wm), full2d),           # d1 BN shift
                pl.BlockSpec((n_live, Wm, Wm), full3d),  # dil conv 2 bands
                pl.BlockSpec((1, Wm), full2d),           # d2 BN scale
                pl.BlockSpec((1, Wm), full2d),           # d2 BN shift
                pl.BlockSpec((Wm, WC), full2d),          # wfin (block-diag)
                pl.BlockSpec((1, WC), full2d),           # bfin (tiled over w)
            ],
            out_specs=pl.BlockSpec((pl.Squeezed(), R, WC), lambda b: (b, 0, 0)),
            scratch_shapes=[
                pltpu.VMEM((D + 2 * p, H + 2 * p, Wm), f32)],  # D/H halo only
        ),
        compiler_params=pltpu.CompilerParams(
            dimension_semantics=("parallel",)),   # batch elems independent
        cost_estimate=cost,
    )(x_lay, wfc1_big, bfc1, wfc2_big, bfc2_big, wred_big, red_sc, red_sh,
      wd1_band, d1_sc, d1_sh, wd2_band, d2_sc, d2_sh, wfin_big, bfin_big)

    out = out_lay.reshape(N, D, H, W, C)
    return jnp.transpose(out, (0, 4, 1, 2, 3))


def _bam_ref(x, params, *, eps=1e-5, dilation=4):
    """Pure-JAX reference mirroring the PyTorch BAM forward (eval-mode BN)."""
    hp = lax.Precision.HIGHEST

    def bias5(b):
        return b[None, :, None, None, None]

    # channel attention
    avg = jnp.mean(x, axis=(2, 3, 4))                                  # (N, C)
    h = jnp.maximum(jnp.dot(avg, params["wfc1"], precision=hp)
                    + params["bfc1"], 0.0)
    ca = jnp.dot(h, params["wfc2"], precision=hp) + params["bfc2"]     # (N, C)
    ca = ca[:, :, None, None, None]

    def conv1x1(z, w, b):                                              # w: (Cin, Cout)
        return jnp.einsum("nidhw,io->nodhw", z, w, precision=hp) + bias5(b)

    def bn(z, g, be, m, v):
        inv = g / jnp.sqrt(v + eps)
        return (z - bias5(m)) * bias5(inv) + bias5(be)

    def dconv(z, w_oidhw, b):
        out = lax.conv_general_dilated(
            z, w_oidhw, window_strides=(1, 1, 1),
            padding=[(dilation, dilation)] * 3,
            rhs_dilation=(dilation, dilation, dilation),
            dimension_numbers=("NCDHW", "OIDHW", "NCDHW"),
            precision=hp)
        return out + bias5(b)

    y = jnp.maximum(bn(conv1x1(x, params["wred"], params["bred"]),
                       params["bn1_g"], params["bn1_b"],
                       params["bn1_m"], params["bn1_v"]), 0.0)
    y = jnp.maximum(bn(dconv(y, params["wd1"], params["bd1"]),
                       params["bn2_g"], params["bn2_b"],
                       params["bn2_m"], params["bn2_v"]), 0.0)
    y = jnp.maximum(bn(dconv(y, params["wd2"], params["bd2"]),
                       params["bn3_g"], params["bn3_b"],
                       params["bn3_m"], params["bn3_v"]), 0.0)
    sa = conv1x1(y, params["wfin"], params["bfin"])
    att = 1.0 + jax.nn.sigmoid(ca * sa)
    return att * x


if __name__ == "__main__":
    # channel must be >= reduction (=16); C=128 keeps the lane axis dense.
    N, C, D, H, W = 2, 128, 4, 8, 8
    reduction, dilation = 16, 4
    mid = C // reduction                      # 8

    key = jax.random.PRNGKey(0)
    ks = jax.random.split(key, 25)

    def nrm(k, shape, scale):
        return jax.random.normal(k, shape, dtype=jnp.float32) * scale

    x = nrm(ks[0], (N, C, D, H, W), 1.0)

    sC = 1.0 / jnp.sqrt(jnp.float32(C))
    sM = 1.0 / jnp.sqrt(jnp.float32(mid))
    sK = 1.0 / jnp.sqrt(jnp.float32(mid * 27))

    params = {
        # channel-attention MLP (stored (in, out))
        "wfc1": nrm(ks[1], (C, mid), sC), "bfc1": nrm(ks[2], (mid,), 0.05),
        "wfc2": nrm(ks[3], (mid, C), sM), "bfc2": nrm(ks[4], (C,), 0.05),
        # spatial attention: 1x1x1 reduce conv + BN1
        "wred": nrm(ks[5], (C, mid), sC), "bred": nrm(ks[6], (mid,), 0.05),
        "bn1_g": 1.0 + nrm(ks[7], (mid,), 0.1), "bn1_b": nrm(ks[8], (mid,), 0.1),
        "bn1_m": nrm(ks[9], (mid,), 0.1),
        "bn1_v": 0.5 + jax.random.uniform(ks[10], (mid,), dtype=jnp.float32),
        # dilated conv 1 (OIDHW) + BN2
        "wd1": nrm(ks[11], (mid, mid, 3, 3, 3), sK), "bd1": nrm(ks[12], (mid,), 0.05),
        "bn2_g": 1.0 + nrm(ks[13], (mid,), 0.1), "bn2_b": nrm(ks[14], (mid,), 0.1),
        "bn2_m": nrm(ks[15], (mid,), 0.1),
        "bn2_v": 0.5 + jax.random.uniform(ks[16], (mid,), dtype=jnp.float32),
        # dilated conv 2 (OIDHW) + BN3
        "wd2": nrm(ks[17], (mid, mid, 3, 3, 3), sK), "bd2": nrm(ks[18], (mid,), 0.05),
        "bn3_g": 1.0 + nrm(ks[19], (mid,), 0.1), "bn3_b": nrm(ks[20], (mid,), 0.1),
        "bn3_m": nrm(ks[21], (mid,), 0.1),
        "bn3_v": 0.5 + jax.random.uniform(ks[22], (mid,), dtype=jnp.float32),
        # final 1x1x1 conv
        "wfin": nrm(ks[23], (mid, C), sM), "bfin": nrm(ks[24], (C,), 0.05),
    }

    out = bam_forward(x, params, dilation=dilation)
    out = jax.block_until_ready(out)

    ref = _bam_ref(x, params, dilation=dilation)
    assert out.shape == (N, C, D, H, W)
    max_err = float(jnp.max(jnp.abs(out - ref)))
    assert jnp.allclose(out, ref, atol=5e-4, rtol=5e-4), max_err

    print("KERNEL_OK")
</pallas_src>

<mosaic_0001>
module attributes {stable_mosaic.version = 11 : i64} {
  func.func @_bam_kernel(%arg0: i32, %arg1: memref<1x32x1024xf32, #tpu.memory_space<vmem>>, %arg2: memref<1024x8xf32, #tpu.memory_space<vmem>>, %arg3: memref<1x8xf32, #tpu.memory_space<vmem>>, %arg4: memref<8x1024xf32, #tpu.memory_space<vmem>>, %arg5: memref<1x1024xf32, #tpu.memory_space<vmem>>, %arg6: memref<1024x64xf32, #tpu.memory_space<vmem>>, %arg7: memref<1x64xf32, #tpu.memory_space<vmem>>, %arg8: memref<1x64xf32, #tpu.memory_space<vmem>>, %arg9: memref<3x64x64xf32, #tpu.memory_space<vmem>>, %arg10: memref<1x64xf32, #tpu.memory_space<vmem>>, %arg11: memref<1x64xf32, #tpu.memory_space<vmem>>, %arg12: memref<3x64x64xf32, #tpu.memory_space<vmem>>, %arg13: memref<1x64xf32, #tpu.memory_space<vmem>>, %arg14: memref<1x64xf32, #tpu.memory_space<vmem>>, %arg15: memref<64x1024xf32, #tpu.memory_space<vmem>>, %arg16: memref<1x1024xf32, #tpu.memory_space<vmem>>, %arg17: memref<1x32x1024xf32, #tpu.memory_space<vmem>>, %arg18: memref<12x16x64xf32, #tpu.memory_space<vmem>>) attributes {dimension_semantics = [#tpu.dimension_semantics<parallel>], iteration_bounds = array<i64: 2>, scalar_prefetch = 0 : i64, scratch_operands = 1 : i64, tpu.core_type = #tpu.core_type<tc>, window_params = [{transform_indices = @transform_0, window_bounds = array<i64: 1, 32, 1024>}, {pipeline_mode = #tpu.pipeline_mode<synchronous>, transform_indices = @transform_1, window_bounds = array<i64: 1024, 8>}, {pipeline_mode = #tpu.pipeline_mode<synchronous>, transform_indices = @transform_2, window_bounds = array<i64: 1, 8>}, {pipeline_mode = #tpu.pipeline_mode<synchronous>, transform_indices = @transform_3, window_bounds = array<i64: 8, 1024>}, {pipeline_mode = #tpu.pipeline_mode<synchronous>, transform_indices = @transform_4, window_bounds = array<i64: 1, 1024>}, {pipeline_mode = #tpu.pipeline_mode<synchronous>, transform_indices = @transform_5, window_bounds = array<i64: 1024, 64>}, {pipeline_mode = #tpu.pipeline_mode<synchronous>, transform_indices = @transform_6, window_bounds = array<i64: 1, 64>}, {pipeline_mode = #tpu.pipeline_mode<synchronous>, transform_indices = @transform_7, window_bounds = array<i64: 1, 64>}, {pipeline_mode = #tpu.pipeline_mode<synchronous>, transform_indices = @transform_8, window_bounds = array<i64: 3, 64, 64>}, {pipeline_mode = #tpu.pipeline_mode<synchronous>, transform_indices = @transform_9, window_bounds = array<i64: 1, 64>}, {pipeline_mode = #tpu.pipeline_mode<synchronous>, transform_indices = @transform_10, window_bounds = array<i64: 1, 64>}, {pipeline_mode = #tpu.pipeline_mode<synchronous>, transform_indices = @transform_11, window_bounds = array<i64: 3, 64, 64>}, {pipeline_mode = #tpu.pipeline_mode<synchronous>, transform_indices = @transform_12, window_bounds = array<i64: 1, 64>}, {pipeline_mode = #tpu.pipeline_mode<synchronous>, transform_indices = @transform_13, window_bounds = array<i64: 1, 64>}, {pipeline_mode = #tpu.pipeline_mode<synchronous>, transform_indices = @transform_14, window_bounds = array<i64: 64, 1024>}, {pipeline_mode = #tpu.pipeline_mode<synchronous>, transform_indices = @transform_15, window_bounds = array<i64: 1, 1024>}, {transform_indices = @transform_16, window_bounds = array<i64: 1, 32, 1024>}]} {
    %cst = arith.constant 0.000000e+00 : f32
    %0 = vector.broadcast %cst : f32 to vector<4x16x64xf32>
    %c0 = arith.constant 0 : index
    %c0_0 = arith.constant 0 : index
    %c0_1 = arith.constant 0 : index
    %1 = vector.load %arg18[%c0, %c0_0, %c0_1] : memref<12x16x64xf32, #tpu.memory_space<vmem>>, vector<4x16x64xf32>
    tpu.vector_store %arg18[%c0, %c0_0, %c0_1], %0 {strides = array<i32>} : memref<12x16x64xf32, #tpu.memory_space<vmem>>, vector<4x16x64xf32>,
    %cst_2 = arith.constant 0.000000e+00 : f32
    %2 = vector.broadcast %cst_2 : f32 to vector<4x16x64xf32>
    %c8 = arith.constant 8 : index
    %c0_3 = arith.constant 0 : index
    %c0_4 = arith.constant 0 : index
    %3 = vector.load %arg18[%c8, %c0_3, %c0_4] : memref<12x16x64xf32, #tpu.memory_space<vmem>>, vector<4x16x64xf32>
    tpu.vector_store %arg18[%c8, %c0_3, %c0_4], %2 {strides = array<i32>} : memref<12x16x64xf32, #tpu.memory_space<vmem>>, vector<4x16x64xf32>,
    %cst_5 = arith.constant 0.000000e+00 : f32
    %4 = vector.broadcast %cst_5 : f32 to vector<4x4x64xf32>
    %c4 = arith.constant 4 : index
    %c0_6 = arith.constant 0 : index
    %c0_7 = arith.constant 0 : index
    %5 = vector.load %arg18[%c4, %c0_6, %c0_7] : memref<12x16x64xf32, #tpu.memory_space<vmem>>, vector<4x4x64xf32>
    tpu.vector_store %arg18[%c4, %c0_6, %c0_7], %4 {strides = array<i32>} : memref<12x16x64xf32, #tpu.memory_space<vmem>>, vector<4x4x64xf32>,
    %cst_8 = arith.constant 0.000000e+00 : f32
    %6 = vector.broadcast %cst_8 : f32 to vector<4x4x64xf32>
    %c4_9 = arith.constant 4 : index
    %c12 = arith.constant 12 : index
    %c0_10 = arith.constant 0 : index
    %7 = vector.load %arg18[%c4_9, %c12, %c0_10] : memref<12x16x64xf32, #tpu.memory_space<vmem>>, vector<4x4x64xf32>
    tpu.vector_store %arg18[%c4_9, %c12, %c0_10], %6 {strides = array<i32>} : memref<12x16x64xf32, #tpu.memory_space<vmem>>, vector<4x4x64xf32>,
    %c0_11 = arith.constant 0 : index
    %c0_12 = arith.constant 0 : index
    %c0_13 = arith.constant 0 : index
    %8 = vector.load %arg1[%c0_11, %c0_12, %c0_13] : memref<1x32x1024xf32, #tpu.memory_space<vmem>>, vector<1x32x1024xf32>
    %9 = vector.shape_cast %8 : vector<1x32x1024xf32> to vector<32x1024xf32>
    %cst_14 = arith.constant dense<0.000000e+00> : vector<1024xf32>
    %10 = vector.multi_reduction <add>, %9, %cst_14 [0] : vector<32x1024xf32> to vector<1024xf32>
    %11 = vector.shape_cast %10 : vector<1024xf32> to vector<1x1024xf32>
    %c0_15 = arith.constant 0 : index
    %c0_16 = arith.constant 0 : index
    %12 = vector.load %arg2[%c0_15, %c0_16] : memref<1024x8xf32, #tpu.memory_space<vmem>>, vector<1024x8xf32>
    %cst_17 = arith.constant dense<0.000000e+00> : vector<1x8xf32>
    %13 = tpu.matmul %11, %12, %cst_17 {dimension_numbers = #tpu.dot_dimension_numbers<[1], [0], [0], [1], [0, 0, 1, 1], [], []>} : vector<1x1024xf32>, vector<1024x8xf32>, vector<1x8xf32> -> vector<1x8xf32>
    %c0_18 = arith.constant 0 : index
    %c0_19 = arith.constant 0 : index
    %14 = vector.load %arg3[%c0_18, %c0_19] : memref<1x8xf32, #tpu.memory_space<vmem>>, vector<1x8xf32>
    %15 = arith.addf %13, %14 : vector<1x8xf32>
    %cst_20 = arith.constant 0.000000e+00 : f32
    %16 = vector.broadcast %cst_20 : f32 to vector<1x8xf32>
    %17 = arith.maximumf %15, %16 : vector<1x8xf32>
    %c0_21 = arith.constant 0 : index
    %c0_22 = arith.constant 0 : index
    %18 = vector.load %arg4[%c0_21, %c0_22] : memref<8x1024xf32, #tpu.memory_space<vmem>>, vector<8x1024xf32>
    %cst_23 = arith.constant dense<0.000000e+00> : vector<1x1024xf32>
    %19 = tpu.matmul %17, %18, %cst_23 {dimension_numbers = #tpu.dot_dimension_numbers<[1], [0], [0], [1], [0, 0, 1, 1], [], []>} : vector<1x8xf32>, vector<8x1024xf32>, vector<1x1024xf32> -> vector<1x1024xf32>
    %c0_24 = arith.constant 0 : index
    %c0_25 = arith.constant 0 : index
    %20 = vector.load %arg5[%c0_24, %c0_25] : memref<1x1024xf32, #tpu.memory_space<vmem>>, vector<1x1024xf32>
    %21 = arith.addf %19, %20 : vector<1x1024xf32>
    %c0_26 = arith.constant 0 : index
    %c0_27 = arith.constant 0 : index
    %22 = vector.load %arg6[%c0_26, %c0_27] : memref<1024x64xf32, #tpu.memory_space<vmem>>, vector<1024x64xf32>
    %cst_28 = arith.constant dense<0.000000e+00> : vector<32x64xf32>
    %23 = tpu.matmul %9, %22, %cst_28 {dimension_numbers = #tpu.dot_dimension_numbers<[1], [0], [0], [1], [0, 0, 1, 1], [], []>} : vector<32x1024xf32>, vector<1024x64xf32>, vector<32x64xf32> -> vector<32x64xf32>
    %c0_29 = arith.constant 0 : index
    %c0_30 = arith.constant 0 : index
    %24 = vector.load %arg7[%c0_29, %c0_30] : memref<1x64xf32, #tpu.memory_space<vmem>>, vector<1x64xf32>
    %25 = vector.broadcast %24 : vector<1x64xf32> to vector<32x64xf32>
    %26 = arith.mulf %23, %25 : vector<32x64xf32>
    %c0_31 = arith.constant 0 : index
    %c0_32 = arith.constant 0 : index
    %27 = vector.load %arg8[%c0_31, %c0_32] : memref<1x64xf32, #tpu.memory_space<vmem>>, vector<1x64xf32>
    %28 = vector.broadcast %27 : vector<1x64xf32> to vector<32x64xf32>
    %29 = arith.addf %26, %28 : vector<32x64xf32>
    %cst_33 = arith.constant 0.000000e+00 : f32
    %30 = vector.broadcast %cst_33 : f32 to vector<32x64xf32>
    %31 = arith.maximumf %29, %30 : vector<32x64xf32>
    %32 = vector.shape_cast %31 : vector<32x64xf32> to vector<4x8x64xf32>
    %c4_34 = arith.constant 4 : index
    %c4_35 = arith.constant 4 : index
    %c0_36 = arith.constant 0 : index
    %33 = vector.load %arg18[%c4_34, %c4_35, %c0_36] : memref<12x16x64xf32, #tpu.memory_space<vmem>>, vector<4x8x64xf32>
    tpu.vector_store %arg18[%c4_34, %c4_35, %c0_36], %32 {strides = array<i32>} : memref<12x16x64xf32, #tpu.memory_space<vmem>>, vector<4x8x64xf32>,
    %c4_37 = arith.constant 4 : index
    %c0_38 = arith.constant 0 : index
    %c0_39 = arith.constant 0 : index
    %34 = vector.load %arg18[%c4_37, %c0_38, %c0_39] : memref<12x16x64xf32, #tpu.memory_space<vmem>>, vector<4x8x64xf32>
    %35 = vector.shape_cast %34 : vector<4x8x64xf32> to vector<32x64xf32>
    %c0_40 = arith.constant 0 : index
    %c0_41 = arith.constant 0 : index
    %c0_42 = arith.constant 0 : index
    %36 = vector.load %arg9[%c0_40, %c0_41, %c0_42] : memref<3x64x64xf32, #tpu.memory_space<vmem>>, vector<1x64x64xf32>
    %37 = vector.shape_cast %36 : vector<1x64x64xf32> to vector<64x64xf32>
    %cst_43 = arith.constant dense<0.000000e+00> : vector<32x64xf32>
    %38 = tpu.matmul %35, %37, %cst_43 {dimension_numbers = #tpu.dot_dimension_numbers<[1], [0], [0], [1], [0, 0, 1, 1], [], []>} : vector<32x64xf32>, vector<64x64xf32>, vector<32x64xf32> -> vector<32x64xf32>
    %c4_44 = arith.constant 4 : index
    %c4_45 = arith.constant 4 : index
    %c0_46 = arith.constant 0 : index
    %39 = vector.load %arg18[%c4_44, %c4_45, %c0_46] : memref<12x16x64xf32, #tpu.memory_space<vmem>>, vector<4x8x64xf32>
    %40 = vector.shape_cast %39 : vector<4x8x64xf32> to vector<32x64xf32>
    %c1 = arith.constant 1 : index
    %c0_47 = arith.constant 0 : index
    %c0_48 = arith.constant 0 : index
    %41 = vector.load %arg9[%c1, %c0_47, %c0_48] : memref<3x64x64xf32, #tpu.memory_space<vmem>>, vector<1x64x64xf32>
    %42 = vector.shape_cast %41 : vector<1x64x64xf32> to vector<64x64xf32>
    %cst_49 = arith.constant dense<0.000000e+00> : vector<32x64xf32>
    %43 = tpu.matmul %40, %42, %cst_49 {dimension_numbers = #tpu.dot_dimension_numbers<[1], [0], [0], [1], [0, 0, 1, 1], [], []>} : vector<32x64xf32>, vector<64x64xf32>, vector<32x64xf32> -> vector<32x64xf32>
    %c4_50 = arith.constant 4 : index
    %c8_51 = arith.constant 8 : index
    %c0_52 = arith.constant 0 : index
    %44 = vector.load %arg18[%c4_50, %c8_51, %c0_52] : memref<12x16x64xf32, #tpu.memory_space<vmem>>, vector<4x8x64xf32>
    %45 = vector.shape_cast %44 : vector<4x8x64xf32> to vector<32x64xf32>
    %c2 = arith.constant 2 : index
    %c0_53 = arith.constant 0 : index
    %c0_54 = arith.constant 0 : index
    %46 = vector.load %arg9[%c2, %c0_53, %c0_54] : memref<3x64x64xf32, #tpu.memory_space<vmem>>, vector<1x64x64xf32>
    %47 = vector.shape_cast %46 : vector<1x64x64xf32> to vector<64x64xf32>
    %cst_55 = arith.constant dense<0.000000e+00> : vector<32x64xf32>
    %48 = tpu.matmul %45, %47, %cst_55 {dimension_numbers = #tpu.dot_dimension_numbers<[1], [0], [0], [1], [0, 0, 1, 1], [], []>} : vector<32x64xf32>, vector<64x64xf32>, vector<32x64xf32> -> vector<32x64xf32>
    %49 = arith.addf %38, %43 : vector<32x64xf32>
    %50 = arith.addf %49, %48 : vector<32x64xf32>
    %c0_56 = arith.constant 0 : index
    %c0_57 = arith.constant 0 : index
    %51 = vector.load %arg10[%c0_56, %c0_57] : memref<1x64xf32, #tpu.memory_space<vmem>>, vector<1x64xf32>
    %52 = vector.broadcast %51 : vector<1x64xf32> to vector<32x64xf32>
    %53 = arith.mulf %50, %52 : vector<32x64xf32>
    %c0_58 = arith.constant 0 : index
    %c0_59 = arith.constant 0 : index
    %54 = vector.load %arg11[%c0_58, %c0_59] : memref<1x64xf32, #tpu.memory_space<vmem>>, vector<1x64xf32>
    %55 = vector.broadcast %54 : vector<1x64xf32> to vector<32x64xf32>
    %56 = arith.addf %53, %55 : vector<32x64xf32>
    %cst_60 = arith.constant 0.000000e+00 : f32
    %57 = vector.broadcast %cst_60 : f32 to vector<32x64xf32>
    %58 = arith.maximumf %56, %57 : vector<32x64xf32>
    %59 = vector.shape_cast %58 : vector<32x64xf32> to vector<4x8x64xf32>
    %c4_61 = arith.constant 4 : index
    %c4_62 = arith.constant 4 : index
    %c0_63 = arith.constant 0 : index
    %60 = vector.load %arg18[%c4_61, %c4_62, %c0_63] : memref<12x16x64xf32, #tpu.memory_space<vmem>>, vector<4x8x64xf32>
    tpu.vector_store %arg18[%c4_61, %c4_62, %c0_63], %59 {strides = array<i32>} : memref<12x16x64xf32, #tpu.memory_space<vmem>>, vector<4x8x64xf32>,
    %c4_64 = arith.constant 4 : index
    %c0_65 = arith.constant 0 : index
    %c0_66 = arith.constant 0 : index
    %61 = vector.load %arg18[%c4_64, %c0_65, %c0_66] : memref<12x16x64xf32, #tpu.memory_space<vmem>>, vector<4x8x64xf32>
    %62 = vector.shape_cast %61 : vector<4x8x64xf32> to vector<32x64xf32>
    %c0_67 = arith.constant 0 : index
    %c0_68 = arith.constant 0 : index
    %c0_69 = arith.constant 0 : index
    %63 = vector.load %arg12[%c0_67, %c0_68, %c0_69] : memref<3x64x64xf32, #tpu.memory_space<vmem>>, vector<1x64x64xf32>
    %64 = vector.shape_cast %63 : vector<1x64x64xf32> to vector<64x64xf32>
    %cst_70 = arith.constant dense<0.000000e+00> : vector<32x64xf32>
    %65 = tpu.matmul %62, %64, %cst_70 {dimension_numbers = #tpu.dot_dimension_numbers<[1], [0], [0], [1], [0, 0, 1, 1], [], []>} : vector<32x64xf32>, vector<64x64xf32>, vector<32x64xf32> -> vector<32x64xf32>
    %c4_71 = arith.constant 4 : index
    %c4_72 = arith.constant 4 : index
    %c0_73 = arith.constant 0 : index
    %66 = vector.load %arg18[%c4_71, %c4_72, %c0_73] : memref<12x16x64xf32, #tpu.memory_space<vmem>>, vector<4x8x64xf32>
    %67 = vector.shape_cast %66 : vector<4x8x64xf32> to vector<32x64xf32>
    %c1_74 = arith.constant 1 : index
    %c0_75 = arith.constant 0 : index
    %c0_76 = arith.constant 0 : index
    %68 = vector.load %arg12[%c1_74, %c0_75, %c0_76] : memref<3x64x64xf32, #tpu.memory_space<vmem>>, vector<1x64x64xf32>
    %69 = vector.shape_cast %68 : vector<1x64x64xf32> to vector<64x64xf32>
    %cst_77 = arith.constant dense<0.000000e+00> : vector<32x64xf32>
    %70 = tpu.matmul %67, %69, %cst_77 {dimension_numbers = #tpu.dot_dimension_numbers<[1], [0], [0], [1], [0, 0, 1, 1], [], []>} : vector<32x64xf32>, vector<64x64xf32>, vector<32x64xf32> -> vector<32x64xf32>
    %c4_78 = arith.constant 4 : index
    %c8_79 = arith.constant 8 : index
    %c0_80 = arith.constant 0 : index
    %71 = vector.load %arg18[%c4_78, %c8_79, %c0_80] : memref<12x16x64xf32, #tpu.memory_space<vmem>>, vector<4x8x64xf32>
    %72 = vector.shape_cast %71 : vector<4x8x64xf32> to vector<32x64xf32>
    %c2_81 = arith.constant 2 : index
    %c0_82 = arith.constant 0 : index
    %c0_83 = arith.constant 0 : index
    %73 = vector.load %arg12[%c2_81, %c0_82, %c0_83] : memref<3x64x64xf32, #tpu.memory_space<vmem>>, vector<1x64x64xf32>
    %74 = vector.shape_cast %73 : vector<1x64x64xf32> to vector<64x64xf32>
    %cst_84 = arith.constant dense<0.000000e+00> : vector<32x64xf32>
    %75 = tpu.matmul %72, %74, %cst_84 {dimension_numbers = #tpu.dot_dimension_numbers<[1], [0], [0], [1], [0, 0, 1, 1], [], []>} : vector<32x64xf32>, vector<64x64xf32>, vector<32x64xf32> -> vector<32x64xf32>
    %76 = arith.addf %65, %70 : vector<32x64xf32>
    %77 = arith.addf %76, %75 : vector<32x64xf32>
    %c0_85 = arith.constant 0 : index
    %c0_86 = arith.constant 0 : index
    %78 = vector.load %arg13[%c0_85, %c0_86] : memref<1x64xf32, #tpu.memory_space<vmem>>, vector<1x64xf32>
    %79 = vector.broadcast %78 : vector<1x64xf32> to vector<32x64xf32>
    %80 = arith.mulf %77, %79 : vector<32x64xf32>
    %c0_87 = arith.constant 0 : index
    %c0_88 = arith.constant 0 : index
    %81 = vector.load %arg14[%c0_87, %c0_88] : memref<1x64xf32, #tpu.memory_space<vmem>>, vector<1x64xf32>
    %82 = vector.broadcast %81 : vector<1x64xf32> to vector<32x64xf32>
    %83 = arith.addf %80, %82 : vector<32x64xf32>
    %cst_89 = arith.constant 0.000000e+00 : f32
    %84 = vector.broadcast %cst_89 : f32 to vector<32x64xf32>
    %85 = arith.maximumf %83, %84 : vector<32x64xf32>
    %c0_90 = arith.constant 0 : index
    %c0_91 = arith.constant 0 : index
    %86 = vector.load %arg15[%c0_90, %c0_91] : memref<64x1024xf32, #tpu.memory_space<vmem>>, vector<64x1024xf32>
    %cst_92 = arith.constant dense<0.000000e+00> : vector<32x1024xf32>
    %87 = tpu.matmul %85, %86, %cst_92 {dimension_numbers = #tpu.dot_dimension_numbers<[1], [0], [0], [1], [0, 0, 1, 1], [], []>} : vector<32x64xf32>, vector<64x1024xf32>, vector<32x1024xf32> -> vector<32x1024xf32>
    %c0_93 = arith.constant 0 : index
    %c0_94 = arith.constant 0 : index
    %88 = vector.load %arg16[%c0_93, %c0_94] : memref<1x1024xf32, #tpu.memory_space<vmem>>, vector<1x1024xf32>
    %89 = vector.broadcast %88 : vector<1x1024xf32> to vector<32x1024xf32>
    %90 = arith.addf %87, %89 : vector<32x1024xf32>
    %91 = vector.broadcast %21 : vector<1x1024xf32> to vector<32x1024xf32>
    %92 = arith.mulf %91, %90 : vector<32x1024xf32>
    %cst_95 = arith.constant 0.000000e+00 : f32
    %93 = vector.broadcast %cst_95 : f32 to vector<32x1024xf32>
    %94 = arith.subf %93, %92 : vector<32x1024xf32>
    %95 = math.exp %94 : vector<32x1024xf32>
    %cst_96 = arith.constant 1.000000e+00 : f32
    %96 = vector.broadcast %cst_96 : f32 to vector<32x1024xf32>
    %97 = arith.addf %96, %95 : vector<32x1024xf32>
    %cst_97 = arith.constant 1.000000e+00 : f32
    %98 = vector.broadcast %cst_97 : f32 to vector<32x1024xf32>
    %99 = arith.divf %98, %97 : vector<32x1024xf32>
    %cst_98 = arith.constant 1.000000e+00 : f32
    %100 = vector.broadcast %cst_98 : f32 to vector<32x1024xf32>
    %101 = arith.addf %100, %99 : vector<32x1024xf32>
    %102 = arith.mulf %101, %9 : vector<32x1024xf32>
    %c0_99 = arith.constant 0 : index
    %c0_100 = arith.constant 0 : index
    %c0_101 = arith.constant 0 : index
    %103 = vector.load %arg17[%c0_99, %c0_100, %c0_101] : memref<1x32x1024xf32, #tpu.memory_space<vmem>>, vector<1x32x1024xf32>
    %104 = vector.shape_cast %103 : vector<1x32x1024xf32> to vector<32x1024xf32>
    %105 = vector.shape_cast %102 : vector<32x1024xf32> to vector<1x32x1024xf32>
    tpu.vector_store %arg17[%c0_99, %c0_100, %c0_101], %105 {strides = array<i32>} : memref<1x32x1024xf32, #tpu.memory_space<vmem>>, vector<1x32x1024xf32>,
    return
  }
  func.func @transform_0(%arg0: i32) -> (i32, i32, i32) {
    %c0_i32 = arith.constant 0 : i32
    %c0_i32_0 = arith.constant 0 : i32
    %c0_i32_1 = arith.constant 0 : i32
    return %arg0, %c0_i32, %c0_i32_0 : i32, i32, i32
  }
  func.func @transform_1(%arg0: i32) -> (i32, i32) {
    %c0_i32 = arith.constant 0 : i32
    %c0_i32_0 = arith.constant 0 : i32
    %c0_i32_1 = arith.constant 0 : i32
    return %c0_i32, %c0_i32_0 : i32, i32
  }
  func.func @transform_2(%arg0: i32) -> (i32, i32) {
    %c0_i32 = arith.constant 0 : i32
    %c0_i32_0 = arith.constant 0 : i32
    %c0_i32_1 = arith.constant 0 : i32
    return %c0_i32, %c0_i32_0 : i32, i32
  }
  func.func @transform_3(%arg0: i32) -> (i32, i32) {
    %c0_i32 = arith.constant 0 : i32
    %c0_i32_0 = arith.constant 0 : i32
    %c0_i32_1 = arith.constant 0 : i32
    return %c0_i32, %c0_i32_0 : i32, i32
  }
  func.func @transform_4(%arg0: i32) -> (i32, i32) {
    %c0_i32 = arith.constant 0 : i32
    %c0_i32_0 = arith.constant 0 : i32
    %c0_i32_1 = arith.constant 0 : i32
    return %c0_i32, %c0_i32_0 : i32, i32
  }
  func.func @transform_5(%arg0: i32) -> (i32, i32) {
    %c0_i32 = arith.constant 0 : i32
    %c0_i32_0 = arith.constant 0 : i32
    %c0_i32_1 = arith.constant 0 : i32
    return %c0_i32, %c0_i32_0 : i32, i32
  }
  func.func @transform_6(%arg0: i32) -> (i32, i32) {
    %c0_i32 = arith.constant 0 : i32
    %c0_i32_0 = arith.constant 0 : i32
    %c0_i32_1 = arith.constant 0 : i32
    return %c0_i32, %c0_i32_0 : i32, i32
  }
  func.func @transform_7(%arg0: i32) -> (i32, i32) {
    %c0_i32 = arith.constant 0 : i32
    %c0_i32_0 = arith.constant 0 : i32
    %c0_i32_1 = arith.constant 0 : i32
    return %c0_i32, %c0_i32_0 : i32, i32
  }
  func.func @transform_8(%arg0: i32) -> (i32, i32, i32) {
    %c0_i32 = arith.constant 0 : i32
    %c0_i32_0 = arith.constant 0 : i32
    %c0_i32_1 = arith.constant 0 : i32
    %c0_i32_2 = arith.constant 0 : i32
    return %c0_i32, %c0_i32_0, %c0_i32_1 : i32, i32, i32
  }
  func.func @transform_9(%arg0: i32) -> (i32, i32) {
    %c0_i32 = arith.constant 0 : i32
    %c0_i32_0 = arith.constant 0 : i32
    %c0_i32_1 = arith.constant 0 : i32
    return %c0_i32, %c0_i32_0 : i32, i32
  }
  func.func @transform_10(%arg0: i32) -> (i32, i32) {
    %c0_i32 = arith.constant 0 : i32
    %c0_i32_0 = arith.constant 0 : i32
    %c0_i32_1 = arith.constant 0 : i32
    return %c0_i32, %c0_i32_0 : i32, i32
  }
  func.func @transform_11(%arg0: i32) -> (i32, i32, i32) {
    %c0_i32 = arith.constant 0 : i32
    %c0_i32_0 = arith.constant 0 : i32
    %c0_i32_1 = arith.constant 0 : i32
    %c0_i32_2 = arith.constant 0 : i32
    return %c0_i32, %c0_i32_0, %c0_i32_1 : i32, i32, i32
  }
  func.func @transform_12(%arg0: i32) -> (i32, i32) {
    %c0_i32 = arith.constant 0 : i32
    %c0_i32_0 = arith.constant 0 : i32
    %c0_i32_1 = arith.constant 0 : i32
    return %c0_i32, %c0_i32_0 : i32, i32
  }
  func.func @transform_13(%arg0: i32) -> (i32, i32) {
    %c0_i32 = arith.constant 0 : i32
    %c0_i32_0 = arith.constant 0 : i32
    %c0_i32_1 = arith.constant 0 : i32
    return %c0_i32, %c0_i32_0 : i32, i32
  }
  func.func @transform_14(%arg0: i32) -> (i32, i32) {
    %c0_i32 = arith.constant 0 : i32
    %c0_i32_0 = arith.constant 0 : i32
    %c0_i32_1 = arith.constant 0 : i32
    return %c0_i32, %c0_i32_0 : i32, i32
  }
  func.func @transform_15(%arg0: i32) -> (i32, i32) {
    %c0_i32 = arith.constant 0 : i32
    %c0_i32_0 = arith.constant 0 : i32
    %c0_i32_1 = arith.constant 0 : i32
    return %c0_i32, %c0_i32_0 : i32, i32
  }
  func.func @transform_16(%arg0: i32) -> (i32, i32, i32) {
    %c0_i32 = arith.constant 0 : i32
    %c0_i32_0 = arith.constant 0 : i32
    %c0_i32_1 = arith.constant 0 : i32
    return %arg0, %c0_i32, %c0_i32_0 : i32, i32, i32
  }
}

</mosaic_0001>

<bundles_post_ra>
// kernel: tpu_custom_call.1
= control target key start
LH: loop header
LB: loop body
LE: loop exit
PB: predicated region body
PF: predicated region fallthrough
CT: control target
= control target key end

     0   :  { %s6682_s0 = inlined_call_operand.vmem [shape: f32[2,32,1024], index: 0, kind: input, shape index: {}]   ;;  %s6683_s1 = inlined_call_operand.vmem [shape: f32[1024,8], index: 1, kind: input, shape index: {}]   ;;  %s6684_s2 = inlined_call_operand.vmem [shape: f32[1,8], index: 2, kind: input, shape index: {}]   ;;  %s6685_s3 = inlined_call_operand.vmem [shape: f32[8,1024], index: 3, kind: input, shape index: {}]   ;;  %s6686_s4 = inlined_call_operand.vmem [shape: f32[1,1024], index: 4, kind: input, shape index: {}]   ;;  %s6687_s5 = inlined_call_operand.vmem [shape: f32[1024,64], index: 5, kind: input, shape index: {}]   ;;  %s6688_s6 = inlined_call_operand.vmem [shape: f32[1,64], index: 6, kind: input, shape index: {}]   ;;  %s6689_s7 = inlined_call_operand.vmem [shape: f32[1,64], index: 7, kind: input, shape index: {}]   ;;  %s6690_s8 = inlined_call_operand.vmem [shape: f32[3,64,64], index: 8, kind: input, shape index: {}]   ;;  %s6691_s9 = inlined_call_operand.vmem [shape: f32[1,64], index: 9, kind: input, shape index: {}]   ;;  %s6692_s10 = inlined_call_operand.vmem [shape: f32[1,64], index: 10, kind: input, shape index: {}]   ;;  %s6693_s11 = inlined_call_operand.vmem [shape: f32[3,64,64], index: 11, kind: input, shape index: {}]   ;;  %s6694_s12 = inlined_call_operand.vmem [shape: f32[1,64], index: 12, kind: input, shape index: {}]   ;;  %s6695_s13 = inlined_call_operand.vmem [shape: f32[1,64], index: 13, kind: input, shape index: {}]   ;;  %s6696_s14 = inlined_call_operand.vmem [shape: f32[64,1024], index: 14, kind: input, shape index: {}]   ;;  %s6697_s15 = inlined_call_operand.vmem [shape: f32[1,1024], index: 15, kind: input, shape index: {}]   ;;  %s6698_s16 = inlined_call_operand.hbm [shape: f32[2,32,1024], index: 16, kind: output, shape index: {}]  }
   0x1   :  { %6706 = sst [smem:[#allocation12_spill]] %s6682_s0 }
   0x2   :  { %6707 = sst [smem:[#allocation13_spill]] %s6698_s16 }
   0x3   :  { %21 = vsyncpa [#allocation4], 0 }
   0x4   :  { %23 = vsyncpa [#allocation4 + $0x1], 0  ;;  %s4928_s21 = smov 0   ;;  %s4930_s22 = smov 0  }
   0x5   :  { %s4932_s23 = smov 0   ;;  %s4934_s24 = smov 0  }
   0x6 LB: > { %6708 = sst [smem:[#allocation6_spill]] %s4825_s21  ;;  %s4949_s25 = sadd.s32 4294967295, %s4837_s24   ;;  %s4837_s24 = sphi %s4934_s24, %s6721_s24   ;;  %s4833_s23 = sphi %s4932_s23, %s6723_s23   ;;  %s4829_s22 = sphi %s4930_s22, %s6725_s22   ;;  %s4825_s21 = sphi %s4928_s21, %s6724_s21  }
   0x7   : > { %6709 = sst [smem:[#allocation7_spill]] %s4833_s23  ;;  %s3522_s26 = sadd.s32 4294967294, %s4837_s24  }
   0x8   : > { %6710 = sst [smem:[#allocation8_spill]] %s4837_s24  ;;  %s4953_s27 = sadd.s32 1, %s4837_s24  }
   0x9   : > { %6711 = sst [smem:[#allocation9_spill]] %s4953_s27  ;;  %s377_s28 = sadd.s32 1, %s4833_s23 }
   0xa   : > { %s374_s29 = ssub.s32 %s4837_s24, %s4953_s27  ;;  %p387_p0 = scmp.ne.s32.totalorder %s4833_s23, %s4829_s22 }
   0xb   : > { %p375_p1 = scmp.eq.s32.totalorder %s374_s29, 0  ;;  %p388_p2 = scmp.eq.s32.totalorder %s4949_s25, 1 }
   0xc   : > { %p393_p3 = scmp.ne.s32.totalorder %s4829_s22, %s4825_s21  ;;  %p394_p4 = scmp.eq.s32.totalorder %s3522_s26, 1 }
   0xd   : > { %s4964_s30 = scalar_select %p375_p1, %s4833_s23, %s377_s28  }
   0xe   : > { %p4966_p5 = por %p388_p2, %p387_p0  ;;  %p4970_p6 = por %p394_p4, %p393_p3 }
   0xf   : > { %6712 = sst [smem:[#allocation10_spill]] %s4964_s30  ;;  %p3525_p7 = scmp.ge.s32.totalorder %s4837_s24, 1 }
  0x10   : > { %s6714_s17 = scalar_select %p4970_p6, 1, 0 }
  0x11   : > { %p465_p8 = scmp.lt.s32.totalorder %s4837_s24, 3 }
  0x12   : > { %6715 = sst [smem:[#allocation11_spill]] %s6714_s17 }
  0x13   : > { %p466_p9 = pnand %p3525_p7, %p465_p8 }
  0x14   : > { %v668_v0 = vld [vmem:[%s6683_s1 + $0x80] sm:$0xff] (!%p466_p9)  ;;  %v669_v1 = vld [vmem:[%s6683_s1 + $0x88] sm:$0xff] (!%p466_p9)  ;;  %v670_v11 = vld [vmem:[%s6683_s1 + $0x90] sm:$0xff] (!%p466_p9)  ;;  %p515_p10 = scmp.lt.s32.totalorder (!%p466_p9), %s4949_s25, 1  ;;  %s6716_s30 = sld [smem:[#allocation12_spill]] (!%p466_p9)  ;;  %vm520_vm0 = vcmask (!%p466_p9), 523264  }
  0x15   : > { %469 = sbr.rel (%p466_p9) target bundleno = 1454 (0x5ae), region = 84  ;;  %v652_v2 = vld [vmem:[%s6683_s1] sm:$0xff] (!%p466_p9)  ;;  %v4138_v3 = vpack.c.bf16 (!%p466_p9), %v669_v1, %v668_v0  ;;  %v653_v4 = vld [vmem:[%s6683_s1 + $0x8] sm:$0xff] (!%p466_p9)  ;;  %v671_v13 = vld [vmem:[%s6683_s1 + $0x98] sm:$0xff] (!%p466_p9)  ;;  %vm1112_vm1 = vcmask (!%p466_p9), 64512   ;;  %vm539_vm2 = vcmask (!%p466_p9), 519168  }
  0x16   : > { %v700_v5 = vld [vmem:[%s6683_s1 + $0x180] sm:$0xff] (!%p466_p9)  ;;  %v701_v6 = vld [vmem:[%s6683_s1 + $0x188] sm:$0xff] (!%p466_p9)  ;;  %v4140_v7 = vpack.c.bf16 (!%p466_p9), %v653_v4, %v652_v2  ;;  %v654_v14 = vld [vmem:[%s6683_s1 + $0x10] sm:$0xff] (!%p466_p9)  ;;  %v4142_v16 = vpack.c.bf16 (!%p466_p9), %v671_v13, %v670_v11  ;;  %s512_s23 = sand.u32 (!%p466_p9), 1, %s4829_s22   ;;  %s3617_s17 = sshll.u32 (!%p466_p9), %s4949_s25, 12 }
  0x17   : > { %v4170_v8 = vpack.c.bf16 (!%p466_p9), %v701_v6, %v700_v5  ;;  %v684_v9 = vld [vmem:[%s6683_s1 + $0x100] sm:$0xff] (!%p466_p9)  ;;  %v685_v10 = vld [vmem:[%s6683_s1 + $0x108] sm:$0xff] (!%p466_p9)  ;;  %4139 = vmatprep.subr.bf16.mxu0 (!%p466_p9), %v4138_v3  ;;  %v655_v15 = vld [vmem:[%s6683_s1 + $0x18] sm:$0xff] (!%p466_p9)  ;;  %s6717_s29 = sld [smem:[#allocation13_spill]] (!%p466_p9)  ;;  %s6641_s19 = scalar_lea.sflag (!%p466_p9), [#allocation4], %s512_s23 }
  0x18   : > { %v4172_v12 = vpack.c.bf16 (!%p466_p9), %v685_v10, %v684_v9  ;;  %4141 = vmatpush3.bf16.msra.mxu0 (!%p466_p9), %v4140_v7  ;;  %v4144_v17 = vpack.c.bf16 (!%p466_p9), %v655_v15, %v654_v14  ;;  %v702_v18 = vld [vmem:[%s6683_s1 + $0x190] sm:$0xff] (!%p466_p9)  ;;  %v703_v19 = vld [vmem:[%s6683_s1 + $0x198] sm:$0xff] (!%p466_p9)  ;;  %v672_v23 = vld [vmem:[%s6683_s1 + $0xa0] sm:$0xff] (!%p466_p9) }
  0x19   : > { %4171 = vmatprep.subr.bf16.mxu1 (!%p466_p9), %v4170_v8  ;;  %v686_v20 = vld [vmem:[%s6683_s1 + $0x110] sm:$0xff] (!%p466_p9)  ;;  %v4174_v21 = vpack.c.bf16 (!%p466_p9), %v703_v19, %v702_v18  ;;  %v687_v22 = vld [vmem:[%s6683_s1 + $0x118] sm:$0xff] (!%p466_p9)  ;;  %v673_v24 = vld [vmem:[%s6683_s1 + $0xa8] sm:$0xff] (!%p466_p9)  ;;  %4143 = vmatprep.subr.bf16.mxu0 (!%p466_p9), %v4142_v16 }
  0x1a   : > { %4173 = vmatpush3.bf16.msra.mxu1 (!%p466_p9), %v4172_v12  ;;  %v4176_v25 = vpack.c.bf16 (!%p466_p9), %v687_v22, %v686_v20  ;;  %v4146_v26 = vpack.c.bf16 (!%p466_p9), %v673_v24, %v672_v23  ;;  %v656_v27 = vld [vmem:[%s6683_s1 + $0x20] sm:$0xff] (!%p466_p9)  ;;  %v657_v28 = vld [vmem:[%s6683_s1 + $0x28] sm:$0xff] (!%p466_p9)  ;;  %v674_v35 = vld [vmem:[%s6683_s1 + $0xb0] sm:$0xff] (!%p466_p9) }
  0x1b   : > { %v704_v29 = vld [vmem:[%s6683_s1 + $0x1a0] sm:$0xff] (!%p466_p9)  ;;  %4175 = vmatprep.subr.bf16.mxu1 (!%p466_p9), %v4174_v21  ;;  %v705_v30 = vld [vmem:[%s6683_s1 + $0x1a8] sm:$0xff] (!%p466_p9)  ;;  %v4148_v33 = vpack.c.bf16 (!%p466_p9), %v657_v28, %v656_v27  ;;  %v675_v36 = vld [vmem:[%s6683_s1 + $0xb8] sm:$0xff] (!%p466_p9) }
  0x1c   : > { %v688_v31 = vld [vmem:[%s6683_s1 + $0x120] sm:$0xff]  ;;  %v689_v32 = vld [vmem:[%s6683_s1 + $0x128] sm:$0xff]  ;;  %4145 = vmatpush3.bf16.msra.mxu0 %v4144_v17  ;;  %v4178_v34 = vpack.c.bf16 %v705_v30, %v704_v29  ;;  %v658_v37 = vld [vmem:[%s6683_s1 + $0x30] sm:$0xff]  ;;  %v4150_v39 = vpack.c.bf16 %v675_v36, %v674_v35  ;;  %s5082_s20 = scalar_select %p515_p10, %s4949_s25, 1 }
  0x1d   : > { %4147 = vmatprep.subr.bf16.mxu0 %v4146_v26  ;;  %v4180_v38 = vpack.c.bf16 %v689_v32, %v688_v31  ;;  %v659_v40 = vld [vmem:[%s6683_s1 + $0x38] sm:$0xff]  ;;  %v706_v41 = vld [vmem:[%s6683_s1 + $0x1b0] sm:$0xff]  ;;  %v676_v46 = vld [vmem:[%s6683_s1 + $0xc0] sm:$0xff]  ;;  %s6631_s18 = scalar_lea.hbm %s6717_s29, %s3617_s17 }
  0x1e   : > { %4177 = vmatpush3.bf16.msra.mxu1 %v4176_v25  ;;  %v707_v42 = vld [vmem:[%s6683_s1 + $0x1b8] sm:$0xff]  ;;  %v690_v44 = vld [vmem:[%s6683_s1 + $0x130] sm:$0xff]  ;;  %v677_v47 = vld [vmem:[%s6683_s1 + $0xc8] sm:$0xff]  ;;  %v4152_v48 = vpack.c.bf16 %v659_v40, %v658_v37  ;;  %s3616_s24 = sshll.u32 %s5082_s20, 8 }
  0x1f   : > { %4179 = vmatprep.subr.bf16.mxu1 %v4178_v34  ;;  %v4182_v43 = vpack.c.bf16 %v707_v42, %v706_v41  ;;  %v691_v45 = vld [vmem:[%s6683_s1 + $0x138] sm:$0xff]  ;;  %v708_v49 = vld [vmem:[%s6683_s1 + $0x1c0] sm:$0xff]  ;;  %v709_v50 = vld [vmem:[%s6683_s1 + $0x1c8] sm:$0xff]  ;;  %v4154_v52 = vpack.c.bf16 %v677_v47, %v676_v46  ;;  %s5136_s16 = scalar_lea.vmem %s6716_s30, %s3616_s24  ;;  %s6528_s30 = sshll.u32 %s512_s23, 8 }
  0x20   : > { %4149 = vmatpush3.bf16.msra.mxu0 %v4148_v33  ;;  %v4184_v51 = vpack.c.bf16 %v691_v45, %v690_v44  ;;  %v660_v53 = vld [vmem:[%s6683_s1 + $0x40] sm:$0xff]  ;;  %v661_v54 = vld [vmem:[%s6683_s1 + $0x48] sm:$0xff]  ;;  %v4186_v56 = vpack.c.bf16 %v709_v50, %v708_v49  ;;  %v678_v58 = vld [vmem:[%s6683_s1 + $0xd0] sm:$0xff]  ;;  %s6541_s27 = scalar_lea.vmem [#allocation3], %s6528_s30  ;;  %s4840_s24 = smov [#allocation3]  }
  0x21   : > { %4151 = vmatprep.subr.bf16.mxu0 %v4150_v39  ;;  %v692_v55 = vld [vmem:[%s6683_s1 + $0x140] sm:$0xff]  ;;  %v693_v57 = vld [vmem:[%s6683_s1 + $0x148] sm:$0xff]  ;;  %v679_v59 = vld [vmem:[%s6683_s1 + $0xd8] sm:$0xff]  ;;  %v4156_v62 = vpack.c.bf16 %v661_v54, %v660_v53  ;;  %s3460_s20 = sshll.u32 %s6541_s27, 4  ;;  %s4779_s28 = sshll.u32 %s4840_s24, 4  ;;  %s6633_s20 = int_to_ptr.vmem [resolvable:$true] %s3460_s20  ;;  %s4780_s28 = int_to_ptr.vmem [resolvable:$false] %s4779_s28 }
  0x22   : > { %4181 = vmatpush3.bf16.msra.mxu1 %v4180_v38  ;;  %v710_v60 = vld [vmem:[%s6683_s1 + $0x1d0] sm:$0xff]  ;;  %v711_v61 = vld [vmem:[%s6683_s1 + $0x1d8] sm:$0xff]  ;;  %v4188_v63 = vpack.c.bf16 %v693_v57, %v692_v55  ;;  %v4158_v0 = vpack.c.bf16 %v679_v59, %v678_v58  ;;  %v680_v6 = vld [vmem:[%s6683_s1 + $0xe0] sm:$0xff]  ;;  %s4775_s26 = scalar_lea.vmem %s6633_s20, 4096  ;;  %s4781_s30 = scalar_lea.vmem %s4780_s28, 8192 }
  0x23   : > { %4183 = vmatprep.subr.bf16.mxu1 %v4182_v43  ;;  %v662_v1 = vld [vmem:[%s6683_s1 + $0x50] sm:$0xff]  ;;  %v663_v2 = vld [vmem:[%s6683_s1 + $0x58] sm:$0xff]  ;;  %v4190_v4 = vpack.c.bf16 %v711_v61, %v710_v60  ;;  %v681_v7 = vld [vmem:[%s6683_s1 + $0xe8] sm:$0xff]  ;;  %p4776_p11 = scmp.ne.s32.totalorder %s6633_s20, %s4775_s26  ;;  %p4782_p0 = scmp.lt.s32.totalorder %s6633_s20, %s4780_s28 }
  0x24   : > { %4153 = vmatpush3.bf16.msra.mxu0 %v4152_v48  ;;  %v694_v3 = vld [vmem:[%s6683_s1 + $0x150] sm:$0xff]  ;;  %v695_v5 = vld [vmem:[%s6683_s1 + $0x158] sm:$0xff]  ;;  %v664_v8 = vld [vmem:[%s6683_s1 + $0x60] sm:$0xff]  ;;  %v4160_v12 = vpack.c.bf16 %v663_v2, %v662_v1  ;;  %v4162_v18 = vpack.c.bf16 %v681_v7, %v680_v6  ;;  %p4783_p1 = scmp.lt.s32.totalorder %s4781_s30, %s4775_s26 }
  0x25   : > { %4155 = vmatprep.subr.bf16.mxu0 %v4154_v52  ;;  %v665_v9 = vld [vmem:[%s6683_s1 + $0x68] sm:$0xff]  ;;  %v712_v10 = vld [vmem:[%s6683_s1 + $0x1e0] sm:$0xff]  ;;  %v682_v15 = vld [vmem:[%s6683_s1 + $0xf0] sm:$0xff]  ;;  %v4192_v17 = vpack.c.bf16 %v695_v5, %v694_v3  ;;  %p4777_p12 = pnand %p4776_p11, %p4966_p5 }
  0x26   : > { %4185 = vmatpush3.bf16.msra.mxu1 %v4184_v51  ;;  %v713_v11 = vld [vmem:[%s6683_s1 + $0x1e8] sm:$0xff]  ;;  %v696_v13 = vld [vmem:[%s6683_s1 + $0x160] sm:$0xff]  ;;  %v683_v16 = vld [vmem:[%s6683_s1 + $0xf8] sm:$0xff]  ;;  %v4164_v32 = vpack.c.bf16 %v665_v9, %v664_v8  ;;  %p4784_p2 = por %p4783_p1, %p4782_p0 }
  0x27   : > { %4187 = vmatprep.subr.bf16.mxu1 %v4186_v56  ;;  %v697_v14 = vld [vmem:[%s6683_s1 + $0x168] sm:$0xff]  ;;  %v714_v19 = vld [vmem:[%s6683_s1 + $0x1f0] sm:$0xff]  ;;  %v4194_v22 = vpack.c.bf16 %v713_v11, %v712_v10  ;;  %v715_v23 = vld [vmem:[%s6683_s1 + $0x1f8] sm:$0xff]  ;;  %v4166_v40 = vpack.c.bf16 %v683_v16, %v682_v15  ;;  %p4778_p13 = pneg %p4777_p12 }
  0x28   : > { %4157 = vmatpush3.bf16.msra.mxu0 %v4156_v62  ;;  %v5166_v20 = vld [vmem:[%s5136_s16 + $0x8] sm:$0xff]  ;;  %v5178_v26 = vld [vmem:[%s5136_s16] sm:$0xff]  ;;  %v666_v27 = vld [vmem:[%s6683_s1 + $0x70] sm:$0xff]  ;;  %v4196_v39 = vpack.c.bf16 %v697_v14, %v696_v13  ;;  %v4198_v44 = vpack.c.bf16 %v715_v23, %v714_v19 }
  0x29   : > { %4159 = vmatprep.subr.bf16.mxu0 %v4158_v0  ;;  %v5169_v21 = vld [vmem:[%s5136_s16 + $0x48] sm:$0xff]  ;;  %v667_v28 = vld [vmem:[%s6683_s1 + $0x78] sm:$0xff]  ;;  %v5188_v30 = vld [vmem:[%s5136_s16 + $0x40] sm:$0xff]  ;;  %p4785_p3 = pnand %p4784_p2, %p4778_p13 }
  0x2a   : > { %4189 = vmatpush3.bf16.msra.mxu1 %v4188_v63  ;;  %v565_v24 = vld [vmem:[%s5136_s16 + $0x88] sm:$0xff]  ;;  %v589_v25 = vadd.f32 %v5169_v21, %v5166_v20  ;;  %v5191_v31 = vld [vmem:[%s5136_s16 + $0x80] sm:$0xff]  ;;  %v698_v33 = vld [vmem:[%s6683_s1 + $0x170] sm:$0xff]  ;;  %v580_v37 = vadd.f32 %v5188_v30, %v5178_v26  ;;  %v4168_v54 = vpack.c.bf16 %v667_v28, %v666_v27 }
  0x2b   : > { %4191 = vmatprep.subr.bf16.mxu1 %v4190_v4  ;;  %v573_v29 = vld [vmem:[%s5136_s16 + $0xc8] sm:$0xff]  ;;  %v699_v34 = vld [vmem:[%s6683_s1 + $0x178] sm:$0xff]  ;;  %v572_v36 = vld [vmem:[%s5136_s16 + $0xc0] sm:$0xff] }
  0x2c   : > { %4161 = vmatpush3.bf16.msra.mxu0 %v4160_v12  ;;  %v590_v35 = vadd.f32 %v589_v25, %v565_v24  ;;  %v5203_v38 = vld [vmem:[%s5136_s16 + $0x18] sm:$0xff]  ;;  %v732_v41 = vld [vmem:[%s6683_s1 + $0x280] sm:$0xff]  ;;  %v581_v46 = vadd.f32 %v580_v37, %v5191_v31  ;;  %v733_v47 = vld [vmem:[%s6683_s1 + $0x288] sm:$0xff]  ;;  %v4200_v59 = vpack.c.bf16 %v699_v34, %v698_v33 }
  0x2d   : > { %4163 = vmatprep.subr.bf16.mxu0 %v4162_v18  ;;  %v5209_v42 = vld [vmem:[%s5136_s16 + $0x58] sm:$0xff]  ;;  %v764_v50 = vld [vmem:[%s6683_s1 + $0x380] sm:$0xff]  ;;  %v765_v51 = vld [vmem:[%s6683_s1 + $0x388] sm:$0xff]  ;;  %v4202_v60 = vpack.c.bf16 %v733_v47, %v732_v41 }
  0x2e   : > { %4193 = vmatpush3.bf16.msra.mxu1 %v4192_v17  ;;  %v5212_v43 = vld [vmem:[%s5136_s16 + $0x98] sm:$0xff]  ;;  %v591_v45 = vadd.f32 %v590_v35, %v573_v29  ;;  %v607_v49 = vadd.f32 %v5209_v42, %v5203_v38  ;;  %v5230_v52 = vld [vmem:[%s5136_s16 + $0x10] sm:$0xff]  ;;  %v582_v56 = vadd.f32 %v581_v46, %v572_v36  ;;  %v4234_v1 = vpack.c.bf16 %v765_v51, %v764_v50  ;;  %v716_v15 = vld [vmem:[%s6683_s1 + $0x200] sm:$0xff] }
  0x2f   : > { %4195 = vmatprep.subr.bf16.mxu1 %v4194_v22  ;;  %v5219_v48 = vld [vmem:[%s5136_s16 + $0xd8] sm:$0xff]  ;;  %v5233_v53 = vld [vmem:[%s5136_s16 + $0x50] sm:$0xff]  ;;  %v717_v16 = vld [vmem:[%s6683_s1 + $0x208] sm:$0xff] }
  0x30   : > { %4165 = vmatpush3.bf16.msra.mxu0 %v4164_v32  ;;  %v592_v55 = vrot.slane %v591_v45, 4  ;;  %v608_v57 = vadd.f32 %v607_v49, %v5212_v43  ;;  %v5237_v58 = vld [vmem:[%s5136_s16 + $0x90] sm:$0xff]  ;;  %v598_v61 = vadd.f32 %v5233_v53, %v5230_v52  ;;  %v583_v63 = vrot.slane %v582_v56, 4  ;;  %v735_v19 = vld [vmem:[%s6683_s1 + $0x298] sm:$0xff]  ;;  %v748_v32 = vld [vmem:[%s6683_s1 + $0x300] sm:$0xff] }
  0x31   : > { %4167 = vmatprep.subr.bf16.mxu0 %v4166_v40  ;;  %v5243_v2 = vld [vmem:[%s5136_s16 + $0xd0] sm:$0xff]  ;;  %v4204_v25 = vpack.c.bf16 %v717_v16, %v716_v15  ;;  %v719_v35 = vld [vmem:[%s6683_s1 + $0x218] sm:$0xff]  ;;  %v749_v37 = vld [vmem:[%s6683_s1 + $0x308] sm:$0xff] }
  0x32   : > { %4197 = vmatpush3.bf16.msra.mxu1 %v4196_v39  ;;  %v593_v62 = vadd.f32 %v592_v55, %v591_v45  ;;  %v609_v0 = vadd.f32 %v608_v57, %v5219_v48  ;;  %v599_v3 = vadd.f32 %v598_v61, %v5237_v58  ;;  %v584_v5 = vadd.f32 %v583_v63, %v582_v56  ;;  %v734_v18 = vld [vmem:[%s6683_s1 + $0x290] sm:$0xff]  ;;  %v736_v39 = vld [vmem:[%s6683_s1 + $0x2a0] sm:$0xff]  ;;  %v737_v40 = vld [vmem:[%s6683_s1 + $0x2a8] sm:$0xff] }
  0x33   : > { %4199 = vmatprep.subr.bf16.mxu1 %v4198_v44  ;;  %v4206_v33 = vpack.c.bf16 %v735_v19, %v734_v18  ;;  %v718_v34 = vld [vmem:[%s6683_s1 + $0x210] sm:$0xff]  ;;  %v767_v45 = vld [vmem:[%s6683_s1 + $0x398] sm:$0xff]  ;;  %v4236_v50 = vpack.c.bf16 %v749_v37, %v748_v32  ;;  %v720_v55 = vld [vmem:[%s6683_s1 + $0x220] sm:$0xff] }
  0x34   : > { %4169 = vmatpush3.bf16.msra.mxu0 %v4168_v54  ;;  %v594_v4 = vrot.slane %v593_v62, 2  ;;  %v610_v6 = vrot.slane %v609_v0, 4  ;;  %v600_v7 = vadd.f32 %v599_v3, %v5243_v2  ;;  %v585_v9 = vrot.slane %v584_v5, 2  ;;  %v766_v44 = vld [vmem:[%s6683_s1 + $0x390] sm:$0xff]  ;;  %v751_v51 = vld [vmem:[%s6683_s1 + $0x318] sm:$0xff]  ;;  %v721_v56 = vld [vmem:[%s6683_s1 + $0x228] sm:$0xff] }
  0x35   : > { %4203 = vmatprep.subr.bf16.mxu0 %v4202_v60  ;;  %v4208_v47 = vpack.c.bf16 %v719_v35, %v718_v34  ;;  %v750_v49 = vld [vmem:[%s6683_s1 + $0x310] sm:$0xff]  ;;  %v4210_v54 = vpack.c.bf16 %v737_v40, %v736_v39  ;;  %v768_v60 = vld [vmem:[%s6683_s1 + $0x3a0] sm:$0xff]  ;;  %v769_v63 = vld [vmem:[%s6683_s1 + $0x3a8] sm:$0xff]  ;;  %v4212_v3 = vpack.c.bf16 %v721_v56, %v720_v55 }
  0x36   : > { %4201 = vmatpush3.bf16.msra.mxu1 %v4200_v59  ;;  %v595_v8 = vadd.f32 %v594_v4, %v593_v62  ;;  %v611_v10 = vadd.f32 %v610_v6, %v609_v0  ;;  %v601_v11 = vrot.slane %v600_v7, 4  ;;  %v586_v13 = vadd.f32 %v585_v9, %v584_v5  ;;  %v738_v61 = vld [vmem:[%s6683_s1 + $0x2b0] sm:$0xff]  ;;  %v739_v62 = vld [vmem:[%s6683_s1 + $0x2b8] sm:$0xff]  ;;  %v752_v0 = vld [vmem:[%s6683_s1 + $0x320] sm:$0xff] }
  0x37   : > { %4235 = vmatprep.subr.bf16.mxu1 %v4234_v1  ;;  %v4238_v59 = vpack.c.bf16 %v767_v45, %v766_v44  ;;  %v753_v1 = vld [vmem:[%s6683_s1 + $0x328] sm:$0xff]  ;;  %v722_v4 = vld [vmem:[%s6683_s1 + $0x230] sm:$0xff]  ;;  %v723_v5 = vld [vmem:[%s6683_s1 + $0x238] sm:$0xff] }
  0x38   : > { %v596_v12 = vrot.slane %v595_v8, 1  ;;  %v612_v14 = vrot.slane %v611_v10, 2  ;;  %v602_v17 = vadd.f32 %v601_v11, %v600_v7  ;;  %v587_v23 = vrot.slane %v586_v13, 1  ;;  %v740_v6 = vld [vmem:[%s6683_s1 + $0x2c0] sm:$0xff]  ;;  %v770_v9 = vld [vmem:[%s6683_s1 + $0x3b0] sm:$0xff]  ;;  %v5329_v11 = vld [vmem:[%s5136_s16 + $0x28] sm:$0xff] }
  0x39   : > { %v4240_v7 = vpack.c.bf16 %v751_v51, %v750_v49  ;;  %v741_v15 = vld [vmem:[%s6683_s1 + $0x2c8] sm:$0xff]  ;;  %v5346_v18 = vld [vmem:[%s5136_s16 + $0x60] sm:$0xff]  ;;  %v754_v32 = vld [vmem:[%s6683_s1 + $0x330] sm:$0xff] }
  0x3a   : > { %v597_v22 = vadd.f32 %v596_v12, %v595_v8  ;;  %v613_v24 = vadd.f32 %v612_v14, %v611_v10  ;;  %v603_v27 = vrot.slane %v602_v17, 2  ;;  %v588_v28 = vadd.f32 %v587_v23, %v586_v13  ;;  %v771_v10 = vld [vmem:[%s6683_s1 + $0x3b8] sm:$0xff]  ;;  %v5332_v12 = vld [vmem:[%s5136_s16 + $0x68] sm:$0xff]  ;;  %v724_v19 = vld [vmem:[%s6683_s1 + $0x240] sm:$0xff] }
  0x3b   : > { %v4214_v8 = vpack.c.bf16 %v739_v62, %v738_v61  ;;  %v5335_v13 = vld [vmem:[%s5136_s16 + $0xa8] sm:$0xff]  ;;  %v4242_v14 = vpack.c.bf16 %v769_v63, %v768_v60  ;;  %v625_v16 = vadd.f32 %v5332_v12, %v5329_v11  ;;  %v5373_v35 = vld [vmem:[%s5136_s16 + $0xe0] sm:$0xff]  ;;  %v5379_v37 = vld [vmem:[%s5136_s16 + $0xb8] sm:$0xff]  ;;  %v4218_v39 = vpack.c.bf16 %v741_v15, %v740_v6 }
  0x3c   : > { %845 = vmatprep.mubr.f32.mxu0 %v597_v22  ;;  %v614_v29 = vrot.slane %v613_v24, 1  ;;  %v604_v36 = vadd.f32 %v603_v27, %v602_v17  ;;  %v5343_v17 = vld [vmem:[%s5136_s16 + $0x20] sm:$0xff]  ;;  %v725_v22 = vld [vmem:[%s6683_s1 + $0x248] sm:$0xff]  ;;  %v5363_v27 = vld [vmem:[%s5136_s16 + $0x38] sm:$0xff] }
  0x3d   : > { %846 = vmatmul.mubr.f32.vlgmr.msra.gmra.mrb[0].mxu0 %v588_v28  ;;  %v5355_v23 = vld [vmem:[%s5136_s16 + $0xe8] sm:$0xff]  ;;  %v4244_v28 = vpack.c.bf16 %v753_v1, %v752_v0  ;;  %v626_v34 = vadd.f32 %v625_v16, %v5335_v13  ;;  %v5385_v44 = vld [vmem:[%s5136_s16 + $0x30] sm:$0xff]  ;;  %v772_v56 = vld [vmem:[%s6683_s1 + $0x3c0] sm:$0xff]  ;;  %v4220_v62 = vpack.c.bf16 %v725_v22, %v724_v19 }
  0x3e   : > { %v615_v41 = vadd.f32 %v614_v29, %v613_v24  ;;  %4205 = vmatpush3.bf16.msra.mxu0 %v4204_v25  ;;  %v605_v46 = vrot.slane %v604_v36, 1  ;;  %v5358_v24 = vld [vmem:[%s5136_s16 + $0xa0] sm:$0xff]  ;;  %v616_v25 = vadd.f32 %v5346_v18, %v5343_v17  ;;  %v4216_v29 = vpack.c.bf16 %v723_v5, %v722_v4  ;;  %v5388_v45 = vld [vmem:[%s5136_s16 + $0x70] sm:$0xff]  ;;  %v727_v6 = vld [vmem:[%s6683_s1 + $0x258] sm:$0xff] }
  0x3f   : > { %4207 = vmatprep.subr.bf16.mxu0 %v4206_v33  ;;  %v755_v33 = vld [vmem:[%s6683_s1 + $0x338] sm:$0xff]  ;;  %v742_v49 = vld [vmem:[%s6683_s1 + $0x2d0] sm:$0xff]  ;;  %v627_v51 = vadd.f32 %v626_v34, %v5355_v23  ;;  %v634_v55 = vadd.f32 %v5388_v45, %v5385_v44  ;;  %v745_v15 = vld [vmem:[%s6683_s1 + $0x2e8] sm:$0xff] }
  0x40   : > { %915 = vmatprep.mubr.f32.mxu1 %v615_v41  ;;  %v606_v57 = vadd.f32 %v605_v46, %v604_v36  ;;  %v5376_v36 = vld [vmem:[%s5136_s16 + $0x78] sm:$0xff]  ;;  %v617_v40 = vadd.f32 %v616_v25, %v5358_v24  ;;  %v5391_v46 = vld [vmem:[%s5136_s16 + $0xb0] sm:$0xff]  ;;  %v4248_v1 = vpack.c.bf16 %v755_v33, %v754_v32 }
  0x41   : > { %v643_v41 = vadd.f32 %v5376_v36, %v5363_v27  ;;  %v5414_v61 = vld [vmem:[%s5136_s16 + $0xf0] sm:$0xff]  ;;  %v628_v63 = vrot.slane %v627_v51, 4  ;;  %v635_v0 = vadd.f32 %v634_v55, %v5391_v46  ;;  %v775_v25 = vld [vmem:[%s6683_s1 + $0x3d8] sm:$0xff] }
  0x42   : > { %916 = vmatmul.mubr.f32.vlgmr.msra.gmra.mrb[0].mxu1 %v606_v57  ;;  %4209 = vmatpush3.bf16.msra.mxu0 %v4208_v47  ;;  %v4246_v47 = vpack.c.bf16 %v771_v10, %v770_v9  ;;  %v773_v57 = vld [vmem:[%s6683_s1 + $0x3c8] sm:$0xff]  ;;  %v726_v5 = vld [vmem:[%s6683_s1 + $0x250] sm:$0xff] }
  0x43   : > { %4237 = vmatpush3.bf16.msra.mxu1 %v4236_v50  ;;  %4211 = vmatprep.subr.bf16.mxu0 %v4210_v54  ;;  %v743_v50 = vld [vmem:[%s6683_s1 + $0x2d8] sm:$0xff]  ;;  %v644_v60 = vadd.f32 %v643_v41, %v5379_v37  ;;  %v4250_v9 = vpack.c.bf16 %v773_v57, %v772_v56  ;;  %v757_v10 = vld [vmem:[%s6683_s1 + $0x348] sm:$0xff]  ;;  %v629_v16 = vadd.f32 %v628_v63, %v627_v51  ;;  %v774_v22 = vld [vmem:[%s6683_s1 + $0x3d0] sm:$0xff] }
  0x44   : > { %4239 = vmatprep.subr.bf16.mxu1 %v4238_v59  ;;  %v5401_v54 = vld [vmem:[%s5136_s16 + $0xf8] sm:$0xff]  ;;  %v618_v59 = vadd.f32 %v617_v40, %v5373_v35  ;;  %v4222_v4 = vpack.c.bf16 %v743_v50, %v742_v49  ;;  %v636_v19 = vadd.f32 %v635_v0, %v5414_v61  ;;  %v4224_v32 = vpack.c.bf16 %v727_v6, %v726_v5  ;;  %v758_v40 = vld [vmem:[%s6683_s1 + $0x350] sm:$0xff]  ;;  %v729_v49 = vld [vmem:[%s6683_s1 + $0x268] sm:$0xff] }
  0x45   : > { %v630_v33 = vrot.slane %v629_v16, 2  ;;  %v4254_v55 = vpack.c.bf16 %v775_v25, %v774_v22  ;;  %v759_v56 = vld [vmem:[%s6683_s1 + $0x358] sm:$0xff]  ;;  %v746_v57 = vld [vmem:[%s6683_s1 + $0x2f0] sm:$0xff]  ;;  %v776_v63 = vld [vmem:[%s6683_s1 + $0x3e0] sm:$0xff] }
  0x46   : > { %4213 = vmatpush3.bf16.msra.mxu0 %v4212_v3  ;;  %v756_v3 = vld [vmem:[%s6683_s1 + $0x340] sm:$0xff]  ;;  %v637_v34 = vrot.slane %v636_v19, 4  ;;  %v777_v0 = vld [vmem:[%s6683_s1 + $0x3e8] sm:$0xff]  ;;  %v778_v25 = vld [vmem:[%s6683_s1 + $0x3f0] sm:$0xff] }
  0x47   : > { %4241 = vmatpush3.bf16.msra.mxu1 %v4240_v7  ;;  %4215 = vmatprep.subr.bf16.mxu0 %v4214_v8  ;;  %v619_v7 = vrot.slane %v618_v59, 4  ;;  %v645_v8 = vadd.f32 %v644_v60, %v5401_v54  ;;  %v631_v60 = vadd.f32 %v630_v33, %v629_v16  ;;  %v760_v16 = vld [vmem:[%s6683_s1 + $0x360] sm:$0xff] }
  0x48   : > { %4243 = vmatprep.subr.bf16.mxu1 %v4242_v14  ;;  %v744_v14 = vld [vmem:[%s6683_s1 + $0x2e0] sm:$0xff] }
  0x49   : > { %v4226_v41 = vpack.c.bf16 %v745_v15, %v744_v14  ;;  %v632_v5 = vrot.slane %v631_v60, 1  ;;  %v4258_v15 = vpack.c.bf16 %v777_v0, %v776_v63  ;;  %v1067_v63 = vld [vmem:[%s6685_s3 + $0x28] sm:$0xff]  ;;  %v4839_v0 = vmov 0.0  }
  0x4a   : > { %4217 = vmatpush3.bf16.msra.mxu0 %v4216_v29  ;;  %v646_v29 = vrot.slane %v645_v8, 4  ;;  %544 = vst.msk [vmem:[#allocation2 + $0x4c] sm:$0xf] %vm539_vm2, %v4839_v0  ;;  %540 = vst.msk [vmem:[#allocation2 + $0x40] sm:$0xf] %vm539_vm2, %v4839_v0 }
  0x4b   : > { %4245 = vmatpush3.bf16.msra.mxu1 %v4244_v28  ;;  %4219 = vmatprep.subr.bf16.mxu0 %v4218_v39  ;;  %v620_v28 = vadd.f32 %v619_v7, %v618_v59  ;;  %v4252_v39 = vpack.c.bf16 %v757_v10, %v756_v3  ;;  %v747_v59 = vld [vmem:[%s6683_s1 + $0x2f8] sm:$0xff]  ;;  %v4256_v7 = vpack.c.bf16 %v759_v56, %v758_v40 }
  0x4c   : > { %4247 = vmatprep.subr.bf16.mxu1 %v4246_v47  ;;  %v728_v47 = vld [vmem:[%s6683_s1 + $0x260] sm:$0xff]  ;;  %v647_v51 = vadd.f32 %v646_v29, %v645_v8  ;;  %v4230_v8 = vpack.c.bf16 %v747_v59, %v746_v57  ;;  %v731_v10 = vld [vmem:[%s6683_s1 + $0x278] sm:$0xff]  ;;  %v633_v22 = vadd.f32 %v632_v5, %v631_v60  ;;  %v1063_v57 = vld [vmem:[%s6685_s3 + $0x8] sm:$0xff]  ;;  %541 = vst.msk [vmem:[#allocation2 + $0x50] sm:$0xf] %vm539_vm2, %v4839_v0 }
  0x4d   : > { %v621_v50 = vrot.slane %v620_v28, 2  ;;  %v1062_v59 = vld [vmem:[%s6685_s3] sm:$0xff]  ;;  %v1065_v60 = vld [vmem:[%s6685_s3 + $0x18] sm:$0xff]  ;;  %542 = vst.msk [vmem:[#allocation2 + $0x60] sm:$0xf] %vm539_vm2, %v4839_v0 }
  0x4e   : > { %4221 = vmatpush3.bf16.msra.mxu0 %v4220_v62  ;;  %v638_v62 = vadd.f32 %v637_v34, %v636_v19  ;;  %v648_v3 = vrot.slane %v647_v51, 2  ;;  %v761_v19 = vld [vmem:[%s6683_s1 + $0x368] sm:$0xff]  ;;  %985 = vmatprep.mubr.f32.mxu0 %v633_v22  ;;  %v780_v5 = vld [vmem:[%s6684_s2] sm:$0x1]  ;;  %543 = vst.msk [vmem:[#allocation2 + $0x70] sm:$0xf] %vm539_vm2, %v4839_v0 }
  0x4f   : > { %4249 = vmatpush3.bf16.msra.mxu1 %v4248_v1  ;;  %4223 = vmatprep.subr.bf16.mxu0 %v4222_v4  ;;  %v622_v1 = vadd.f32 %v621_v50, %v620_v28  ;;  %v4228_v4 = vpack.c.bf16 %v729_v49, %v728_v47  ;;  %v779_v28 = vld [vmem:[%s6683_s1 + $0x3f8] sm:$0xff]  ;;  %v762_v47 = vld [vmem:[%s6683_s1 + $0x370] sm:$0xff]  ;;  %545 = vst.msk [vmem:[#allocation2 + $0x5c] sm:$0xf] %vm539_vm2, %v4839_v0  ;;  %546 = vst.msk [vmem:[#allocation2 + $0x6c] sm:$0xf] %vm539_vm2, %v4839_v0 }
  0x50   : > { %4251 = vmatprep.subr.bf16.mxu1 %v4250_v9  ;;  %v639_v6 = vrot.slane %v638_v62, 2  ;;  %v730_v9 = vld [vmem:[%s6683_s1 + $0x270] sm:$0xff]  ;;  %v649_v14 = vadd.f32 %v648_v3, %v647_v51  ;;  %v763_v49 = vld [vmem:[%s6683_s1 + $0x378] sm:$0xff]  ;;  %547 = vst.msk [vmem:[#allocation2 + $0x7c] sm:$0xf] %vm539_vm2, %v4839_v0 }
  0x51   : > { %v623_v29 = vrot.slane %v622_v1, 1  ;;  %v4232_v33 = vpack.c.bf16 %v731_v10, %v730_v9 }
  0x52   : > { %4225 = vmatpush3.bf16.msra.mxu0 %v4224_v32  ;;  %v650_v32 = vrot.slane %v649_v14, 1  ;;  %v640_v34 = vadd.f32 %v639_v6, %v638_v62  ;;  %v1064_v62 = vld [vmem:[%s6685_s3 + $0x10] sm:$0xff] }
  0x53   : > { %4253 = vmatpush3.bf16.msra.mxu1 %v4252_v39  ;;  %4227 = vmatprep.subr.bf16.mxu0 %v4226_v41  ;;  %v4260_v39 = vpack.c.bf16 %v761_v19, %v760_v16  ;;  %v4262_v41 = vpack.c.bf16 %v779_v28, %v778_v25  ;;  %v624_v50 = vadd.f32 %v623_v29, %v622_v1  ;;  %v1069_v1 = vld [vmem:[%s6685_s3 + $0x38] sm:$0xff] }
  0x54   : > { %4255 = vmatprep.subr.bf16.mxu1 %v4254_v55  ;;  %v651_v40 = vadd.f32 %v650_v32, %v649_v14  ;;  %v641_v51 = vrot.slane %v640_v34, 1  ;;  %v4264_v55 = vpack.c.bf16 %v763_v49, %v762_v47  ;;  %v1416_v32 = vld [vmem:[%s6687_s5 + $0x80] sm:$0xff]  ;;  %v1068_v47 = vld [vmem:[%s6685_s3 + $0x30] sm:$0xff] }
  0x55   : > { %v1400_v49 = vld [vmem:[%s6687_s5] sm:$0xff] }
  0x56   : > { %4229 = vmatpush3.bf16.msra.mxu0 %v4228_v4  ;;  %1055 = vmatprep.mubr.f32.mxu1 %v651_v40  ;;  %v642_v56 = vadd.f32 %v641_v51, %v640_v34  ;;  %v1066_v34 = vld [vmem:[%s6685_s3 + $0x20] sm:$0xff] }
  0x57   : > { %4257 = vmatpush3.bf16.msra.mxu1 %v4256_v7  ;;  %4231 = vmatprep.subr.bf16.mxu0 %v4230_v8  ;;  %v1448_v40 = vld [vmem:[%s6687_s5 + $0x180] sm:$0xff] }
  0x58   : > { %4259 = vmatprep.subr.bf16.mxu1 %v4258_v15 }
  0x5a   : > { %4233 = vmatpush3.bf16.msra.mxu0 %v4232_v33 }
  0x5b   : > { %4261 = vmatpush3.bf16.msra.mxu1 %v4260_v39  ;;  %1116 = vmatprep.subr.mxu0 %v1063_v57  ;;  %v1417_v39 = vld [vmem:[%s6687_s5 + $0x88] sm:$0xff]  ;;  %v1418_v57 = vld [vmem:[%s6687_s5 + $0x90] sm:$0xff] }
  0x5c   : > { %4263 = vmatprep.subr.bf16.mxu1 %v4262_v41  ;;  %v1449_v41 = vld [vmem:[%s6687_s5 + $0x188] sm:$0xff] }
  0x5d   : > { %986 = vmatmul.mubr.f32.vlgmr.msra.gmra.mrb[2].mxu0 %v624_v50  ;;  %v1401_v50 = vld [vmem:[%s6687_s5 + $0x8] sm:$0xff] }
  0x5e   : > { %1117 = vmatpush1.msra.mxu0 %v1062_v59  ;;  %1180 = vmatprep.mubr.f32.mxu0 %v4839_v0  ;;  %v4266_v59 = vpack.c.bf16 %v1417_v39, %v1416_v32  ;;  %v1437_v39 = vld [vmem:[%s6687_s5 + $0x128] sm:$0xff] }
  0x5f   : > { %4265 = vmatpush3.bf16.msra.mxu1 %v4264_v55  ;;  %1258 = vmatprep.subr.mxu0 %v1067_v63  ;;  %v1432_v55 = vld [vmem:[%s6687_s5 + $0x100] sm:$0xff]  ;;  %v1450_v63 = vld [vmem:[%s6687_s5 + $0x190] sm:$0xff] }
  0x60   : > { %1187 = vmatprep.subr.mxu1 %v1065_v60  ;;  %v4298_v60 = vpack.c.bf16 %v1449_v41, %v1448_v40  ;;  %v1422_v40 = vld [vmem:[%s6687_s5 + $0xb0] sm:$0xff]  ;;  %v1423_v41 = vld [vmem:[%s6687_s5 + $0xb8] sm:$0xff] }
  0x62   : > { %1056 = vmatmul.mubr.f32.vlgmr.msra.gmra.mrb[2].mxu1 %v642_v56  ;;  %v1433_v56 = vld [vmem:[%s6687_s5 + $0x108] sm:$0xff] }
  0x63   : > { %1188 = vmatpush1.msra.mxu1 %v1064_v62  ;;  %1251 = vmatprep.mubr.f32.mxu1 %v4839_v0  ;;  %v1419_v62 = vld [vmem:[%s6687_s5 + $0x98] sm:$0xff] }
  0x64   : > { %1329 = vmatprep.subr.mxu1 %v1069_v1  ;;  %v1451_v1 = vld [vmem:[%s6687_s5 + $0x198] sm:$0xff] }
 0x110   : > { %v3650_v3 = vpop.f32.mrb[0].mxu0 }
 0x111   : > { %v3651_v4 = vpop.f32.mrb[1].mxu0 }
 0x112   : > { %v3652_v6 = vadd.f32 %v3651_v4, %v3650_v3  ;;  %v4268_v3 = vpack.c.bf16 %v1401_v50, %v1400_v49  ;;  %v4300_v4 = vpack.c.bf16 %v1433_v56, %v1432_v55  ;;  %v1455_v49 = vld [vmem:[%s6687_s5 + $0x1b8] sm:$0xff]  ;;  %v1406_v55 = vld [vmem:[%s6687_s5 + $0x30] sm:$0xff] }
 0x113   : > { %v1407_v56 = vld [vmem:[%s6687_s5 + $0x38] sm:$0xff] }
 0x114   : > { %v848_v7 = vadd.f32 %v3652_v6, %v780_v5  ;;  %v1402_v5 = vld [vmem:[%s6687_s5 + $0x10] sm:$0xff]  ;;  %v1403_v6 = vld [vmem:[%s6687_s5 + $0x18] sm:$0xff] }
 0x115   : > { %v3685_v8 = vpop.f32.mrb[0].mxu1 }
 0x116   : > { %v3686_v9 = vpop.f32.mrb[1].mxu1 }
 0x117   : > { %v3687_v10 = vadd.f32 %v3686_v9, %v3685_v8  ;;  %v4302_v8 = vpack.c.bf16 %v1451_v1, %v1450_v63  ;;  %v1434_v9 = vld [vmem:[%s6687_s5 + $0x110] sm:$0xff]  ;;  %v1456_v63 = vld [vmem:[%s6687_s5 + $0x1c0] sm:$0xff]  ;;  %v1457_v1 = vld [vmem:[%s6687_s5 + $0x1c8] sm:$0xff] }
 0x119   : > { %v918_v14 = vadd.f32 %v3687_v10, %v848_v7  ;;  %v4270_v7 = vpack.c.bf16 %v1419_v62, %v1418_v57  ;;  %v1435_v10 = vld [vmem:[%s6687_s5 + $0x118] sm:$0xff]  ;;  %v4278_v57 = vpack.c.bf16 %v1423_v41, %v1422_v40  ;;  %v1425_v62 = vld [vmem:[%s6687_s5 + $0xc8] sm:$0xff]  ;;  %v1428_v40 = vld [vmem:[%s6687_s5 + $0xe0] sm:$0xff] }
 0x11a   : > { %v1429_v41 = vld [vmem:[%s6687_s5 + $0xe8] sm:$0xff] }
 0x130   : > { %v3720_v15 = vpop.f32.mrb[2].mxu0 }
 0x131   : > { %v3721_v16 = vpop.f32.mrb[3].mxu0 }
 0x132   : > { %v3722_v19 = vadd.f32 %v3721_v16, %v3720_v15  ;;  %v1421_v15 = vld [vmem:[%s6687_s5 + $0xa8] sm:$0xff]  ;;  %v1452_v16 = vld [vmem:[%s6687_s5 + $0x1a0] sm:$0xff] }
 0x134   : > { %v988_v22 = vadd.f32 %v3722_v19, %v918_v14  ;;  %v1420_v14 = vld [vmem:[%s6687_s5 + $0xa0] sm:$0xff]  ;;  %v1453_v19 = vld [vmem:[%s6687_s5 + $0x1a8] sm:$0xff] }
 0x135   : > { %v3755_v25 = vpop.f32.mrb[2].mxu1  ;;  %v4274_v32 = vpack.c.bf16 %v1421_v15, %v1420_v14  ;;  %v1426_v14 = vld [vmem:[%s6687_s5 + $0xd0] sm:$0xff]  ;;  %v1427_v15 = vld [vmem:[%s6687_s5 + $0xd8] sm:$0xff] }
 0x136   : > { %v3756_v28 = vpop.f32.mrb[3].mxu1 }
 0x137   : > { %v3757_v29 = vadd.f32 %v3756_v28, %v3755_v25  ;;  %v4304_v25 = vpack.c.bf16 %v1435_v10, %v1434_v9  ;;  %v1404_v28 = vld [vmem:[%s6687_s5 + $0x20] sm:$0xff]  ;;  %v1441_v10 = vld [vmem:[%s6687_s5 + $0x148] sm:$0xff] }
 0x138   : > { %v1440_v9 = vld [vmem:[%s6687_s5 + $0x140] sm:$0xff] }
 0x139   : > { %v1058_v33 = vadd.f32 %v3757_v29, %v988_v22  ;;  %v4272_v22 = vpack.c.bf16 %v1403_v6, %v1402_v5  ;;  %v1405_v29 = vld [vmem:[%s6687_s5 + $0x28] sm:$0xff]  ;;  %v1408_v5 = vld [vmem:[%s6687_s5 + $0x40] sm:$0xff] }
 0x13a   : > { %v4276_v50 = vpack.c.bf16 %v1405_v29, %v1404_v28  ;;  %v1409_v6 = vld [vmem:[%s6687_s5 + $0x48] sm:$0xff]  ;;  %v1410_v28 = vld [vmem:[%s6687_s5 + $0x50] sm:$0xff]  ;;  %v1411_v29 = vld [vmem:[%s6687_s5 + $0x58] sm:$0xff] }
 0x13b   : > { %v1061_v51 = vmax.f32 %v1058_v33, 0.0  ;;  %v4306_v33 = vpack.c.bf16 %v1453_v19, %v1452_v16  ;;  %v1458_v16 = vld [vmem:[%s6687_s5 + $0x1d0] sm:$0xff]  ;;  %v1459_v19 = vld [vmem:[%s6687_s5 + $0x1d8] sm:$0xff] }
 0x13d   : > { %3529 = vmatmul.mubr.msk.f32.vlgmr.msra.gmra.mrb[4].mxu0 %vm1112_vm1, %v1061_v51  ;;  %3530 = vmatmul.mubr.msk.f32.vlgmr.msra.gmra.mrb[4].mxu1 %vm1112_vm1, %v1061_v51 }
 0x13e   : > { %1259 = vmatpush1.msra.mxu0 %v1066_v34  ;;  %1330 = vmatpush1.msra.mxu1 %v1068_v47  ;;  %v1436_v34 = vld [vmem:[%s6687_s5 + $0x120] sm:$0xff]  ;;  %v1454_v47 = vld [vmem:[%s6687_s5 + $0x1b0] sm:$0xff] }
 0x13f   : > { %1322 = vmatprep.mubr.f32.mxu0 %v4839_v0  ;;  %1393 = vmatprep.mubr.f32.mxu1 %v4839_v0 }
 0x140   : > { %4267 = vmatprep.subr.bf16.mxu0 %v4266_v59  ;;  %4299 = vmatprep.subr.bf16.mxu1 %v4298_v60  ;;  %v4310_v59 = vpack.c.bf16 %v1455_v49, %v1454_v47  ;;  %v1424_v60 = vld [vmem:[%s6687_s5 + $0xc0] sm:$0xff]  ;;  %v1461_v49 = vld [vmem:[%s6687_s5 + $0x1e8] sm:$0xff] }
 0x141   : > { %3531 = vmatmul.mubr.msk.f32.vlgmr.msra.gmra.mrb[6].mxu0 %vm1112_vm1, %v1061_v51  ;;  %3532 = vmatmul.mubr.msk.f32.vlgmr.msra.gmra.mrb[6].mxu1 %vm1112_vm1, %v1061_v51  ;;  %v4308_v51 = vpack.c.bf16 %v1437_v39, %v1436_v34  ;;  %v1442_v34 = vld [vmem:[%s6687_s5 + $0x150] sm:$0xff]  ;;  %v1443_v39 = vld [vmem:[%s6687_s5 + $0x158] sm:$0xff]  ;;  %v1460_v47 = vld [vmem:[%s6687_s5 + $0x1e0] sm:$0xff] }
 0x142   : > { %4269 = vmatpush3.bf16.msra.mxu0 %v4268_v3  ;;  %4301 = vmatpush3.bf16.msra.mxu1 %v4300_v4  ;;  %v4280_v3 = vpack.c.bf16 %v1407_v56, %v1406_v55  ;;  %v1412_v55 = vld [vmem:[%s6687_s5 + $0x60] sm:$0xff]  ;;  %v1413_v56 = vld [vmem:[%s6687_s5 + $0x68] sm:$0xff] }
 0x143   : > { %4271 = vmatprep.subr.bf16.mxu0 %v4270_v7  ;;  %4303 = vmatprep.subr.bf16.mxu1 %v4302_v8  ;;  %v4282_v7 = vpack.c.bf16 %v1425_v62, %v1424_v60  ;;  %v4314_v8 = vpack.c.bf16 %v1457_v1, %v1456_v63  ;;  %v1430_v60 = vld [vmem:[%s6687_s5 + $0xf0] sm:$0xff]  ;;  %v1431_v62 = vld [vmem:[%s6687_s5 + $0xf8] sm:$0xff] }
 0x144   : > { %1592 = vmatprep.mubr.f32.mxu0 %v5166_v20  ;;  %1677 = vmatprep.mubr.f32.mxu1 %v5203_v38  ;;  %v1438_v20 = vld [vmem:[%s6687_s5 + $0x130] sm:$0xff]  ;;  %v1439_v38 = vld [vmem:[%s6687_s5 + $0x138] sm:$0xff] }
 0x145   : > { %v4312_v4 = vpack.c.bf16 %v1439_v38, %v1438_v20  ;;  %v1444_v20 = vld [vmem:[%s6687_s5 + $0x160] sm:$0xff]  ;;  %v1445_v38 = vld [vmem:[%s6687_s5 + $0x168] sm:$0xff]  ;;  %v1462_v63 = vld [vmem:[%s6687_s5 + $0x1f0] sm:$0xff] }
 0x146   : > { %4273 = vmatpush3.bf16.msra.mxu0 %v4272_v22  ;;  %4305 = vmatpush3.bf16.msra.mxu1 %v4304_v25  ;;  %v4284_v22 = vpack.c.bf16 %v1409_v6, %v1408_v5  ;;  %v4316_v25 = vpack.c.bf16 %v1441_v10, %v1440_v9  ;;  %v1463_v1 = vld [vmem:[%s6687_s5 + $0x1f8] sm:$0xff]  ;;  %v1414_v5 = vld [vmem:[%s6687_s5 + $0x70] sm:$0xff] }
 0x147   : > { %4275 = vmatprep.subr.bf16.mxu0 %v4274_v32  ;;  %4307 = vmatprep.subr.bf16.mxu1 %v4306_v33  ;;  %v4286_v32 = vpack.c.bf16 %v1427_v15, %v1426_v14  ;;  %v4318_v33 = vpack.c.bf16 %v1459_v19, %v1458_v16  ;;  %v1415_v6 = vld [vmem:[%s6687_s5 + $0x78] sm:$0xff]  ;;  %v1446_v9 = vld [vmem:[%s6687_s5 + $0x170] sm:$0xff]  ;;  %v1480_v14 = vld [vmem:[%s6687_s5 + $0x280] sm:$0xff] }
 0x148   : > { %v1447_v10 = vld [vmem:[%s6687_s5 + $0x178] sm:$0xff]  ;;  %v1481_v15 = vld [vmem:[%s6687_s5 + $0x288] sm:$0xff]  ;;  %v1512_v16 = vld [vmem:[%s6687_s5 + $0x380] sm:$0xff] }
 0x149   : > { %v1513_v19 = vld [vmem:[%s6687_s5 + $0x388] sm:$0xff] }
 0x14a   : > { %4277 = vmatpush3.bf16.msra.mxu0 %v4276_v50  ;;  %4309 = vmatpush3.bf16.msra.mxu1 %v4308_v51  ;;  %v4288_v50 = vpack.c.bf16 %v1411_v29, %v1410_v28  ;;  %v4320_v51 = vpack.c.bf16 %v1443_v39, %v1442_v34  ;;  %v1464_v28 = vld [vmem:[%s6687_s5 + $0x200] sm:$0xff]  ;;  %v1465_v29 = vld [vmem:[%s6687_s5 + $0x208] sm:$0xff] }
 0x14b   : > { %4279 = vmatprep.subr.bf16.mxu0 %v4278_v57  ;;  %4311 = vmatprep.subr.bf16.mxu1 %v4310_v59  ;;  %v4290_v57 = vpack.c.bf16 %v1429_v41, %v1428_v40  ;;  %v4322_v59 = vpack.c.bf16 %v1461_v49, %v1460_v47  ;;  %v1496_v34 = vld [vmem:[%s6687_s5 + $0x300] sm:$0xff]  ;;  %v1497_v39 = vld [vmem:[%s6687_s5 + $0x308] sm:$0xff]  ;;  %v1482_v40 = vld [vmem:[%s6687_s5 + $0x290] sm:$0xff] }
 0x14c   : > { %v1483_v41 = vld [vmem:[%s6687_s5 + $0x298] sm:$0xff]  ;;  %v1514_v47 = vld [vmem:[%s6687_s5 + $0x390] sm:$0xff] }
 0x14d   : > { %v1515_v49 = vld [vmem:[%s6687_s5 + $0x398] sm:$0xff] }
 0x14e   : > { %4281 = vmatpush3.bf16.msra.mxu0 %v4280_v3  ;;  %4313 = vmatpush3.bf16.msra.mxu1 %v4312_v4  ;;  %v4292_v3 = vpack.c.bf16 %v1413_v56, %v1412_v55  ;;  %v4324_v4 = vpack.c.bf16 %v1445_v38, %v1444_v20  ;;  %v1466_v55 = vld [vmem:[%s6687_s5 + $0x210] sm:$0xff]  ;;  %v1467_v56 = vld [vmem:[%s6687_s5 + $0x218] sm:$0xff] }
 0x14f   : > { %4283 = vmatprep.subr.bf16.mxu0 %v4282_v7  ;;  %4315 = vmatprep.subr.bf16.mxu1 %v4314_v8  ;;  %v4294_v7 = vpack.c.bf16 %v1431_v62, %v1430_v60  ;;  %v4326_v8 = vpack.c.bf16 %v1463_v1, %v1462_v63  ;;  %v1498_v20 = vld [vmem:[%s6687_s5 + $0x310] sm:$0xff]  ;;  %v1499_v38 = vld [vmem:[%s6687_s5 + $0x318] sm:$0xff]  ;;  %v1484_v60 = vld [vmem:[%s6687_s5 + $0x2a0] sm:$0xff] }
 0x150   : > { %v1485_v62 = vld [vmem:[%s6687_s5 + $0x2a8] sm:$0xff]  ;;  %v1516_v63 = vld [vmem:[%s6687_s5 + $0x3a0] sm:$0xff] }
 0x151   : > { %v1517_v1 = vld [vmem:[%s6687_s5 + $0x3a8] sm:$0xff] }
 0x152   : > { %4285 = vmatpush3.bf16.msra.mxu0 %v4284_v22  ;;  %4317 = vmatpush3.bf16.msra.mxu1 %v4316_v25  ;;  %v4296_v22 = vpack.c.bf16 %v1415_v6, %v1414_v5  ;;  %v4328_v25 = vpack.c.bf16 %v1447_v10, %v1446_v9  ;;  %v1468_v5 = vld [vmem:[%s6687_s5 + $0x220] sm:$0xff]  ;;  %v1469_v6 = vld [vmem:[%s6687_s5 + $0x228] sm:$0xff]  ;;  %v1486_v9 = vld [vmem:[%s6687_s5 + $0x2b0] sm:$0xff] }
 0x153   : > { %4287 = vmatprep.subr.bf16.mxu0 %v4286_v32  ;;  %4319 = vmatprep.subr.bf16.mxu1 %v4318_v33  ;;  %v4330_v32 = vpack.c.bf16 %v1481_v15, %v1480_v14  ;;  %v4362_v33 = vpack.c.bf16 %v1513_v19, %v1512_v16  ;;  %v1487_v10 = vld [vmem:[%s6687_s5 + $0x2b8] sm:$0xff]  ;;  %v1518_v14 = vld [vmem:[%s6687_s5 + $0x3b0] sm:$0xff]  ;;  %v4340_v16 = vpack.c.bf16 %v1469_v6, %v1468_v5  ;;  %v1524_v5 = vld [vmem:[%s6687_s5 + $0x3e0] sm:$0xff] }
 0x154   : > { %v1519_v15 = vld [vmem:[%s6687_s5 + $0x3b8] sm:$0xff]  ;;  %v1525_v6 = vld [vmem:[%s6687_s5 + $0x3e8] sm:$0xff] }
 0x156   : > { %4289 = vmatpush3.bf16.msra.mxu0 %v4288_v50  ;;  %4321 = vmatpush3.bf16.msra.mxu1 %v4320_v51  ;;  %v4332_v50 = vpack.c.bf16 %v1465_v29, %v1464_v28  ;;  %v4364_v51 = vpack.c.bf16 %v1497_v39, %v1496_v34  ;;  %v1488_v28 = vld [vmem:[%s6687_s5 + $0x2c0] sm:$0xff]  ;;  %v1489_v29 = vld [vmem:[%s6687_s5 + $0x2c8] sm:$0xff] }
 0x157   : > { %4291 = vmatprep.subr.bf16.mxu0 %v4290_v57  ;;  %4323 = vmatprep.subr.bf16.mxu1 %v4322_v59  ;;  %v4334_v57 = vpack.c.bf16 %v1483_v41, %v1482_v40  ;;  %v4366_v59 = vpack.c.bf16 %v1515_v49, %v1514_v47  ;;  %v4740_v34 = vld [vmem:[%s5136_s16 + $0x88] sm:$0xff]  ;;  %v1472_v41 = vld [vmem:[%s6687_s5 + $0x240] sm:$0xff] }
 0x158   : > { %v1473_v47 = vld [vmem:[%s6687_s5 + $0x248] sm:$0xff] }
 0x159   : > { %v1505_v49 = vld [vmem:[%s6687_s5 + $0x348] sm:$0xff] }
 0x15a   : > { %4293 = vmatpush3.bf16.msra.mxu0 %v4292_v3  ;;  %4325 = vmatpush3.bf16.msra.mxu1 %v4324_v4  ;;  %v4336_v3 = vpack.c.bf16 %v1467_v56, %v1466_v55  ;;  %v4368_v4 = vpack.c.bf16 %v1499_v38, %v1498_v20  ;;  %v1522_v55 = vld [vmem:[%s6687_s5 + $0x3d0] sm:$0xff]  ;;  %v1523_v56 = vld [vmem:[%s6687_s5 + $0x3d8] sm:$0xff]  ;;  %v4348_v20 = vpack.c.bf16 %v1473_v47, %v1472_v41 }
 0x15b   : > { %4295 = vmatprep.subr.bf16.mxu0 %v4294_v7  ;;  %4327 = vmatprep.subr.bf16.mxu1 %v4326_v8  ;;  %v4338_v7 = vpack.c.bf16 %v1485_v62, %v1484_v60  ;;  %v4370_v8 = vpack.c.bf16 %v1517_v1, %v1516_v63  ;;  %v1474_v60 = vld [vmem:[%s6687_s5 + $0x250] sm:$0xff]  ;;  %v1475_v62 = vld [vmem:[%s6687_s5 + $0x258] sm:$0xff] }
 0x15c   : > { %v1507_v1 = vld [vmem:[%s6687_s5 + $0x358] sm:$0xff] }
 0x15e   : > { %4297 = vmatpush3.bf16.msra.mxu0 %v4296_v22  ;;  %4329 = vmatpush3.bf16.msra.mxu1 %v4328_v25  ;;  %v1470_v22 = vld [vmem:[%s6687_s5 + $0x230] sm:$0xff]  ;;  %v1471_v25 = vld [vmem:[%s6687_s5 + $0x238] sm:$0xff] }
 0x15f   : > { %4331 = vmatprep.subr.bf16.mxu0 %v4330_v32  ;;  %4363 = vmatprep.subr.bf16.mxu1 %v4362_v33  ;;  %v1520_v32 = vld [vmem:[%s6687_s5 + $0x3c0] sm:$0xff]  ;;  %v1521_v33 = vld [vmem:[%s6687_s5 + $0x3c8] sm:$0xff]  ;;  %v4344_v39 = vpack.c.bf16 %v1471_v25, %v1470_v22 }
 0x161   : > { %1593 = vmatmul.mubr.f32.vlgmr.msra.gmra.mrb[8].mxu0 %v5178_v26  ;;  %1678 = vmatmul.mubr.f32.vlgmr.msra.gmra.mrb[8].mxu1 %v5230_v52  ;;  %v1500_v26 = vld [vmem:[%s6687_s5 + $0x320] sm:$0xff]  ;;  %v1501_v52 = vld [vmem:[%s6687_s5 + $0x328] sm:$0xff] }
 0x162   : > { %4333 = vmatpush3.bf16.msra.mxu0 %v4332_v50  ;;  %4365 = vmatpush3.bf16.msra.mxu1 %v4364_v51  ;;  %v4372_v19 = vpack.c.bf16 %v1501_v52, %v1500_v26  ;;  %v1490_v50 = vld [vmem:[%s6687_s5 + $0x2d0] sm:$0xff]  ;;  %v1491_v51 = vld [vmem:[%s6687_s5 + $0x2d8] sm:$0xff]  ;;  %v1476_v26 = vld [vmem:[%s6687_s5 + $0x260] sm:$0xff] }
 0x163   : > { %4335 = vmatprep.subr.bf16.mxu0 %v4334_v57  ;;  %4367 = vmatprep.subr.bf16.mxu1 %v4366_v59  ;;  %v4741_v57 = vld [vmem:[%s5136_s16 + $0xc8] sm:$0xff]  ;;  %v4742_v59 = vld [vmem:[%s5136_s16 + $0xc0] sm:$0xff]  ;;  %v4350_v63 = vpack.c.bf16 %v1491_v51, %v1490_v50 }
 0x164   : > { %1597 = vmatprep.mubr.f32.mxu0 %v5169_v21  ;;  %1682 = vmatprep.mubr.f32.mxu1 %v5209_v42  ;;  %v4342_v21 = vpack.c.bf16 %v1487_v10, %v1486_v9  ;;  %v4374_v42 = vpack.c.bf16 %v1519_v15, %v1518_v14  ;;  %v1477_v52 = vld [vmem:[%s6687_s5 + $0x268] sm:$0xff]  ;;  %v4386_v10 = vpack.c.bf16 %v1525_v6, %v1524_v5  ;;  %v1494_v14 = vld [vmem:[%s6687_s5 + $0x2f0] sm:$0xff]  ;;  %v1495_v15 = vld [vmem:[%s6687_s5 + $0x2f8] sm:$0xff] }
 0x165   : > { %1598 = vmatmul.mubr.f32.gmra.mrb[10].mxu0 %v5188_v30  ;;  %1683 = vmatmul.mubr.f32.gmra.mrb[10].mxu1 %v5233_v53  ;;  %v1502_v30 = vld [vmem:[%s6687_s5 + $0x330] sm:$0xff]  ;;  %v1503_v53 = vld [vmem:[%s6687_s5 + $0x338] sm:$0xff]  ;;  %v4356_v22 = vpack.c.bf16 %v1477_v52, %v1476_v26 }
 0x166   : > { %4337 = vmatpush3.bf16.msra.mxu0 %v4336_v3  ;;  %4369 = vmatpush3.bf16.msra.mxu1 %v4368_v4  ;;  %v4376_v40 = vpack.c.bf16 %v1503_v53, %v1502_v30  ;;  %v1492_v3 = vld [vmem:[%s6687_s5 + $0x2e0] sm:$0xff]  ;;  %v1493_v4 = vld [vmem:[%s6687_s5 + $0x2e8] sm:$0xff]  ;;  %v1479_v30 = vld [vmem:[%s6687_s5 + $0x278] sm:$0xff] }
 0x167   : > { %4339 = vmatprep.subr.bf16.mxu0 %v4338_v7  ;;  %4371 = vmatprep.subr.bf16.mxu1 %v4370_v8  ;;  %v4352_v7 = vpack.c.bf16 %v1475_v62, %v1474_v60  ;;  %v4354_v9 = vpack.c.bf16 %v1493_v4, %v1492_v3 }
 0x168   : > { %1602 = vmatprep.mubr.f32.mxu0 %v4740_v34  ;;  %1687 = vmatprep.mubr.f32.mxu1 %v5212_v43  ;;  %v4346_v43 = vpack.c.bf16 %v1489_v29, %v1488_v28  ;;  %v1510_v28 = vld [vmem:[%s6687_s5 + $0x370] sm:$0xff]  ;;  %v1511_v29 = vld [vmem:[%s6687_s5 + $0x378] sm:$0xff] }
 0x169   : > { %1603 = vmatmul.mubr.f32.gmra.mrb[12].mxu0 %v5191_v31  ;;  %1688 = vmatmul.mubr.f32.gmra.mrb[12].mxu1 %v5237_v58  ;;  %v4378_v31 = vpack.c.bf16 %v1521_v33, %v1520_v32  ;;  %v1504_v58 = vld [vmem:[%s6687_s5 + $0x340] sm:$0xff]  ;;  %v4392_v33 = vpack.c.bf16 %v1511_v29, %v1510_v28 }
 0x16a   : > { %4341 = vmatpush3.bf16.msra.mxu0 %v4340_v16  ;;  %4373 = vmatpush3.bf16.msra.mxu1 %v4372_v19  ;;  %v4380_v38 = vpack.c.bf16 %v1505_v49, %v1504_v58  ;;  %v1526_v16 = vld [vmem:[%s6687_s5 + $0x3f0] sm:$0xff]  ;;  %v1527_v19 = vld [vmem:[%s6687_s5 + $0x3f8] sm:$0xff]  ;;  %v3533_v29 = vld [vmem:[%s6688_s6] ss:$0 sm:$0xff] }
 0x16b   : > { %4343 = vmatprep.subr.bf16.mxu0 %v4342_v21  ;;  %4375 = vmatprep.subr.bf16.mxu1 %v4374_v42  ;;  %v1478_v21 = vld [vmem:[%s6687_s5 + $0x270] sm:$0xff]  ;;  %v4358_v42 = vpack.c.bf16 %v1495_v15, %v1494_v14  ;;  %v4390_v53 = vpack.c.bf16 %v1527_v19, %v1526_v16 }
 0x16c   : > { %1607 = vmatprep.mubr.f32.mxu0 %v4741_v57  ;;  %1692 = vmatprep.mubr.f32.mxu1 %v5219_v48  ;;  %v4382_v48 = vpack.c.bf16 %v1523_v56, %v1522_v55  ;;  %v4360_v32 = vpack.c.bf16 %v1479_v30, %v1478_v21 }
 0x16d   : > { %1608 = vmatmul.mubr.f32.gmra.mrb[14].mxu0 %v4742_v59  ;;  %1693 = vmatmul.mubr.f32.gmra.mrb[14].mxu1 %v5243_v2  ;;  %v1506_v2 = vld [vmem:[%s6687_s5 + $0x350] sm:$0xff] }
 0x16e   : > { %4345 = vmatpush3.bf16.msra.mxu0 %v4344_v39  ;;  %4377 = vmatpush3.bf16.msra.mxu1 %v4376_v40  ;;  %v4384_v8 = vpack.c.bf16 %v1507_v1, %v1506_v2 }
 0x16f   : > { %4347 = vmatprep.subr.bf16.mxu0 %v4346_v43  ;;  %4379 = vmatprep.subr.bf16.mxu1 %v4378_v31 }
 0x170   : > { %1762 = vmatprep.mubr.f32.mxu0 %v5329_v11  ;;  %1847 = vmatprep.mubr.f32.mxu1 %v5363_v27  ;;  %v1508_v11 = vld [vmem:[%s6687_s5 + $0x360] sm:$0xff]  ;;  %v1509_v27 = vld [vmem:[%s6687_s5 + $0x368] sm:$0xff] }
 0x171   : > { %v4388_v25 = vpack.c.bf16 %v1509_v27, %v1508_v11 }
 0x172   : > { %4349 = vmatpush3.bf16.msra.mxu0 %v4348_v20  ;;  %4381 = vmatpush3.bf16.msra.mxu1 %v4380_v38 }
 0x173   : > { %4351 = vmatprep.subr.bf16.mxu0 %v4350_v63  ;;  %4383 = vmatprep.subr.bf16.mxu1 %v4382_v48 }
 0x176   : > { %4353 = vmatpush3.bf16.msra.mxu0 %v4352_v7  ;;  %4385 = vmatpush3.bf16.msra.mxu1 %v4384_v8 }
 0x177   : > { %4355 = vmatprep.subr.bf16.mxu0 %v4354_v9  ;;  %4387 = vmatprep.subr.bf16.mxu1 %v4386_v10 }
 0x17a   : > { %4357 = vmatpush3.bf16.msra.mxu0 %v4356_v22  ;;  %4389 = vmatpush3.bf16.msra.mxu1 %v4388_v25 }
 0x17b   : > { %4359 = vmatprep.subr.bf16.mxu0 %v4358_v42  ;;  %4391 = vmatprep.subr.bf16.mxu1 %v4390_v53 }
 0x17e   : > { %4361 = vmatpush3.bf16.msra.mxu0 %v4360_v32  ;;  %4393 = vmatpush3.bf16.msra.mxu1 %v4392_v33 }
 0x181   : > { %1763 = vmatmul.mubr.f32.vlgmr.msra.gmra.mrb[16].mxu0 %v5343_v17  ;;  %1848 = vmatmul.mubr.f32.vlgmr.msra.gmra.mrb[16].mxu1 %v5385_v44  ;;  %v3541_v44 = vld [vmem:[%s6690_s8 + $0x70] sm:$0xff] }
 0x182   : > { %1767 = vmatprep.mubr.f32.mxu0 %v5332_v12  ;;  %1852 = vmatprep.mubr.f32.mxu1 %v5376_v36  ;;  %v3535_v12 = vld [vmem:[%s6690_s8 + $0x40] sm:$0xff]  ;;  %v3540_v36 = vld [vmem:[%s6690_s8 + $0x68] sm:$0xff] }
 0x185   : > { %1768 = vmatmul.mubr.f32.gmra.mrb[18].mxu0 %v5346_v18  ;;  %1853 = vmatmul.mubr.f32.gmra.mrb[18].mxu1 %v5388_v45  ;;  %v3537_v18 = vld [vmem:[%s6690_s8 + $0x50] sm:$0xff]  ;;  %v3542_v45 = vld [vmem:[%s6690_s8 + $0x78] sm:$0xff] }
 0x186   : > { %1772 = vmatprep.mubr.f32.mxu0 %v5335_v13  ;;  %1857 = vmatprep.mubr.f32.mxu1 %v5379_v37  ;;  %v3536_v13 = vld [vmem:[%s6690_s8 + $0x48] sm:$0xff] }
 0x187   : > { %v4394_v17 = vpack.c.bf16 %v3536_v13, %v3535_v12 }
 0x189   : > { %1773 = vmatmul.mubr.f32.gmra.mrb[20].mxu0 %v5358_v24  ;;  %1858 = vmatmul.mubr.f32.gmra.mrb[20].mxu1 %v5391_v46  ;;  %v4406_v46 = vpack.c.bf16 %v3542_v45, %v3541_v44 }
 0x18a   : > { %1777 = vmatprep.mubr.f32.mxu0 %v5355_v23  ;;  %1862 = vmatprep.mubr.f32.mxu1 %v5401_v54  ;;  %v3538_v23 = vld [vmem:[%s6690_s8 + $0x58] sm:$0xff]  ;;  %v3547_v54 = vld [vmem:[%s6690_s8 + $0x80] sm:$0xff] }
 0x18b   : > { %4395 = vmatprep.subr.bf16.mxu0 %v4394_v17  ;;  %v4398_v24 = vpack.c.bf16 %v3538_v23, %v3537_v18  ;;  %v3534_v18 = vld [vmem:[%s6689_s7] ss:$0 sm:$0xff] }
 0x18c   : > { %4397 = vmatpush3.bf16.msra.mxu0 %v4394_v17 }
 0x18d   : > { %1778 = vmatmul.mubr.f32.gmra.mrb[22].mxu0 %v5373_v35  ;;  %1863 = vmatmul.mubr.f32.gmra.mrb[22].mxu1 %v5414_v61  ;;  %v3539_v35 = vld [vmem:[%s6690_s8 + $0x60] sm:$0xff]  ;;  %v3548_v61 = vld [vmem:[%s6690_s8 + $0x88] sm:$0xff] }
 0x18e   : > { %4399 = vmatprep.subr.bf16.mxu0 %v4398_v24  ;;  %v4402_v37 = vpack.c.bf16 %v3540_v36, %v3539_v35  ;;  %v5980_v34 = vpack.c.bf16 %v3548_v61, %v3547_v54 }
 0x190   : > { %4401 = vmatpush3.bf16.msra.mxu0 %v4398_v24 }
 0x191   : > { %4403 = vmatprep.subr.bf16.mxu0 %v4402_v37 }
 0x194   : > { %4405 = vmatpush3.bf16.msra.mxu0 %v4402_v37 }
 0x195   : > { %4407 = vmatprep.subr.bf16.mxu0 %v4406_v46 }
 0x198   : > { %4409 = vmatpush3.bf16.msra.mxu0 %v4406_v46 }
 0x199   : > { %4411 = vmatprep.subr.bf16.mxu0 %v5980_v34 }
 0x210   : > { %v5983_v39 = vpop.f32.mrb[4].mxu0  ;;  %v5985_v40 = vpop.f32.mrb[4].mxu1 }
 0x211   : > { %v5987_v41 = vpop.f32.mrb[5].mxu0  ;;  %v5989_v47 = vpop.f32.mrb[5].mxu1 }
 0x214   : > { %v5991_v43 = vpop.f32.mrb[6].mxu0  ;;  %v5993_v31 = vpop.f32.mrb[6].mxu1 }
 0x215   : > { %v5995_v58 = vpop.f32.mrb[7].mxu0  ;;  %v5997_v49 = vpop.f32.mrb[7].mxu1 }
 0x234   : > { %v3790_v50 = vpop.f32.mrb[8].mxu0  ;;  %v3834_v51 = vpop.f32.mrb[8].mxu1 }
 0x235   : > { %v3791_v55 = vpop.f32.mrb[9].mxu0  ;;  %v3835_v56 = vpop.f32.mrb[9].mxu1 }
 0x236   : > { %v3792_v57 = vadd.f32 %v3791_v55, %v3790_v50  ;;  %v3836_v59 = vadd.f32 %v3835_v56, %v3834_v51 }
 0x238   : > { %v1680_v20 = vadd.f32 %v3836_v59, %v3792_v57  ;;  %v3793_v38 = vpop.f32.mrb[10].mxu0  ;;  %v3837_v60 = vpop.f32.mrb[10].mxu1 }
 0x239   : > { %v3794_v62 = vpop.f32.mrb[11].mxu0  ;;  %v3838_v63 = vpop.f32.mrb[11].mxu1 }
 0x23a   : > { %v3795_v48 = vadd.f32 %v3794_v62, %v3793_v38  ;;  %v3839_v2 = vadd.f32 %v3838_v63, %v3837_v60 }
 0x23c   : > { %v1685_v1 = vadd.f32 %v3839_v2, %v3795_v48  ;;  %v3796_v3 = vpop.f32.mrb[12].mxu0  ;;  %v3840_v4 = vpop.f32.mrb[12].mxu1 }
 0x23d   : > { %v3797_v5 = vpop.f32.mrb[13].mxu0  ;;  %v3841_v6 = vpop.f32.mrb[13].mxu1 }
 0x23e   : > { %v3798_v7 = vadd.f32 %v3797_v5, %v3796_v3  ;;  %v3842_v8 = vadd.f32 %v3841_v6, %v3840_v4 }
 0x240   : > { %v1690_v26 = vadd.f32 %v3842_v8, %v3798_v7  ;;  %v3799_v52 = vpop.f32.mrb[14].mxu0  ;;  %v3843_v9 = vpop.f32.mrb[14].mxu1  ;;  %v3549_v8 = vld [vmem:[%s6690_s8 + $0x90] sm:$0xff] }
 0x241   : > { %v3800_v10 = vpop.f32.mrb[15].mxu0  ;;  %v3844_v11 = vpop.f32.mrb[15].mxu1 }
 0x242   : > { %v3801_v27 = vadd.f32 %v3800_v10, %v3799_v52  ;;  %v3845_v14 = vadd.f32 %v3844_v11, %v3843_v9 }
 0x244   : > { %v1695_v15 = vadd.f32 %v3845_v14, %v3801_v27  ;;  %v3551_v27 = vld [vmem:[%s6690_s8 + $0xa0] sm:$0xff]  ;;  %v3552_v14 = vld [vmem:[%s6690_s8 + $0xa8] sm:$0xff] }
 0x254   : > { %v3878_v16 = vpop.f32.mrb[16].mxu0  ;;  %v3922_v19 = vpop.f32.mrb[16].mxu1 }
 0x255   : > { %v3879_v22 = vpop.f32.mrb[17].mxu0  ;;  %v3923_v25 = vpop.f32.mrb[17].mxu1 }
 0x256   : > { %v3880_v21 = vadd.f32 %v3879_v22, %v3878_v16  ;;  %v3924_v42 = vadd.f32 %v3923_v25, %v3922_v19  ;;  %v3553_v19 = vld [vmem:[%s6690_s8 + $0xb0] sm:$0xff]  ;;  %v3554_v22 = vld [vmem:[%s6690_s8 + $0xb8] sm:$0xff] }
 0x257   : > { %v4422_v25 = vpack.c.bf16 %v3554_v22, %v3553_v19  ;;  %v3564_v22 = vld [vmem:[%s6692_s10] ss:$0 sm:$0xff] }
 0x258   : > { %v1765_v30 = vadd.f32 %v3880_v21, %v1680_v20  ;;  %v3881_v53 = vpop.f32.mrb[18].mxu0  ;;  %v3925_v28 = vpop.f32.mrb[18].mxu1 }
 0x259   : > { %v3882_v32 = vpop.f32.mrb[19].mxu0  ;;  %v3926_v33 = vpop.f32.mrb[19].mxu1 }
 0x25a   : > { %v1850_v12 = vadd.f32 %v3924_v42, %v1765_v30  ;;  %v3883_v13 = vadd.f32 %v3882_v32, %v3881_v53  ;;  %v3927_v17 = vadd.f32 %v3926_v33, %v3925_v28  ;;  %v1903_v42 = vld [vmem:[%s6690_s8 + $0x8] sm:$0xff]  ;;  %v1904_v28 = vld [vmem:[%s6690_s8 + $0x10] sm:$0xff] }
 0x25c   : > { %v1875_v23 = vmul.f32 %v3533_v29, %v1850_v12  ;;  %v1770_v24 = vadd.f32 %v3883_v13, %v1685_v1  ;;  %v3884_v35 = vpop.f32.mrb[20].mxu0  ;;  %v3928_v36 = vpop.f32.mrb[20].mxu1  ;;  %v1906_v12 = vld [vmem:[%s6690_s8 + $0x20] sm:$0xff]  ;;  %v1907_v13 = vld [vmem:[%s6690_s8 + $0x28] sm:$0xff] }
 0x25d   : > { %v3885_v37 = vpop.f32.mrb[21].mxu0  ;;  %v3929_v44 = vpop.f32.mrb[21].mxu1 }
 0x25e   : > { %v1886_v45 = vadd.f32 %v3534_v18, %v1875_v23  ;;  %v1855_v46 = vadd.f32 %v3927_v17, %v1770_v24  ;;  %v3886_v54 = vadd.f32 %v3885_v37, %v3884_v35  ;;  %v3930_v61 = vadd.f32 %v3929_v44, %v3928_v36  ;;  %v1908_v24 = vld [vmem:[%s6690_s8 + $0x30] sm:$0xff]  ;;  %v1909_v35 = vld [vmem:[%s6690_s8 + $0x38] sm:$0xff] }
 0x25f   : > { %v4438_v37 = vpack.c.bf16 %v1909_v35, %v1908_v24  ;;  %v3579_v24 = vld [vmem:[%s6693_s11 + $0x90] sm:$0xff]  ;;  %v3580_v35 = vld [vmem:[%s6693_s11 + $0x98] sm:$0xff] }
 0x260   : > { %v1890_v50 = vmax.f32 %v1886_v45, 0.0  ;;  %v1876_v51 = vmul.f32 %v3533_v29, %v1855_v46  ;;  %v1775_v55 = vadd.f32 %v3886_v54, %v1690_v26  ;;  %v3887_v56 = vpop.f32.mrb[22].mxu0  ;;  %v3931_v57 = vpop.f32.mrb[22].mxu1  ;;  %v3550_v26 = vld [vmem:[%s6690_s8 + $0x98] sm:$0xff]  ;;  %v3565_v54 = vld [vmem:[%s6693_s11 + $0x40] sm:$0xff] }
 0x261   : > { %v3888_v59 = vpop.f32.mrb[23].mxu0  ;;  %v3932_v20 = vpop.f32.mrb[23].mxu1  ;;  %v4414_v10 = vpack.c.bf16 %v3550_v26, %v3549_v8  ;;  %v2637_v8 = vld [vmem:[%s6696_s14 + $0x88] sm:$0xff] }
 0x262   : > { %1894 = vst.msk [vmem:[#allocation2 + $0x44] sm:$0xff] %vm520_vm0, %v1890_v50  ;;  %v1887_v38 = vadd.f32 %v3534_v18, %v1876_v51  ;;  %v1860_v60 = vadd.f32 %v3930_v61, %v1775_v55  ;;  %v3889_v62 = vadd.f32 %v3888_v59, %v3887_v56  ;;  %v3933_v63 = vadd.f32 %v3932_v20, %v3931_v57  ;;  %v3566_v61 = vld [vmem:[%s6693_s11 + $0x48] sm:$0xff]  ;;  %v3567_v51 = vld [vmem:[%s6693_s11 + $0x50] sm:$0xff]  ;;  %v3568_v55 = vld [vmem:[%s6693_s11 + $0x58] sm:$0xff] }
 0x263   : > { %v4442_v50 = vpack.c.bf16 %v3566_v61, %v3565_v54  ;;  %v4446_v56 = vpack.c.bf16 %v3568_v55, %v3567_v51  ;;  %v3569_v57 = vld [vmem:[%s6693_s11 + $0x60] sm:$0xff]  ;;  %v3570_v59 = vld [vmem:[%s6693_s11 + $0x68] sm:$0xff]  ;;  %v3583_v51 = vld [vmem:[%s6693_s11 + $0xb0] sm:$0xff] }
 0x264   : > { %v1891_v48 = vmax.f32 %v1887_v38, 0.0  ;;  %v1877_v2 = vmul.f32 %v3533_v29, %v1860_v60  ;;  %v1780_v1 = vadd.f32 %v3889_v62, %v1695_v15  ;;  %v4418_v15 = vpack.c.bf16 %v3552_v14, %v3551_v27  ;;  %v3571_v38 = vld [vmem:[%s6693_s11 + $0x70] sm:$0xff]  ;;  %v3572_v60 = vld [vmem:[%s6693_s11 + $0x78] sm:$0xff]  ;;  %v2645_v26 = vld [vmem:[%s6696_s14 + $0xc8] sm:$0xff] }
 0x265   : > { %4443 = vmatprep.subr.bf16.mxu1 %v4442_v50  ;;  %v4450_v20 = vpack.c.bf16 %v3570_v59, %v3569_v57  ;;  %v4454_v62 = vpack.c.bf16 %v3572_v60, %v3571_v38  ;;  %v2653_v27 = vld [vmem:[%s6696_s14 + $0x108] sm:$0xff]  ;;  %v3584_v55 = vld [vmem:[%s6693_s11 + $0xb8] sm:$0xff]  ;;  %v2265_v59 = vld [vmem:[%s6693_s11] sm:$0xff] }
 0x266   : > { %1895 = vst.msk [vmem:[#allocation2 + $0x54] sm:$0xff] %vm520_vm0, %v1891_v48  ;;  %v1888_v3 = vadd.f32 %v3534_v18, %v1877_v2  ;;  %v1865_v4 = vadd.f32 %v3933_v63, %v1780_v1  ;;  %4445 = vmatpush3.bf16.msra.mxu1 %v4442_v50  ;;  %v3577_v63 = vld [vmem:[%s6693_s11 + $0x80] sm:$0xff]  ;;  %v3578_v48 = vld [vmem:[%s6693_s11 + $0x88] sm:$0xff]  ;;  %v4470_v57 = vpack.c.bf16 %v3584_v55, %v3583_v51  ;;  %v2267_v60 = vld [vmem:[%s6693_s11 + $0x10] sm:$0xff] }
 0x267   : > { %4447 = vmatprep.subr.bf16.mxu1 %v4446_v56  ;;  %v4458_v2 = vpack.c.bf16 %v3578_v48, %v3577_v63  ;;  %v2621_v1 = vld [vmem:[%s6696_s14 + $0x8] sm:$0xff] }
 0x268   : > { %v1892_v5 = vmax.f32 %v1888_v3, 0.0  ;;  %v1878_v6 = vmul.f32 %v3533_v29, %v1865_v4  ;;  %v1905_v29 = vld [vmem:[%s6690_s8 + $0x18] sm:$0xff]  ;;  %v2629_v3 = vld [vmem:[%s6696_s14 + $0x48] sm:$0xff] }
 0x269   : > { %v1910_v7 = vld [vmem:[#allocation2 + $0x44] sm:$0xff]  ;;  %v4430_v32 = vpack.c.bf16 %v1905_v29, %v1904_v28  ;;  %v4490_v4 = vpack.c.bf16 %v2629_v3, %v2621_v1 }
 0x26a   : > { %1896 = vst.msk [vmem:[#allocation2 + $0x64] sm:$0xff] %vm520_vm0, %v1892_v5  ;;  %v1889_v52 = vadd.f32 %v3534_v18, %v1878_v6  ;;  %4022 = vmatprep.mubr.msk.f32.mxu0 %vm520_vm0, %v1910_v7  ;;  %v2020_v30 = vld [vmem:[#allocation2 + $0x48] sm:$0xff]  ;;  %v4434_v18 = vpack.c.bf16 %v1907_v13, %v1906_v12  ;;  %v1898_v36 = vld [vmem:[#allocation2 + $0x40] sm:$0xff]  ;;  %4449 = vmatpush3.bf16.msra.mxu1 %v4446_v56 }
 0x26b   : > { %4451 = vmatprep.subr.bf16.mxu1 %v4450_v20  ;;  %v2620_v5 = vld [vmem:[%s6696_s14] sm:$0xff]  ;;  %v2661_v14 = vld [vmem:[%s6696_s14 + $0x148] sm:$0xff] }
 0x26c   : > { %v1893_v9 = vmax.f32 %v1889_v52, 0.0  ;;  %v2628_v6 = vld [vmem:[%s6696_s14 + $0x40] sm:$0xff]  ;;  %v4494_v52 = vpack.c.bf16 %v2645_v26, %v2637_v8  ;;  %v2270_v1 = vld [vmem:[%s6693_s11 + $0x28] sm:$0xff] }
 0x26d   : > { %v1911_v11 = vld [vmem:[#allocation2 + $0x54] sm:$0xff]  ;;  %v4492_v7 = vpack.c.bf16 %v2628_v6, %v2620_v5  ;;  %v2625_v55 = vld [vmem:[%s6696_s14 + $0x28] sm:$0xff] }
 0x26e   : > { %1897 = vst.msk [vmem:[#allocation2 + $0x74] sm:$0xff] %vm520_vm0, %v1893_v9  ;;  %4023 = vmatmul.mubr.msk.f32.vlgmr.msra.gmra.mrb[24].mxu0 %vm520_vm0, %v1911_v11  ;;  %v2021_v33 = vld [vmem:[#allocation2 + $0x58] sm:$0xff]  ;;  %v1899_v44 = vld [vmem:[#allocation2 + $0x50] sm:$0xff]  ;;  %4453 = vmatpush3.bf16.msra.mxu1 %v4450_v20  ;;  %v2636_v9 = vld [vmem:[%s6696_s14 + $0x80] sm:$0xff] }
 0x26f   : > { %4413 = vmatpush3.bf16.msra.mxu0 %v5980_v34  ;;  %v1902_v34 = vld [vmem:[%s6690_s8] sm:$0xff]  ;;  %4455 = vmatprep.subr.bf16.mxu1 %v4454_v62  ;;  %v2266_v20 = vld [vmem:[%s6693_s11 + $0x8] sm:$0xff]  ;;  %v2271_v6 = vld [vmem:[%s6693_s11 + $0x30] sm:$0xff] }
 0x270   : > { %4415 = vmatprep.subr.bf16.mxu0 %v4414_v10  ;;  %v4426_v53 = vpack.c.bf16 %v1903_v42, %v1902_v34  ;;  %v4474_v38 = vpack.c.bf16 %v2266_v20, %v2265_v59  ;;  %v2635_v20 = vld [vmem:[%s6696_s14 + $0x78] sm:$0xff] }
 0x271   : > { %v1912_v16 = vld [vmem:[#allocation2 + $0x64] sm:$0xff] }
 0x272   : > { %4025 = vmatprep.mubr.msk.f32.mxu0 %vm520_vm0, %v1912_v16  ;;  %v2022_v17 = vld [vmem:[#allocation2 + $0x68] sm:$0xff]  ;;  %v1900_v45 = vld [vmem:[#allocation2 + $0x60] sm:$0xff]  ;;  %4457 = vmatpush3.bf16.msra.mxu1 %v4454_v62  ;;  %v2268_v62 = vld [vmem:[%s6693_s11 + $0x18] sm:$0xff] }
 0x273   : > { %4417 = vmatpush3.bf16.msra.mxu0 %v4414_v10  ;;  %4459 = vmatprep.subr.bf16.mxu1 %v4458_v2  ;;  %v2644_v10 = vld [vmem:[%s6696_s14 + $0xc0] sm:$0xff]  ;;  %v4478_v63 = vpack.c.bf16 %v2268_v62, %v2267_v60 }
 0x274   : > { %4419 = vmatprep.subr.bf16.mxu0 %v4418_v15  ;;  %v4496_v11 = vpack.c.bf16 %v2644_v10, %v2636_v9  ;;  %v3563_v16 = vld [vmem:[%s6691_s9] ss:$0 sm:$0xff]  ;;  %v2631_v9 = vld [vmem:[%s6696_s14 + $0x58] sm:$0xff] }
 0x275   : > { %v1913_v21 = vld [vmem:[#allocation2 + $0x74] sm:$0xff]  ;;  %v3593_v60 = vld [vmem:[%s6694_s12] ss:$0 sm:$0xff] }
 0x276   : > { %4026 = vmatmul.mubr.msk.f32.gmra.mrb[26].mxu0 %vm520_vm0, %v1913_v21  ;;  %v2023_v23 = vld [vmem:[#allocation2 + $0x78] sm:$0xff]  ;;  %v1901_v46 = vld [vmem:[#allocation2 + $0x70] sm:$0xff] }
 0x277   : > { %4421 = vmatpush3.bf16.msra.mxu0 %v4418_v15  ;;  %4044 = vmatprep.mubr.msk.f32.mxu0 %vm520_vm0, %v2020_v30  ;;  %v4498_v15 = vpack.c.bf16 %v2661_v14, %v2653_v27  ;;  %v2630_v27 = vld [vmem:[%s6696_s14 + $0x50] sm:$0xff]  ;;  %v2639_v14 = vld [vmem:[%s6696_s14 + $0x98] sm:$0xff] }
 0x278   : > { %4423 = vmatprep.subr.bf16.mxu0 %v4422_v25 }
 0x27b   : > { %4425 = vmatpush3.bf16.msra.mxu0 %v4422_v25 }
 0x27c   : > { %4427 = vmatprep.subr.bf16.mxu0 %v4426_v53 }
 0x27e   : > { %4045 = vmatmul.mubr.msk.f32.vlgmr.msra.gmra.mrb[24].mxu0 %vm520_vm0, %v2021_v33 }
 0x27f   : > { %4047 = vmatprep.mubr.msk.f32.mxu0 %vm520_vm0, %v2022_v17  ;;  %4429 = vmatpush3.bf16.msra.mxu0 %v4426_v53 }
 0x280   : > { %4431 = vmatprep.subr.bf16.mxu0 %v4430_v32 }
 0x282   : > { %4048 = vmatmul.mubr.msk.f32.gmra.mrb[26].mxu0 %vm520_vm0, %v2023_v23 }
 0x283   : > { %4433 = vmatpush3.bf16.msra.mxu0 %v4430_v32  ;;  %4066 = vmatprep.mubr.msk.f32.mxu0 %vm520_vm0, %v1898_v36 }
 0x284   : > { %4435 = vmatprep.subr.bf16.mxu0 %v4434_v18 }
 0x287   : > { %4437 = vmatpush3.bf16.msra.mxu0 %v4434_v18 }
 0x288   : > { %4439 = vmatprep.subr.bf16.mxu0 %v4438_v37 }
 0x28b   : > { %4441 = vmatpush3.bf16.msra.mxu0 %v4438_v37  ;;  %v4462_v37 = vpack.c.bf16 %v3580_v35, %v3579_v24  ;;  %v2677_v24 = vld [vmem:[%s6696_s14 + $0x1c8] sm:$0xff] }
 0x28c   : > { %4491 = vmatprep.subr.bf16.mxu0 %v4490_v4 }
 0x28e   : > { %4067 = vmatmul.mubr.msk.f32.vlgmr.msra.gmra.mrb[24].mxu0 %vm520_vm0, %v1899_v44 }
 0x28f   : > { %4069 = vmatprep.mubr.msk.f32.mxu0 %vm520_vm0, %v1900_v45  ;;  %4493 = vmatpush1.bf16.msra.mxu0 %v4492_v7  ;;  %v3581_v45 = vld [vmem:[%s6693_s11 + $0xa0] sm:$0xff]  ;;  %v2272_v7 = vld [vmem:[%s6693_s11 + $0x38] sm:$0xff] }
 0x290   : > { %4495 = vmatprep.subr.bf16.mxu0 %v4494_v52  ;;  %v4486_v26 = vpack.c.bf16 %v2272_v7, %v2271_v6  ;;  %v2623_v52 = vld [vmem:[%s6696_s14 + $0x18] sm:$0xff]  ;;  %v2634_v6 = vld [vmem:[%s6696_s14 + $0x70] sm:$0xff]  ;;  %v2641_v7 = vld [vmem:[%s6696_s14 + $0xa8] sm:$0xff] }
 0x291   : > { %v4506_v10 = vpack.c.bf16 %v2631_v9, %v2623_v52  ;;  %v2649_v52 = vld [vmem:[%s6696_s14 + $0xe8] sm:$0xff]  ;;  %v2643_v9 = vld [vmem:[%s6696_s14 + $0xb8] sm:$0xff] }
 0x292   : > { %4070 = vmatmul.mubr.msk.f32.gmra.mrb[26].mxu0 %vm520_vm0, %v1901_v46  ;;  %v3582_v46 = vld [vmem:[%s6693_s11 + $0xa8] sm:$0xff] }
 0x293   : > { %2802 = vmatprep.mubr.f32.mxu0 %v4839_v0  ;;  %4497 = vmatpush1.bf16.msra.mxu0 %v4496_v11  ;;  %v4466_v61 = vpack.c.bf16 %v3582_v46, %v3581_v45  ;;  %v2622_v11 = vld [vmem:[%s6696_s14 + $0x10] sm:$0xff]  ;;  %v2676_v46 = vld [vmem:[%s6696_s14 + $0x1c0] sm:$0xff] }
 0x294   : > { %4499 = vmatprep.subr.bf16.mxu0 %v4498_v15  ;;  %v2647_v15 = vld [vmem:[%s6696_s14 + $0xd8] sm:$0xff] }
 0x361   : > { %v4068_v19 = vpop.f32.mrb[24].mxu0 }
 0x362   : > { %v2239_v25 = vmul.f32 %v4068_v19, %v3563_v16  ;;  %v2208_v21 = vpop.f32.mrb[25].mxu0  ;;  %v4510_v19 = vpack.c.bf16 %v2647_v15, %v2639_v14  ;;  %v2640_v15 = vld [vmem:[%s6696_s14 + $0xa0] sm:$0xff] }
 0x363   : > { %v2238_v34 = vmul.f32 %v3563_v16, %v2208_v21 }
 0x364   : > { %v2250_v42 = vadd.f32 %v3564_v22, %v2239_v25  ;;  %v2646_v25 = vld [vmem:[%s6696_s14 + $0xd0] sm:$0xff] }
 0x365   : > { %v2249_v30 = vadd.f32 %v3564_v22, %v2238_v34  ;;  %v4071_v53 = vpop.f32.mrb[26].mxu0  ;;  %v2655_v34 = vld [vmem:[%s6696_s14 + $0x118] sm:$0xff] }
 0x366   : > { %v2254_v28 = vmax.f32 %v2250_v42, 0.0  ;;  %v2241_v29 = vmul.f32 %v4071_v53, %v3563_v16  ;;  %v2218_v32 = vpop.f32.mrb[27].mxu0  ;;  %v2663_v42 = vld [vmem:[%s6696_s14 + $0x158] sm:$0xff] }
 0x367   : > { %v2253_v33 = vmax.f32 %v2249_v30, 0.0  ;;  %v2240_v12 = vmul.f32 %v3563_v16, %v2218_v32  ;;  %v4508_v16 = vpack.c.bf16 %v2630_v27, %v2622_v11  ;;  %v2652_v32 = vld [vmem:[%s6696_s14 + $0x100] sm:$0xff] }
 0x368   : > { %2258 = vst.msk [vmem:[#allocation2 + $0x54] sm:$0xff] %vm520_vm0, %v2254_v28  ;;  %v2252_v13 = vadd.f32 %v3564_v22, %v2241_v29  ;;  %v4514_v28 = vpack.c.bf16 %v2663_v42, %v2655_v34  ;;  %v2650_v34 = vld [vmem:[%s6696_s14 + $0xf0] sm:$0xff]  ;;  %v4526_v42 = vpack.c.bf16 %v2649_v52, %v2641_v7 }
 0x369   : > { %2257 = vst.msk [vmem:[#allocation2 + $0x44] sm:$0xff] %vm520_vm0, %v2253_v33  ;;  %v2251_v17 = vadd.f32 %v3564_v22, %v2240_v12  ;;  %v2638_v22 = vld [vmem:[%s6696_s14 + $0x90] sm:$0xff]  ;;  %v2660_v33 = vld [vmem:[%s6696_s14 + $0x140] sm:$0xff] }
 0x36a   : > { %v2256_v18 = vmax.f32 %v2252_v13, 0.0  ;;  %v4512_v53 = vpack.c.bf16 %v2646_v25, %v2638_v22  ;;  %v2654_v12 = vld [vmem:[%s6696_s14 + $0x110] sm:$0xff]  ;;  %v4500_v13 = vpack.c.bf16 %v2660_v33, %v2652_v32  ;;  %v2648_v25 = vld [vmem:[%s6696_s14 + $0xe0] sm:$0xff]  ;;  %v2667_v32 = vld [vmem:[%s6696_s14 + $0x178] sm:$0xff] }
 0x36b   : > { %v2255_v23 = vmax.f32 %v2251_v17, 0.0  ;;  %v2662_v17 = vld [vmem:[%s6696_s14 + $0x150] sm:$0xff]  ;;  %v4528_v33 = vpack.c.bf16 %v2648_v25, %v2640_v15 }
 0x36c   : > { %2260 = vst.msk [vmem:[#allocation2 + $0x74] sm:$0xff] %vm520_vm0, %v2256_v18  ;;  %v4516_v18 = vpack.c.bf16 %v2662_v17, %v2654_v12  ;;  %4501 = vmatpush1.bf16.msra.mxu0 %v4500_v13  ;;  %v2656_v13 = vld [vmem:[%s6696_s14 + $0x120] sm:$0xff] }
 0x36d   : > { %2259 = vst.msk [vmem:[#allocation2 + $0x64] sm:$0xff] %vm520_vm0, %v2255_v23  ;;  %v2669_v23 = vld [vmem:[%s6696_s14 + $0x188] sm:$0xff] }
 0x36e   : > { %v4502_v35 = vpack.c.bf16 %v2677_v24, %v2669_v23  ;;  %v2664_v24 = vld [vmem:[%s6696_s14 + $0x160] sm:$0xff] }
 0x36f   : > { %v2274_v44 = vld [vmem:[#allocation2 + $0x54] sm:$0xff] }
 0x370   : > { %v2273_v36 = vld [vmem:[#allocation2 + $0x44] sm:$0xff]  ;;  %v2384_v48 = vld [vmem:[#allocation2 + $0x58] sm:$0xff]  ;;  %v2262_v21 = vld [vmem:[#allocation2 + $0x50] sm:$0xff]  ;;  %4503 = vmatprep.subr.bf16.mxu0 %v4502_v35 }
 0x371   : > { %4088 = vmatprep.mubr.msk.f32.mxu1 %vm520_vm0, %v2273_v36  ;;  %v2383_v56 = vld [vmem:[#allocation2 + $0x48] sm:$0xff]  ;;  %v2261_v8 = vld [vmem:[#allocation2 + $0x40] sm:$0xff]  ;;  %v2671_v36 = vld [vmem:[%s6696_s14 + $0x198] sm:$0xff] }
 0x372   : > { %4089 = vmatmul.mubr.msk.f32.vlgmr.msra.gmra.mrb[24].mxu1 %vm520_vm0, %v2274_v44  ;;  %v2668_v44 = vld [vmem:[%s6696_s14 + $0x180] sm:$0xff]  ;;  %v2658_v35 = vld [vmem:[%s6696_s14 + $0x130] sm:$0xff] }
 0x373   : > { %4461 = vmatpush3.bf16.msra.mxu1 %v4458_v2  ;;  %v2276_v50 = vld [vmem:[#allocation2 + $0x74] sm:$0xff]  ;;  %v2269_v2 = vld [vmem:[%s6693_s11 + $0x20] sm:$0xff] }
 0x374   : > { %v2275_v54 = vld [vmem:[#allocation2 + $0x64] sm:$0xff]  ;;  %4463 = vmatprep.subr.bf16.mxu1 %v4462_v37  ;;  %v4482_v4 = vpack.c.bf16 %v2270_v1, %v2269_v2  ;;  %v2386_v5 = vld [vmem:[#allocation2 + $0x78] sm:$0xff]  ;;  %v2264_v29 = vld [vmem:[#allocation2 + $0x70] sm:$0xff] }
 0x375   : > { %4091 = vmatprep.mubr.msk.f32.mxu1 %vm520_vm0, %v2275_v54  ;;  %v2385_v3 = vld [vmem:[#allocation2 + $0x68] sm:$0xff]  ;;  %v2263_v30 = vld [vmem:[#allocation2 + $0x60] sm:$0xff]  ;;  %v2670_v54 = vld [vmem:[%s6696_s14 + $0x190] sm:$0xff] }
 0x376   : > { %4092 = vmatmul.mubr.msk.f32.gmra.mrb[26].mxu1 %vm520_vm0, %v2276_v50  ;;  %v4504_v50 = vpack.c.bf16 %v2676_v46, %v2668_v44  ;;  %v2624_v2 = vld [vmem:[%s6696_s14 + $0x20] sm:$0xff]  ;;  %v2681_v46 = vld [vmem:[%s6696_s14 + $0x1e8] sm:$0xff] }
 0x377   : > { %4465 = vmatpush3.bf16.msra.mxu1 %v4462_v37  ;;  %4110 = vmatprep.mubr.msk.f32.mxu1 %vm520_vm0, %v2383_v56  ;;  %v2679_v37 = vld [vmem:[%s6696_s14 + $0x1d8] sm:$0xff]  ;;  %v2633_v56 = vld [vmem:[%s6696_s14 + $0x68] sm:$0xff] }
 0x378   : > { %4467 = vmatprep.subr.bf16.mxu1 %v4466_v61  ;;  %v4518_v45 = vpack.c.bf16 %v2679_v37, %v2671_v36  ;;  %4505 = vmatpush1.bf16.msra.mxu0 %v4504_v50  ;;  %v4522_v59 = vpack.c.bf16 %v2633_v56, %v2625_v55  ;;  %v2666_v36 = vld [vmem:[%s6696_s14 + $0x170] sm:$0xff]  ;;  %v4532_v50 = vpack.c.bf16 %v2664_v24, %v2656_v13  ;;  %v2672_v55 = vld [vmem:[%s6696_s14 + $0x1a0] sm:$0xff] }
 0x37a   : > { %4523 = vmatprep.subr.bf16.mxu0 %v4522_v59  ;;  %v2680_v59 = vld [vmem:[%s6696_s14 + $0x1e0] sm:$0xff] }
 0x37b   : > { %4469 = vmatpush3.bf16.msra.mxu1 %v4466_v61  ;;  %v2678_v61 = vld [vmem:[%s6696_s14 + $0x1d0] sm:$0xff] }
 0x37c   : > { %4471 = vmatprep.subr.bf16.mxu1 %v4470_v57  ;;  %v4520_v51 = vpack.c.bf16 %v2678_v61, %v2670_v54  ;;  %v2675_v54 = vld [vmem:[%s6696_s14 + $0x1b8] sm:$0xff] }
 0x37d   : > { %v2683_v61 = vld [vmem:[%s6696_s14 + $0x1f8] sm:$0xff] }
 0x37f   : > { %4473 = vmatpush3.bf16.msra.mxu1 %v4470_v57  ;;  %v2627_v57 = vld [vmem:[%s6696_s14 + $0x38] sm:$0xff] }
 0x380   : > { %4475 = vmatprep.subr.bf16.mxu1 %v4474_v38 }
 0x382   : > { %4111 = vmatmul.mubr.msk.f32.vlgmr.msra.gmra.mrb[24].mxu1 %vm520_vm0, %v2384_v48 }
 0x383   : > { %4113 = vmatprep.mubr.msk.f32.mxu1 %vm520_vm0, %v2385_v3  ;;  %4477 = vmatpush3.bf16.msra.mxu1 %v4474_v38  ;;  %v4538_v38 = vpack.c.bf16 %v2635_v20, %v2627_v57  ;;  %v2674_v20 = vld [vmem:[%s6696_s14 + $0x1b0] sm:$0xff] }
 0x384   : > { %4479 = vmatprep.subr.bf16.mxu1 %v4478_v63 }
 0x386   : > { %4114 = vmatmul.mubr.msk.f32.gmra.mrb[26].mxu1 %vm520_vm0, %v2386_v5  ;;  %v2626_v5 = vld [vmem:[%s6696_s14 + $0x30] sm:$0xff] }
 0x387   : > { %4481 = vmatpush3.bf16.msra.mxu1 %v4478_v63  ;;  %4132 = vmatprep.mubr.msk.f32.mxu1 %vm520_vm0, %v2261_v8  ;;  %v3594_v63 = vld [vmem:[%s6695_s13] ss:$0 sm:$0xff]  ;;  %v4540_v14 = vpack.c.bf16 %v2634_v6, %v2626_v5 }
 0x388   : > { %4483 = vmatprep.subr.bf16.mxu1 %v4482_v4  ;;  %v1070_v6 = vld [vmem:[%s6686_s4] sm:$0xff] }
 0x38b   : > { %4485 = vmatpush3.bf16.msra.mxu1 %v4482_v4  ;;  %v2632_v4 = vld [vmem:[%s6696_s14 + $0x60] sm:$0xff] }
 0x38c   : > { %4487 = vmatprep.subr.bf16.mxu1 %v4486_v26  ;;  %v4524_v27 = vpack.c.bf16 %v2632_v4, %v2624_v2 }
 0x38f   : > { %4489 = vmatpush3.bf16.msra.mxu1 %v4486_v26 }
 0x390   : > { %4507 = vmatprep.subr.bf16.mxu1 %v4506_v10  ;;  %v2651_v10 = vld [vmem:[%s6696_s14 + $0xf8] sm:$0xff] }
 0x392   : > { %4133 = vmatmul.mubr.msk.f32.vlgmr.msra.gmra.mrb[24].mxu1 %vm520_vm0, %v2262_v21  ;;  %v2642_v21 = vld [vmem:[%s6696_s14 + $0xb0] sm:$0xff] }
 0x393   : > { %4135 = vmatprep.mubr.msk.f32.mxu1 %vm520_vm0, %v2263_v30  ;;  %4509 = vmatpush1.bf16.msra.mxu1 %v4508_v16  ;;  %v4542_v30 = vpack.c.bf16 %v2651_v10, %v2643_v9  ;;  %v4544_v12 = vpack.c.bf16 %v2650_v34, %v2642_v21 }
 0x394   : > { %4511 = vmatprep.subr.bf16.mxu1 %v4510_v19 }
 0x396   : > { %4136 = vmatmul.mubr.msk.f32.gmra.mrb[26].mxu1 %vm520_vm0, %v2264_v29  ;;  %v2659_v29 = vld [vmem:[%s6696_s14 + $0x138] sm:$0xff] }
 0x397   : > { %4513 = vmatpush1.bf16.msra.mxu1 %v4512_v53  ;;  %2891 = vmatprep.mubr.f32.mxu1 %v4839_v0  ;;  %v2657_v53 = vld [vmem:[%s6696_s14 + $0x128] sm:$0xff]  ;;  %v4546_v44 = vpack.c.bf16 %v2667_v32, %v2659_v29 }
 0x398   : > { %4515 = vmatprep.subr.bf16.mxu1 %v4514_v28  ;;  %v2665_v28 = vld [vmem:[%s6696_s14 + $0x168] sm:$0xff] }
 0x399   : > { %v4530_v37 = vpack.c.bf16 %v2665_v28, %v2657_v53 }
 0x39b   : > { %4517 = vmatpush1.bf16.msra.mxu1 %v4516_v18 }
 0x39c   : > { %4519 = vmatprep.subr.bf16.mxu1 %v4518_v45  ;;  %v2673_v45 = vld [vmem:[%s6696_s14 + $0x1a8] sm:$0xff] }
 0x39f   : > { %4521 = vmatpush1.bf16.msra.mxu1 %v4520_v51  ;;  %v4548_v51 = vpack.c.bf16 %v2666_v36, %v2658_v35 }
 0x3a0   : > { %4539 = vmatprep.subr.bf16.mxu1 %v4538_v38  ;;  %v2682_v38 = vld [vmem:[%s6696_s14 + $0x1f0] sm:$0xff] }
 0x465   : > { %v4134_v62 = vpop.f32.mrb[24].mxu1 }
 0x466   : > { %v2571_v48 = vpop.f32.mrb[25].mxu1  ;;  %v2602_v1 = vmul.f32 %v4134_v62, %v3593_v60  ;;  %v4550_v62 = vpack.c.bf16 %v2683_v61, %v2675_v54 }
 0x467   : > { %v2601_v3 = vmul.f32 %v3593_v60, %v2571_v48  ;;  %v4552_v48 = vpack.c.bf16 %v2682_v38, %v2674_v20 }
 0x468   : > { %v2613_v16 = vadd.f32 %v3594_v63, %v2602_v1  ;;  %v1072_v1 = vlaneseq }
 0x469   : > { %v2612_v8 = vadd.f32 %v3594_v63, %v2601_v3  ;;  %v4137_v26 = vpop.f32.mrb[26].mxu1 }
 0x46a   : > { %v2581_v11 = vpop.f32.mrb[27].mxu1  ;;  %v2617_v17 = vmax.f32 %v2613_v16, 0.0  ;;  %v2604_v18 = vmul.f32 %v4137_v26, %v3593_v60  ;;  %v1073_v3 = vshrl.u32 %v1072_v1, 7 }
 0x46b   : > { %v6301_v19 = vmax.f32 %v2612_v8, 0.0  ;;  %v2603_v22 = vmul.f32 %v3593_v60, %v2581_v11  ;;  %v4534_v60 = vpack.c.bf16 %v2681_v46, %v2673_v45  ;;  %v2684_v11 = vld [vmem:[%s6697_s15] sm:$0xff] }
 0x46c   : > { %v2615_v56 = vadd.f32 %v3594_v63, %v2604_v18  ;;  %v6394_v4 = vsub.s32 0, %v1073_v3  ;;  %v1082_v5 = vsub.s32 2, %v1073_v3  ;;  %v1078_v7 = vsub.s32 1, %v1073_v3 }
 0x46d   : > { %3595 = vmatmul.mubr.msk.f32.vlgmr.msra.gmra.mrb[28].mxu0 %vm520_vm0, %v6301_v19  ;;  %3599 = vmatmul.mubr.msk.f32.vlgmr.msra.gmra.mrb[28].mxu1 %vm520_vm0, %v6301_v19  ;;  %v2614_v23 = vadd.f32 %v3594_v63, %v2603_v22  ;;  %v4536_v63 = vpack.c.bf16 %v2680_v59, %v2672_v55  ;;  %v1086_v8 = vsub.s32 3, %v1073_v3  ;;  %v1090_v26 = vsub.s32 4, %v1073_v3 }
 0x46e   : > { %4525 = vmatpush1.bf16.msra.mxu0 %v4524_v27  ;;  %4541 = vmatpush1.bf16.msra.mxu1 %v4540_v14  ;;  %v2619_v2 = vmax.f32 %v2615_v56, 0.0  ;;  %v1098_v52 = vsub.s32 6, %v1073_v3  ;;  %v1094_v9 = vsub.s32 5, %v1073_v3  ;;  %v1083_v10 = vrot.slane %v1070_v6, %v1082_v5 }
 0x46f   : > { %2808 = vmatprep.mubr.f32.mxu0 %v4839_v0  ;;  %2897 = vmatprep.mubr.f32.mxu1 %v4839_v0  ;;  %v2618_v57 = vmax.f32 %v2614_v23, 0.0  ;;  %v1079_v27 = vrot.slane %v1070_v6, %v1078_v7  ;;  %v1087_v14 = vrot.slane %v1070_v6, %v1086_v8  ;;  %v1091_v15 = vrot.slane %v1070_v6, %v1090_v26 }
 0x470   : > { %4527 = vmatprep.subr.bf16.mxu0 %v4526_v42  ;;  %4543 = vmatprep.subr.bf16.mxu1 %v4542_v30  ;;  %v1102_v16 = vsub.s32 7, %v1073_v3  ;;  %v1095_v22 = vrot.slane %v1070_v6, %v1094_v9  ;;  %v1254_v21 = vadd.f32 %v5985_v40, %v1083_v10  ;;  %v6405_v34 = vrot.slane %v2684_v11, %v1082_v5 }
 0x471   : > { %3596 = vmatmul.mubr.msk.f32.gmra.mrb[30].mxu0 %vm520_vm0, %v2617_v17  ;;  %3600 = vmatmul.mubr.msk.f32.gmra.mrb[30].mxu1 %vm520_vm0, %v2617_v17  ;;  %v6408_v42 = vrot.slane %v2684_v11, %v6394_v4  ;;  %v1185_v30 = vadd.f32 %v5987_v41, %v1079_v27  ;;  %v6411_v53 = vrot.slane %v2684_v11, %v1078_v7 }
 0x472   : > { %4529 = vmatpush1.bf16.msra.mxu0 %v4528_v33  ;;  %4545 = vmatpush1.bf16.msra.mxu1 %v4544_v12  ;;  %v1256_v28 = vadd.f32 %v5989_v47, %v1087_v14  ;;  %v6414_v29 = vrot.slane %v2684_v11, %v1086_v8  ;;  %v1325_v32 = vadd.f32 %v5991_v43, %v1091_v15 }
 0x473   : > { %2814 = vmatprep.mubr.f32.mxu0 %v4839_v0  ;;  %2903 = vmatprep.mubr.f32.mxu1 %v4839_v0  ;;  %v6417_v33 = vrot.slane %v2684_v11, %v1090_v26  ;;  %v1103_v40 = vrot.slane %v1070_v6, %v1102_v16  ;;  %v1327_v13 = vadd.f32 %v5995_v58, %v1095_v22 }
 0x474   : > { %4531 = vmatprep.subr.bf16.mxu0 %v4530_v37  ;;  %4547 = vmatprep.subr.bf16.mxu1 %v4546_v44  ;;  %v6425_v41 = vrot.slane %v2684_v11, %v1102_v16  ;;  %v6431_v43 = vrot.slane %v1254_v21, %v6394_v4  ;;  %v6436_v58 = vrot.slane %v1185_v30, %v6394_v4 }
 0x475   : > { %3597 = vmatmul.mubr.msk.f32.gmra.mrb[32].mxu0 %vm520_vm0, %v2618_v57  ;;  %3601 = vmatmul.mubr.msk.f32.gmra.mrb[32].mxu1 %vm520_vm0, %v2618_v57  ;;  %v6439_v37 = vrot.slane %v1256_v28, %v6394_v4  ;;  %v6444_v46 = vrot.slane %v1325_v32, %v6394_v4  ;;  %v6447_v54 = vadd.f32 %v5997_v49, %v1103_v40 }
 0x476   : > { %4533 = vmatpush1.bf16.msra.mxu0 %v4532_v50  ;;  %4549 = vmatpush1.bf16.msra.mxu1 %v4548_v51  ;;  %v6455_v55 = vrot.slane %v1327_v13, %v6394_v4 }
 0x477   : > { %2820 = vmatprep.mubr.f32.mxu0 %v4839_v0  ;;  %2909 = vmatprep.mubr.f32.mxu1 %v4839_v0 }
 0x478   : > { %4535 = vmatprep.subr.bf16.mxu0 %v4534_v60  ;;  %4551 = vmatprep.subr.bf16.mxu1 %v4550_v62 }
 0x479   : > { %3598 = vmatmul.mubr.msk.f32.gmra.mrb[34].mxu0 %vm520_vm0, %v2619_v2  ;;  %3602 = vmatmul.mubr.msk.f32.gmra.mrb[34].mxu1 %vm520_vm0, %v2619_v2 }
 0x47a   : > { %4537 = vmatpush1.bf16.msra.mxu0 %v4536_v63  ;;  %4553 = vmatpush1.bf16.msra.mxu1 %v4552_v48 }
 0x47b   : > { %2980 = vmatprep.mubr.f32.mxu0 %v4839_v0  ;;  %3069 = vmatprep.mubr.f32.mxu1 %v4839_v0 }
 0x47d   : > { %3603 = vmatmul.mubr.msk.f32.vlgmr.msra.gmra.mrb[36].mxu0 %vm520_vm0, %v6301_v19  ;;  %3607 = vmatmul.mubr.msk.f32.vlgmr.msra.gmra.mrb[36].mxu1 %vm520_vm0, %v6301_v19  ;;  %v1099_v19 = vrot.slane %v1070_v6, %v1098_v52 }
 0x47e   : > { %2986 = vmatprep.mubr.f32.mxu0 %v4839_v0  ;;  %3075 = vmatprep.mubr.f32.mxu1 %v4839_v0 }
 0x47f   : > { %v1396_v12 = vadd.f32 %v5993_v31, %v1099_v19 }
 0x481   : > { %3604 = vmatmul.mubr.msk.f32.gmra.mrb[38].mxu0 %vm520_vm0, %v2617_v17  ;;  %3608 = vmatmul.mubr.msk.f32.gmra.mrb[38].mxu1 %vm520_vm0, %v2617_v17  ;;  %v6423_v17 = vrot.slane %v2684_v11, %v1094_v9  ;;  %v6452_v51 = vrot.slane %v1396_v12, %v6394_v4 }
 0x482   : > { %2992 = vmatprep.mubr.f32.mxu0 %v4839_v0  ;;  %3081 = vmatprep.mubr.f32.mxu1 %v4839_v0 }
 0x485   : > { %3605 = vmatmul.mubr.msk.f32.gmra.mrb[40].mxu0 %vm520_vm0, %v2618_v57  ;;  %3609 = vmatmul.mubr.msk.f32.gmra.mrb[40].mxu1 %vm520_vm0, %v2618_v57 }
 0x486   : > { %2998 = vmatprep.mubr.f32.mxu0 %v4839_v0  ;;  %3087 = vmatprep.mubr.f32.mxu1 %v4839_v0  ;;  %v1075_v0 = vrot.slane %v1070_v6, %v6394_v4 }
 0x488   : > { %v1183_v25 = vadd.f32 %v5983_v39, %v1075_v0  ;;  %v6419_v39 = vrot.slane %v2684_v11, %v1098_v52 }
 0x489   : > { %3606 = vmatmul.mubr.msk.f32.gmra.mrb[42].mxu0 %vm520_vm0, %v2619_v2  ;;  %3610 = vmatmul.mubr.msk.f32.gmra.mrb[42].mxu1 %vm520_vm0, %v2619_v2 }
 0x48a   : > { %v6428_v47 = vrot.slane %v1183_v25, %v6394_v4 }
 0x540   : > { %v2804_v18 = vpop.f32.mrb[28].mxu0  ;;  %v2893_v23 = vpop.f32.mrb[28].mxu1 }
 0x541   : > { %v2805_v24 = vadd.f32 %v2804_v18, %v6408_v42  ;;  %v2894_v35 = vadd.f32 %v2893_v23, %v6405_v34  ;;  %v2806_v36 = vpop.f32.mrb[29].mxu0  ;;  %v2895_v31 = vpop.f32.mrb[29].mxu1 }
 0x542   : > { %v2807_v44 = vadd.f32 %v2806_v36, %v6411_v53  ;;  %v2896_v45 = vadd.f32 %v2895_v31, %v6414_v29 }
 0x543   : > { %v3126_v61 = vmul.f32 %v6428_v47, %v2805_v24  ;;  %v3128_v50 = vmul.f32 %v6431_v43, %v2894_v35 }
 0x544   : > { %v3127_v56 = vmul.f32 %v6436_v58, %v2807_v44  ;;  %v3129_v57 = vmul.f32 %v6439_v37, %v2896_v45  ;;  %v2810_v59 = vpop.f32.mrb[30].mxu0  ;;  %v2899_v20 = vpop.f32.mrb[30].mxu1 }
 0x545   : > { %v3158_v38 = vsub.f32 0.0, %v3126_v61  ;;  %v3160_v60 = vsub.f32 0.0, %v3128_v50  ;;  %v2811_v49 = vadd.f32 %v2810_v59, %v6408_v42  ;;  %v2900_v62 = vadd.f32 %v2899_v20, %v6405_v34  ;;  %v2812_v63 = vpop.f32.mrb[31].mxu0  ;;  %v2901_v48 = vpop.f32.mrb[31].mxu1 }
 0x546   : > { %v3159_v2 = vsub.f32 0.0, %v3127_v56  ;;  %v3161_v1 = vsub.f32 0.0, %v3129_v57  ;;  %v2813_v3 = vadd.f32 %v2812_v63, %v6411_v53  ;;  %v2902_v5 = vadd.f32 %v2901_v48, %v6414_v29 }
 0x547   : > { %v3190_v6 = vmul.f32 1.442695, %v3158_v38  ;;  %v3194_v7 = vmul.f32 1.442695, %v3160_v60  ;;  %v3134_v8 = vmul.f32 %v6428_v47, %v2811_v49  ;;  %v3136_v26 = vmul.f32 %v6431_v43, %v2900_v62 }
 0x548   : > { %v3192_v52 = vmul.f32 1.442695, %v3159_v2  ;;  %v3196_v9 = vmul.f32 1.442695, %v3161_v1  ;;  %v3135_v0 = vmul.f32 %v6436_v58, %v2813_v3  ;;  %v3137_v10 = vmul.f32 %v6439_v37, %v2902_v5  ;;  %v2816_v11 = vpop.f32.mrb[32].mxu0  ;;  %v2905_v27 = vpop.f32.mrb[32].mxu1 }
 0x549   : > { %4612 = vpow2.f32 %v3190_v6  ;;  %v3166_v14 = vsub.f32 0.0, %v3134_v8  ;;  %v3168_v15 = vsub.f32 0.0, %v3136_v26  ;;  %v2817_v16 = vadd.f32 %v2816_v11, %v6408_v42  ;;  %v2818_v19 = vpop.f32.mrb[33].mxu0  ;;  %v2907_v22 = vpop.f32.mrb[33].mxu1 }
 0x54a   : > { %4614 = vpow2.f32 %v3194_v7  ;;  %v3167_v25 = vsub.f32 0.0, %v3135_v0  ;;  %v3169_v21 = vsub.f32 0.0, %v3137_v10  ;;  %v2906_v30 = vadd.f32 %v2905_v27, %v6405_v34 }
 0x54b   : > { %4616 = vpow2.f32 %v3192_v52  ;;  %v3206_v28 = vmul.f32 1.442695, %v3166_v14  ;;  %v3210_v32 = vmul.f32 1.442695, %v3168_v15  ;;  %v3142_v40 = vmul.f32 %v6428_v47, %v2817_v16 }
 0x54c   : > { %4618 = vpow2.f32 %v3196_v9  ;;  %v3208_v12 = vmul.f32 1.442695, %v3167_v25  ;;  %v3212_v13 = vmul.f32 1.442695, %v3169_v21  ;;  %v3144_v18 = vmul.f32 %v6431_v43, %v2906_v30  ;;  %v2822_v23 = vpop.f32.mrb[34].mxu0  ;;  %v2911_v24 = vpop.f32.mrb[34].mxu1 }
 0x54d   : > { %4620 = vpow2.f32 %v3206_v28  ;;  %v3174_v35 = vsub.f32 0.0, %v3142_v40  ;;  %v2819_v36 = vadd.f32 %v2818_v19, %v6411_v53  ;;  %v2908_v31 = vadd.f32 %v2907_v22, %v6414_v29  ;;  %v2824_v44 = vpop.f32.mrb[35].mxu0  ;;  %v2913_v45 = vpop.f32.mrb[35].mxu1 }
 0x54e   : > { %4622 = vpow2.f32 %v3210_v32  ;;  %v3176_v61 = vsub.f32 0.0, %v3144_v18  ;;  %v2823_v50 = vadd.f32 %v2822_v23, %v6408_v42  ;;  %v2912_v56 = vadd.f32 %v2911_v24, %v6405_v34 }
 0x54f   : > { %4624 = vpow2.f32 %v3208_v12  ;;  %v3222_v57 = vmul.f32 1.442695, %v3174_v35  ;;  %v3143_v59 = vmul.f32 %v6436_v58, %v2819_v36  ;;  %v3145_v20 = vmul.f32 %v6439_v37, %v2908_v31 }
 0x550   : > { %4626 = vpow2.f32 %v3212_v13  ;;  %v3226_v38 = vmul.f32 1.442695, %v3176_v61  ;;  %v3150_v60 = vmul.f32 %v6428_v47, %v2823_v50  ;;  %v3152_v49 = vmul.f32 %v6431_v43, %v2912_v56  ;;  %v2982_v62 = vpop.f32.mrb[36].mxu0  ;;  %v3071_v63 = vpop.f32.mrb[36].mxu1 }
 0x551   : > { %4628 = vpow2.f32 %v3222_v57  ;;  %v3175_v48 = vsub.f32 0.0, %v3143_v59  ;;  %v3177_v2 = vsub.f32 0.0, %v3145_v20  ;;  %v2825_v42 = vadd.f32 %v2824_v44, %v6411_v53  ;;  %v2984_v34 = vpop.f32.mrb[37].mxu0  ;;  %v3073_v1 = vpop.f32.mrb[37].mxu1 }
 0x552   : > { %v6482_v3 = vrot.slane %v6447_v54, %v6394_v4  ;;  %4630 = vpow2.f32 %v3226_v38  ;;  %v3182_v5 = vsub.f32 0.0, %v3150_v60  ;;  %v2914_v6 = vadd.f32 %v2913_v45, %v6414_v29 }
 0x553   : > { %v4613_v47 = vpop.eup %4612  ;;  %v3224_v7 = vmul.f32 1.442695, %v3175_v48  ;;  %v3184_v43 = vsub.f32 0.0, %v3152_v49  ;;  %v3151_v8 = vmul.f32 %v6436_v58, %v2825_v42  ;;  %v2983_v26 = vadd.f32 %v2982_v62, %v6417_v33 }
 0x554   : > { %v4615_v52 = vpop.eup %4614  ;;  %v3254_v9 = vadd.f32 1.0, %v4613_v47  ;;  %v6487_v53 = vmul.f32 1.442695, %v3177_v2  ;;  %v6489_v0 = vmul.f32 1.442695, %v3182_v5  ;;  %v3153_v4 = vmul.f32 %v6439_v37, %v2914_v6  ;;  %v2988_v54 = vpop.f32.mrb[38].mxu0 }
 0x555   : > { %v4617_v10 = vpop.eup %4616  ;;  %v3256_v11 = vadd.f32 1.0, %v4615_v52  ;;  %4632 = vpow2.f32 %v3224_v7  ;;  %v3183_v29 = vsub.f32 0.0, %v3151_v8  ;;  %v3130_v27 = vmul.f32 %v6444_v46, %v2983_v26  ;;  %v3077_v14 = vpop.f32.mrb[38].mxu1 }
 0x556   : > { %v2990_v15 = vpop.f32.mrb[39].mxu0  ;;  %v4619_v58 = vpop.eup %4618  ;;  %4634 = vrcp.f32 %v3254_v9  ;;  %v3255_v16 = vadd.f32 1.0, %v4617_v10  ;;  %v3185_v19 = vsub.f32 0.0, %v3153_v4  ;;  %v3072_v22 = vadd.f32 %v3071_v63, %v6419_v39 }
 0x557   : > { %v3079_v25 = vpop.f32.mrb[39].mxu1  ;;  %v4621_v21 = vpop.eup %4620  ;;  %4636 = vrcp.f32 %v3256_v11  ;;  %v3257_v30 = vadd.f32 1.0, %v4619_v58  ;;  %v6494_v37 = vmul.f32 1.442695, %v3184_v43  ;;  %v6496_v28 = vmul.f32 1.442695, %v3183_v29 }
 0x558   : > { %v4623_v32 = vpop.eup %4622  ;;  %4638 = vrcp.f32 %v3255_v16  ;;  %v3262_v40 = vadd.f32 1.0, %v4621_v21  ;;  %v3162_v12 = vsub.f32 0.0, %v3130_v27  ;;  %v3132_v13 = vmul.f32 %v6452_v51, %v3072_v22  ;;  %v6499_v18 = vpop.f32.mrb[40].mxu0  ;;  %v4743_v21 = vld [vmem:[%s5136_s16] sm:$0xff] }
 0x559   : > { %v6501_v23 = vpop.f32.mrb[40].mxu1  ;;  %v4625_v24 = vpop.eup %4624  ;;  %4640 = vrcp.f32 %v3257_v30  ;;  %v3264_v35 = vadd.f32 1.0, %v4623_v32  ;;  %v6503_v36 = vmul.f32 1.442695, %v3185_v19  ;;  %v2985_v31 = vadd.f32 %v2984_v34, %v6423_v17 }
 0x55a   : > { %v6506_v44 = vpop.f32.mrb[41].mxu0  ;;  %v6508_v45 = vpop.f32.mrb[41].mxu1  ;;  %4642 = vrcp.f32 %v3262_v40  ;;  %v3263_v50 = vadd.f32 1.0, %v4625_v24  ;;  %v3164_v56 = vsub.f32 0.0, %v3132_v13  ;;  %v3074_v57 = vadd.f32 %v3073_v1, %v6425_v41 }
 0x55b   : > { %v4627_v61 = vpop.eup %4626  ;;  %4644 = vrcp.f32 %v3264_v35  ;;  %v3131_v38 = vmul.f32 %v6455_v55, %v2985_v31  ;;  %v2989_v60 = vadd.f32 %v2988_v54, %v6417_v33  ;;  %v3198_v63 = vmul.f32 1.442695, %v3162_v12 }
 0x55c   : > { %v4629_v59 = vpop.eup %4628  ;;  %v3265_v20 = vadd.f32 1.0, %v4627_v61  ;;  %4646 = vrcp.f32 %v3263_v50  ;;  %v3133_v48 = vmul.f32 %v6482_v3, %v3074_v57  ;;  %v6515_v2 = vpop.f32.mrb[42].mxu0  ;;  %v3078_v43 = vadd.f32 %v3077_v14, %v6419_v39  ;;  %v4745_v61 = vld [vmem:[%s5136_s16 + $0x8] sm:$0xff] }
 0x55d   : > { %v4631_v49 = vpop.eup %4630  ;;  %v3270_v62 = vadd.f32 1.0, %v4629_v59  ;;  %v6517_v42 = vpop.f32.mrb[42].mxu1  ;;  %v3163_v1 = vsub.f32 0.0, %v3131_v38  ;;  %v3138_v5 = vmul.f32 %v6444_v46, %v2989_v60  ;;  %v2991_v8 = vadd.f32 %v2990_v15, %v6423_v17 }
 0x55e   : > { %4648 = vrcp.f32 %v3265_v20  ;;  %v3272_v34 = vadd.f32 1.0, %v4631_v49  ;;  %v6520_v6 = vpop.f32.mrb[43].mxu0  ;;  %v6522_v47 = vpop.f32.mrb[43].mxu1  ;;  %v3165_v7 = vsub.f32 0.0, %v3133_v48  ;;  %v3202_v52 = vmul.f32 1.442695, %v3164_v56 }
 0x55f   : > { %4650 = vrcp.f32 %v3270_v62  ;;  %v4633_v26 = vpop.eup %4632  ;;  %v3170_v9 = vsub.f32 0.0, %v3138_v5  ;;  %v3080_v4 = vadd.f32 %v3079_v25, %v6425_v41  ;;  %v3200_v11 = vmul.f32 1.442695, %v3163_v1  ;;  %v4747_v49 = vld [vmem:[%s5136_s16 + $0x40] sm:$0xff]  ;;  %v4748_v1 = vld [vmem:[%s5136_s16 + $0x50] sm:$0xff] }
 0x560   : > { %4652 = vrcp.f32 %v3272_v34  ;;  %v4635_v54 = vpop.eup %4634  ;;  %v3271_v10 = vadd.f32 1.0, %v4633_v26  ;;  %v3140_v29 = vmul.f32 %v6452_v51, %v3078_v43  ;;  %v3204_v15 = vmul.f32 1.442695, %v3165_v7 }
 0x561   : > { %4654 = vpow2.f32 %v6487_v53  ;;  %v4637_v27 = vpop.eup %4636  ;;  %v3350_v14 = vadd.f32 1.0, %v4635_v54  ;;  %v3139_v58 = vmul.f32 %v6455_v55, %v2991_v8  ;;  %v3141_v25 = vmul.f32 %v6482_v3, %v3080_v4  ;;  %v4749_v8 = vld [vmem:[%s5136_s16 + $0x48] sm:$0xff]  ;;  %v4750_v4 = vld [vmem:[%s5136_s16 + $0x58] sm:$0xff] }
 0x562   : > { %4656 = vpow2.f32 %v6489_v0  ;;  %v4639_v16 = vpop.eup %4638  ;;  %v3352_v19 = vadd.f32 1.0, %v4637_v27  ;;  %v3172_v22 = vsub.f32 0.0, %v3140_v29  ;;  %v3214_v40 = vmul.f32 1.442695, %v3170_v9  ;;  %v4744_v0 = vld [vmem:[%s5136_s16 + $0x10] sm:$0xff]  ;;  %v4751_v27 = vld [vmem:[%s5136_s16 + $0x80] sm:$0xff] }
 0x563   : > { %4658 = vrcp.f32 %v3271_v10  ;;  %v4641_v53 = vpop.eup %4640  ;;  %v3382_v30 = vmul.f32 %v4743_v21, %v3350_v14  ;;  %v3351_v32 = vadd.f32 1.0, %v4639_v16  ;;  %v3171_v35 = vsub.f32 0.0, %v3139_v58 }
 0x564   : > { %4660 = vpow2.f32 %v6494_v37  ;;  %v4643_v12 = vpop.eup %4642  ;;  %v3384_v13 = vmul.f32 %v4744_v0, %v3352_v19  ;;  %v3353_v24 = vadd.f32 1.0, %v4641_v53  ;;  %v3218_v56 = vmul.f32 1.442695, %v3172_v22  ;;  %v4752_v19 = vld [vmem:[%s5136_s16 + $0x90] sm:$0xff] }
 0x565   : > { %4662 = vpow2.f32 %v6496_v28  ;;  %v4645_v31 = vpop.eup %4644  ;;  %3414 = vst [vmem:[%s6541_s27] sm:$0xff] %v3382_v30  ;;  %v3383_v50 = vmul.f32 %v4745_v61, %v3351_v32  ;;  %v3358_v37 = vadd.f32 1.0, %v4643_v12  ;;  %v4746_v28 = vld [vmem:[%s5136_s16 + $0x18] sm:$0xff]  ;;  %v3173_v38 = vsub.f32 0.0, %v3141_v25 }
 0x566   : > { %4664 = vpow2.f32 %v6503_v36  ;;  %v4647_v57 = vpop.eup %4646  ;;  %3416 = vst [vmem:[%s6541_s27 + $0x10] sm:$0xff] %v3384_v13  ;;  %v3385_v59 = vmul.f32 %v4746_v28, %v3353_v24  ;;  %v3360_v20 = vadd.f32 1.0, %v4645_v31  ;;  %v2995_v36 = vadd.f32 %v6499_v18, %v6417_v33  ;;  %v4753_v24 = vld [vmem:[%s5136_s16 + $0x88] sm:$0xff] }
 0x567   : > { %4666 = vpow2.f32 %v3198_v63  ;;  %3415 = vst [vmem:[%s6541_s27 + $0x8] sm:$0xff] %v3383_v50  ;;  %v3390_v62 = vmul.f32 %v4747_v49, %v3358_v37  ;;  %v3359_v48 = vadd.f32 1.0, %v4647_v57  ;;  %v3216_v63 = vmul.f32 1.442695, %v3171_v35 }
 0x568   : > { %v4649_v60 = vpop.eup %4648  ;;  %4668 = vpow2.f32 %v3202_v52  ;;  %3417 = vst [vmem:[%s6541_s27 + $0x18] sm:$0xff] %v3385_v59  ;;  %v3392_v5 = vmul.f32 %v4748_v1, %v3360_v20  ;;  %v3146_v52 = vmul.f32 %v6444_v46, %v2995_v36  ;;  %v2997_v30 = vadd.f32 %v6506_v44, %v6423_v17 }
 0x569   : > { %v4651_v34 = vpop.eup %4650  ;;  %v3361_v7 = vadd.f32 1.0, %v4649_v60  ;;  %4670 = vpow2.f32 %v3200_v11  ;;  %3422 = vst [vmem:[%s6541_s27 + $0x40] sm:$0xff] %v3390_v62  ;;  %v3391_v26 = vmul.f32 %v4749_v8, %v3359_v48  ;;  %v3084_v11 = vadd.f32 %v6501_v23, %v6419_v39 }
 0x56a   : > { %v4653_v43 = vpop.eup %4652  ;;  %v3366_v9 = vadd.f32 1.0, %v4651_v34  ;;  %4672 = vpow2.f32 %v3204_v15  ;;  %3424 = vst [vmem:[%s6541_s27 + $0x50] sm:$0xff] %v3392_v5  ;;  %v3220_v15 = vmul.f32 1.442695, %v3173_v38  ;;  %v3178_v12 = vsub.f32 0.0, %v3146_v52 }
 0x56b   : > { %v4655_v18 = vpop.eup %4654  ;;  %v3393_v54 = vmul.f32 %v4750_v4, %v3361_v7  ;;  %v3368_v10 = vadd.f32 1.0, %v4653_v43  ;;  %4674 = vpow2.f32 %v3214_v40  ;;  %3423 = vst [vmem:[%s6541_s27 + $0x48] sm:$0xff] %v3391_v26  ;;  %v3148_v53 = vmul.f32 %v6452_v51, %v3084_v11 }
 0x56c   : > { %v4657_v29 = vpop.eup %4656  ;;  %v3398_v14 = vmul.f32 %v4751_v27, %v3366_v9  ;;  %v3273_v58 = vadd.f32 1.0, %v4655_v18  ;;  %4676 = vpow2.f32 %v3218_v56  ;;  %v3086_v0 = vadd.f32 %v6508_v45, %v6425_v41 }
 0x56d   : > { %v4659_v16 = vpop.eup %4658  ;;  %3425 = vst [vmem:[%s6541_s27 + $0x58] sm:$0xff] %v3393_v54  ;;  %v3400_v22 = vmul.f32 %v4752_v19, %v3368_v10  ;;  %v3278_v25 = vadd.f32 1.0, %v4657_v29  ;;  %4678 = vpow2.f32 %v3216_v63  ;;  %v3147_v61 = vmul.f32 %v6455_v55, %v2997_v30  ;;  %v4754_v29 = vld [vmem:[%s5136_s16 + $0x98] sm:$0xff] }
 0x56e   : > { %v4661_v21 = vpop.eup %4660  ;;  %3430 = vst [vmem:[%s6541_s27 + $0x80] sm:$0xff] %v3398_v14  ;;  %v3367_v23 = vadd.f32 1.0, %v4659_v16  ;;  %4680 = vrcp.f32 %v3273_v58  ;;  %v3180_v44 = vsub.f32 0.0, %v3148_v53  ;;  %v3149_v56 = vmul.f32 %v6482_v3, %v3086_v0  ;;  %v4757_v0 = vld [vmem:[%s5136_s16 + $0xc8] sm:$0xff] }
 0x56f   : > { %v4663_v32 = vpop.eup %4662  ;;  %3432 = vst [vmem:[%s6541_s27 + $0x90] sm:$0xff] %v3400_v22  ;;  %4682 = vrcp.f32 %v3278_v25  ;;  %v3280_v40 = vadd.f32 1.0, %v4661_v21  ;;  %v3001_v45 = vadd.f32 %v6515_v2, %v6417_v33  ;;  %v3179_v38 = vsub.f32 0.0, %v3147_v61  ;;  %v4758_v61 = vld [vmem:[%s5136_s16 + $0xd8] sm:$0xff] }
 0x570   : > { %v4665_v13 = vpop.eup %4664  ;;  %v3399_v35 = vmul.f32 %v4753_v24, %v3367_v23  ;;  %v3279_v31 = vadd.f32 1.0, %v4663_v32  ;;  %4684 = vpow2.f32 %v3220_v15  ;;  %v3090_v60 = vadd.f32 %v6517_v42, %v6419_v39  ;;  %v4755_v15 = vld [vmem:[%s5136_s16 + $0xc0] sm:$0xff]  ;;  %v4756_v23 = vld [vmem:[%s5136_s16 + $0xd0] sm:$0xff] }
 0x571   : > { %v4667_v50 = vpop.eup %4666  ;;  %4686 = vrcp.f32 %v3280_v40  ;;  %v3281_v37 = vadd.f32 1.0, %v4665_v13  ;;  %v3230_v48 = vmul.f32 1.442695, %v3178_v12  ;;  %v3154_v36 = vmul.f32 %v6444_v46, %v3001_v45 }
 0x572   : > { %v4669_v57 = vpop.eup %4668  ;;  %3431 = vst [vmem:[%s6541_s27 + $0x88] sm:$0xff] %v3399_v35  ;;  %4688 = vrcp.f32 %v3279_v31  ;;  %v3258_v28 = vadd.f32 1.0, %v4667_v50  ;;  %v3234_v5 = vmul.f32 1.442695, %v3180_v44  ;;  %v3156_v7 = vmul.f32 %v6452_v51, %v3090_v60 }
 0x573   : > { %v4671_v59 = vpop.eup %4670  ;;  %4690 = vrcp.f32 %v3281_v37  ;;  %v3260_v20 = vadd.f32 1.0, %v4669_v57  ;;  %v3181_v63 = vsub.f32 0.0, %v3149_v56  ;;  %v3003_v43 = vadd.f32 %v6520_v6, %v6423_v17  ;;  %v4759_v56 = vld [vmem:[%s5136_s16 + $0x20] sm:$0xff] }
 0x574   : > { %v4673_v49 = vpop.eup %4672  ;;  %4692 = vrcp.f32 %v3258_v28  ;;  %v3259_v62 = vadd.f32 1.0, %v4671_v59  ;;  %v3232_v8 = vmul.f32 1.442695, %v3179_v38  ;;  %v3092_v46 = vadd.f32 %v6522_v47, %v6425_v41  ;;  %v4760_v59 = vld [vmem:[%s5136_s16 + $0x30] sm:$0xff] }
 0x575   : > { %v4675_v34 = vpop.eup %4674  ;;  %4694 = vrcp.f32 %v3260_v20  ;;  %v3261_v1 = vadd.f32 1.0, %v4673_v49  ;;  %v3186_v52 = vsub.f32 0.0, %v3154_v36  ;;  %v3155_v51 = vmul.f32 %v6455_v55, %v3003_v43  ;;  %v4761_v49 = vld [vmem:[%s5136_s16 + $0x28] sm:$0xff] }
 0x576   : > { %v4677_v33 = vpop.eup %4676  ;;  %4696 = vrcp.f32 %v3259_v62  ;;  %v3266_v2 = vadd.f32 1.0, %v4675_v34  ;;  %v3188_v54 = vsub.f32 0.0, %v3156_v7  ;;  %v3157_v17 = vmul.f32 %v6482_v3, %v3092_v46  ;;  %v4762_v34 = vld [vmem:[%s5136_s16 + $0x38] sm:$0xff] }
 0x577   : > { %v4679_v39 = vpop.eup %4678  ;;  %4698 = vrcp.f32 %v3261_v1  ;;  %v3268_v42 = vadd.f32 1.0, %v4677_v33  ;;  %v3236_v11 = vmul.f32 1.442695, %v3181_v63  ;;  %v3187_v41 = vsub.f32 0.0, %v3155_v51  ;;  %v4763_v33 = vld [vmem:[%s5136_s16 + $0x60] sm:$0xff] }
 0x578   : > { %v4681_v26 = vpop.eup %4680  ;;  %4700 = vrcp.f32 %v3266_v2  ;;  %v3267_v9 = vadd.f32 1.0, %v4679_v39  ;;  %v3189_v55 = vsub.f32 0.0, %v3157_v17  ;;  %v3246_v3 = vmul.f32 1.442695, %v3186_v52  ;;  %v4764_v39 = vld [vmem:[%s5136_s16 + $0x70] sm:$0xff] }
 0x579   : > { %v4683_v18 = vpop.eup %4682  ;;  %v3369_v4 = vadd.f32 1.0, %v4681_v26  ;;  %4702 = vrcp.f32 %v3268_v42  ;;  %v3250_v53 = vmul.f32 1.442695, %v3188_v54  ;;  %v3248_v40 = vmul.f32 1.442695, %v3187_v41  ;;  %v4765_v26 = vld [vmem:[%s5136_s16 + $0x68] sm:$0xff] }
 0x57a   : > { %v4685_v6 = vpop.eup %4684  ;;  %v3374_v10 = vadd.f32 1.0, %v4683_v18  ;;  %4704 = vrcp.f32 %v3267_v9  ;;  %v3252_v35 = vmul.f32 1.442695, %v3189_v55 }
 0x57b   : > { %v4687_v47 = vpop.eup %4686  ;;  %v3401_v27 = vmul.f32 %v4754_v29, %v3369_v4  ;;  %v3269_v14 = vadd.f32 1.0, %v4685_v6  ;;  %4706 = vpow2.f32 %v3230_v48  ;;  %v4766_v6 = vld [vmem:[%s5136_s16 + $0x78] sm:$0xff] }
 0x57c   : > { %v4689_v58 = vpop.eup %4688  ;;  %v3406_v16 = vmul.f32 %v4755_v15, %v3374_v10  ;;  %v3376_v19 = vadd.f32 1.0, %v4687_v47  ;;  %4708 = vpow2.f32 %v3234_v5 }
 0x57d   : > { %v4691_v22 = vpop.eup %4690  ;;  %3433 = vst [vmem:[%s6541_s27 + $0x98] sm:$0xff] %v3401_v27  ;;  %v3375_v25 = vadd.f32 1.0, %v4689_v58  ;;  %4710 = vrcp.f32 %v3269_v14 }
 0x57e   : > { %v4693_v21 = vpop.eup %4692  ;;  %3438 = vst [vmem:[%s6541_s27 + $0xc0] sm:$0xff] %v3406_v16  ;;  %v3408_v30 = vmul.f32 %v4756_v23, %v3376_v19  ;;  %v3377_v32 = vadd.f32 1.0, %v4691_v22  ;;  %4712 = vpow2.f32 %v3232_v8  ;;  %v4768_v23 = vld [vmem:[%s5136_s16 + $0xb0] sm:$0xff] }
 0x57f   : > { %v4695_v12 = vpop.eup %4694  ;;  %v3407_v13 = vmul.f32 %v4757_v0, %v3375_v25  ;;  %v3354_v24 = vadd.f32 1.0, %v4693_v21  ;;  %4714 = vpow2.f32 %v3236_v11  ;;  %v4767_v25 = vld [vmem:[%s5136_s16 + $0xa0] sm:$0xff] }
 0x580   : > { %v4697_v31 = vpop.eup %4696  ;;  %3440 = vst [vmem:[%s6541_s27 + $0xd0] sm:$0xff] %v3408_v30  ;;  %v3409_v50 = vmul.f32 %v4758_v61, %v3377_v32  ;;  %v3356_v37 = vadd.f32 1.0, %v4695_v12  ;;  %4716 = vpow2.f32 %v3246_v3  ;;  %v4770_v61 = vld [vmem:[%s5136_s16 + $0xb8] sm:$0xff] }
 0x581   : > { %v4699_v44 = vpop.eup %4698  ;;  %3439 = vst [vmem:[%s6541_s27 + $0xc8] sm:$0xff] %v3407_v13  ;;  %v3386_v57 = vmul.f32 %v4759_v56, %v3354_v24  ;;  %v3355_v28 = vadd.f32 1.0, %v4697_v31  ;;  %4718 = vpow2.f32 %v3250_v53  ;;  %v4769_v13 = vld [vmem:[%s5136_s16 + $0xa8] sm:$0xff]  ;;  %v4771_v56 = vld [vmem:[%s5136_s16 + $0xe0] sm:$0xff] }
 0x582   : > { %v4701_v45 = vpop.eup %4700  ;;  %3441 = vst [vmem:[%s6541_s27 + $0xd8] sm:$0xff] %v3409_v50  ;;  %v3388_v20 = vmul.f32 %v4760_v59, %v3356_v37  ;;  %v3357_v38 = vadd.f32 1.0, %v4699_v44  ;;  %4720 = vpow2.f32 %v3248_v40 }
 0x583   : > { %v4703_v60 = vpop.eup %4702  ;;  %3418 = vst [vmem:[%s6541_s27 + $0x20] sm:$0xff] %v3386_v57  ;;  %v3387_v62 = vmul.f32 %v4761_v49, %v3355_v28  ;;  %v3362_v48 = vadd.f32 1.0, %v4701_v45  ;;  %4722 = vpow2.f32 %v3252_v35  ;;  %v4772_v45 = vld [vmem:[%s5136_s16 + $0xf0] sm:$0xff]  ;;  %v4774_v49 = vld [vmem:[%s5136_s16 + $0xf8] sm:$0xff] }
 0x584   : > { %v4705_v36 = vpop.eup %4704  ;;  %3420 = vst [vmem:[%s6541_s27 + $0x30] sm:$0xff] %v3388_v20  ;;  %v3389_v1 = vmul.f32 %v4762_v34, %v3357_v38  ;;  %v3364_v5 = vadd.f32 1.0, %v4703_v60  ;;  %v4773_v38 = vld [vmem:[%s5136_s16 + $0xe8] sm:$0xff] }
 0x585   : > { %v4707_v7 = vpop.eup %4706  ;;  %3419 = vst [vmem:[%s6541_s27 + $0x28] sm:$0xff] %v3387_v62  ;;  %v3394_v2 = vmul.f32 %v4763_v33, %v3362_v48  ;;  %v3363_v63 = vadd.f32 1.0, %v4705_v36 }
 0x586   : > { %v4709_v43 = vpop.eup %4708  ;;  %3421 = vst [vmem:[%s6541_s27 + $0x38] sm:$0xff] %v3389_v1  ;;  %v3396_v42 = vmul.f32 %v4764_v39, %v3364_v5  ;;  %v3274_v8 = vadd.f32 1.0, %v4707_v7 }
 0x587   : > { %v4711_v46 = vpop.eup %4710  ;;  %3426 = vst [vmem:[%s6541_s27 + $0x60] sm:$0xff] %v3394_v2  ;;  %v3395_v9 = vmul.f32 %v4765_v26, %v3363_v63  ;;  %v3276_v52 = vadd.f32 1.0, %v4709_v43 }
 0x588   : > { %v4713_v51 = vpop.eup %4712  ;;  %3428 = vst [vmem:[%s6541_s27 + $0x70] sm:$0xff] %v3396_v42  ;;  %v3365_v18 = vadd.f32 1.0, %v4711_v46  ;;  %4724 = vrcp.f32 %v3274_v8 }
 0x589   : > { %v4715_v4 = vpop.eup %4714  ;;  %3427 = vst [vmem:[%s6541_s27 + $0x68] sm:$0xff] %v3395_v9  ;;  %4726 = vrcp.f32 %v3276_v52  ;;  %v3275_v54 = vadd.f32 1.0, %v4713_v51 }
 0x58a   : > { %v4717_v17 = vpop.eup %4716  ;;  %v3397_v10 = vmul.f32 %v4766_v6, %v3365_v18  ;;  %v3277_v11 = vadd.f32 1.0, %v4715_v4 }
 0x58b   : > { %v4719_v41 = vpop.eup %4718  ;;  %4728 = vrcp.f32 %v3275_v54  ;;  %v3282_v47 = vadd.f32 1.0, %v4717_v17 }
 0x58c   : > { %v4721_v29 = vpop.eup %4720  ;;  %3429 = vst [vmem:[%s6541_s27 + $0x78] sm:$0xff] %v3397_v10  ;;  %4730 = vrcp.f32 %v3277_v11  ;;  %v3284_v27 = vadd.f32 1.0, %v4719_v41 }
 0x58d   : > { %v4723_v14 = vpop.eup %4722  ;;  %4732 = vrcp.f32 %v3282_v47  ;;  %v3283_v55 = vadd.f32 1.0, %v4721_v29 }
 0x58e   : > { %4734 = vrcp.f32 %v3284_v27  ;;  %v3285_v58 = vadd.f32 1.0, %v4723_v14 }
 0x58f   : > { %4736 = vrcp.f32 %v3283_v55 }
 0x590   : > { %4738 = vrcp.f32 %v3285_v58 }
 0x592   : > { %v4725_v15 = vpop.eup %4724 }
 0x593   : > { %v4727_v16 = vpop.eup %4726  ;;  %v3370_v19 = vadd.f32 1.0, %v4725_v15 }
 0x594   : > { %v3372_v3 = vadd.f32 1.0, %v4727_v16 }
 0x595   : > { %v4729_v22 = vpop.eup %4728  ;;  %v3402_v53 = vmul.f32 %v4767_v25, %v3370_v19 }
 0x596   : > { %v4731_v21 = vpop.eup %4730  ;;  %v3404_v30 = vmul.f32 %v4768_v23, %v3372_v3  ;;  %v3371_v32 = vadd.f32 1.0, %v4729_v22 }
 0x597   : > { %v4733_v40 = vpop.eup %4732  ;;  %3434 = vst [vmem:[%s6541_s27 + $0xa0] sm:$0xff] %v3402_v53  ;;  %v3373_v12 = vadd.f32 1.0, %v4731_v21 }
 0x598   : > { %v4735_v0 = vpop.eup %4734  ;;  %3436 = vst [vmem:[%s6541_s27 + $0xb0] sm:$0xff] %v3404_v30  ;;  %v3403_v24 = vmul.f32 %v4769_v13, %v3371_v32  ;;  %v3378_v35 = vadd.f32 1.0, %v4733_v40 }
 0x599   : > { %v4737_v31 = vpop.eup %4736  ;;  %v3405_v50 = vmul.f32 %v4770_v61, %v3373_v12  ;;  %v3380_v37 = vadd.f32 1.0, %v4735_v0 }
 0x59a   : > { %v4739_v44 = vpop.eup %4738  ;;  %3435 = vst [vmem:[%s6541_s27 + $0xa8] sm:$0xff] %v3403_v24  ;;  %v3410_v57 = vmul.f32 %v4771_v56, %v3378_v35  ;;  %v3379_v28 = vadd.f32 1.0, %v4737_v31 }
 0x59b   : > { %3437 = vst [vmem:[%s6541_s27 + $0xb8] sm:$0xff] %v3405_v50  ;;  %v3412_v59 = vmul.f32 %v4772_v45, %v3380_v37  ;;  %v3381_v20 = vadd.f32 1.0, %v4739_v44 }
 0x59c   : > { %3442 = vst [vmem:[%s6541_s27 + $0xe0] sm:$0xff] %v3410_v57  ;;  %v3411_v60 = vmul.f32 %v4773_v38, %v3379_v28 }
 0x59d   : > { %3444 = vst [vmem:[%s6541_s27 + $0xf0] sm:$0xff] %v3412_v59  ;;  %v3413_v62 = vmul.f32 %v4774_v49, %v3381_v20 }
 0x59e   : > { %3443 = vst [vmem:[%s6541_s27 + $0xe8] sm:$0xff] %v3411_v60 }
 0x59f   : > { %3445 = vst [vmem:[%s6541_s27 + $0xf8] sm:$0xff] %v3413_v62 }
 0x5a0   : > { %4788 = shalt.err (!%p4785_p3)
}
 0x5a1   : > { %s4789_s16 = scalar_lea.hbm %s6631_s18, 4096  ;;  %s4793_s17 = scalar_lea.hbm %s6717_s29, 8192 }
 0x5a2   : > { %p4790_p4 = scmp.ne.s32.totalorder %s6631_s18, %s4789_s16  ;;  %p4794_p9 = scmp.lt.u32.totalorder %s6631_s18, %s6717_s29 }
 0x5a3   : > { %p4795_p10 = scmp.lt.u32.totalorder %s4793_s17, %s4789_s16  ;;  %p4797_p12 = scmp.lt.u32.totalorder %s4789_s16, %s6631_s18 }
 0x5a4   : > { %p4791_p7 = pnand %p4790_p4, %p4966_p5 }
 0x5a5   : > { %p4796_p11 = por %p4795_p10, %p4794_p9 }
 0x5a6   : > { %p4792_p8 = pneg %p4791_p7 }
 0x5a7   : > { %p4798_p13 = por %p4797_p12, %p4796_p11 }
 0x5a9   : > { %p4799_p0 = pnand %p4798_p13, %p4792_p8 }
 0x5ab   : > { %4802 = shalt.err (!%p4799_p0)
}
 0x5ac   : > { %s4841_s26 = smov 1024   ;;  %s4842_s24 = smov 64  }
 0x5ad   : > { %4570 = dma.vmem_to_hbm [thread:$0]  (%p4966_p5), %s6633_s20, 4096, %s6631_s18, %s6641_s19, %s4841_s26, %s4841_s26, %s4842_s24  }
 0x5ae PF: > { %s6718_s28 = sld [smem:[#allocation8_spill]]  ;;  %s6719_s30 = sld [smem:[#allocation6_spill]] }
 0x5b4   : > { %p4576_p1 = scmp.ge.s32.totalorder %s6718_s28, 2  ;;  %s3475_s27 = sand.u32 1, %s6719_s30  }
 0x5b5   : > { %s3476_s16 = scalar_lea.sflag [#allocation4], %s3475_s27 }
 0x5b6   : > { %p4573_p2 = pnand %p4576_p1, %p4970_p6 }
 0x5b8   : > { %4820 = dma.done.wait (!%p4573_p2), %s3476_s16, 4096  }
 0x5b9   : > { %4822 = vsyncadd (!%p4573_p2), %s3476_s16, 4294963200  ;;  %s6721_s24 = sld [smem:[#allocation9_spill]]  ;;  %s6722_s17 = sld [smem:[#allocation7_spill]] }
 0x5ba   : > { %s6723_s23 = sld [smem:[#allocation10_spill]]  ;;  %s6724_s21 = smov %s4829_s22 }
 0x5bf   : > { %p26_p3 = scmp.ge.s32.totalorder %s6721_s24, 4   ;;  %s6725_s22 = smov %s6722_s17 }
 0x5c1   :  { %28 = sbr.rel (!%p26_p3) target bundleno = 6 (0x6), region = 125 }
 0x5c8   :  { %3481 = vsyncpa [#allocation4], 1 }
 0x5c9   :  { %3483 = vsyncpa [#allocation4 + $0x1], 1 }

</bundles_post_ra>
